<compile_context>
chip_gen: v6e
topology: v6e:2x2x1
jax: 0.10.0
libtpu: 0.0.40
codegen_flags: <defaults>
</compile_context>

<pallas_src>
import functools

import jax
import jax.numpy as jnp
from jax.experimental import pallas as pl
from jax.experimental.pallas import tpu as pltpu

EPS = 1e-5
NEG_SLOPE = 0.2
LANE = 128
XOFF = 8   # interior column offset in the padded scratch (sublane-aligned store)


def _residual_block_kernel(x_ref, w1_ref, aff1_ref, w2_ref, aff2_ref, o_ref,
                           xp_ref, slab_ref, *, H, W, C):
    """Fully fused residual block for one batch element.

    x_ref    : (H, W, C)           input plane (input dtype, C lane-padded)
    w*_ref   : (9*C, C)            conv weights, rows ordered (ky, kx, cin)
    aff*_ref : (2, C)    f32       packed [gamma, beta] (conv bias cancelled by IN)
    o_ref    : (H, W, C)           output plane
    xp_ref   : (H+2, XOFF+W+1, C)  reflect-padded activation scratch (input dtype);
                                   interior at columns [XOFF, XOFF+W), halos at
                                   columns XOFF-1 and XOFF+W.
    slab_ref : (H, W, 9*C)         im2col slab scratch (input dtype)
    """
    cdt = xp_ref.dtype
    HW = H * W
    inv_n = 1.0 / HW

    def reflect_pad(src):
        # src: Ref or array of shape (H, W, C), dtype cdt.  ReflectionPad2d(1).
        xp_ref[1:H + 1, XOFF:XOFF + W, :] = src[...]
        xp_ref[0:1, XOFF:XOFF + W, :] = src[1:2, :, :]                  # top    <- row 1
        xp_ref[H + 1:H + 2, XOFF:XOFF + W, :] = src[H - 2:H - 1, :, :]  # bottom <- row H-2
        # Left/right halo columns (corners included) from already-filled columns.
        xp_ref[:, XOFF - 1:XOFF, :] = xp_ref[:, XOFF + 1:XOFF + 2, :]
        xp_ref[:, XOFF + W:XOFF + W + 1, :] = xp_ref[:, XOFF + W - 2:XOFF + W - 1, :]

    def conv3x3(w):
        # Build the full 9-tap im2col slab (input dtype), then ONE fat MXU
        # matmul: (H*W, 9C) x (9C, C) with f32 accumulation.
        for ky in range(3):
            for kx in range(3):
                t = ky * 3 + kx
                slab_ref[:, :, t * C:(t + 1) * C] = \
                    xp_ref[ky:ky + H, XOFF - 1 + kx:XOFF - 1 + kx + W, :]
        return jnp.dot(slab_ref[...].reshape(HW, 9 * C), w,
                       preferred_element_type=jnp.float32)              # (HW, C) f32

    def instance_norm(acc, aff):
        # Single-pass statistics (sum & sum-of-squares), biased variance like
        # PyTorch; normalize + affine folded into one scale/shift pass.
        mean = jnp.sum(acc, axis=0, keepdims=True) * inv_n
        var = jnp.maximum(
            jnp.sum(acc * acc, axis=0, keepdims=True) * inv_n - mean * mean, 0.0)
        scale = aff[0:1, :] * jax.lax.rsqrt(var + EPS)
        shift = aff[1:2, :] - mean * scale
        return acc * scale + shift

    # --- conv1 + IN1 + LeakyReLU(0.2) (pad filled straight from x_ref) ---
    reflect_pad(x_ref)
    y = instance_norm(conv3x3(w1_ref[...]), aff1_ref[...])
    y = jnp.where(y >= 0.0, y, NEG_SLOPE * y)

    # --- conv2 + IN2 + residual add (x_ref re-read only here) ---
    reflect_pad(y.reshape(H, W, C).astype(cdt))
    y = instance_norm(conv3x3(w2_ref[...]), aff2_ref[...])
    o_ref[...] = (y.reshape(H, W, C)
                  + x_ref[...].astype(jnp.float32)).astype(o_ref.dtype)


def residual_block_forward(x_nchw, params):
    """params: w1, w2: (3, 3, C, C) HWIO; g*, bt*: (C,).  Conv biases (b1/b2)
    are accepted but unused: a per-channel bias is exactly cancelled by
    InstanceNorm's per-channel spatial mean subtraction."""
    x = jnp.transpose(x_nchw, (0, 2, 3, 1))              # NCHW -> NHWC
    N, H, W, C = x.shape                                  # needs H >= 2, W >= 2
    cdt = x.dtype
    Cp = ((C + LANE - 1) // LANE) * LANE                  # lane-pad channels

    def pad_c(a, axis):
        if Cp == C:
            return a
        pad = [(0, 0)] * a.ndim
        pad[axis] = (0, Cp - C)
        return jnp.pad(a, pad)

    xpad = pad_c(x, 3)

    def pack_w(w):
        # HWIO (3,3,C,C) -> lane-pad both channel dims -> (9*Cp, Cp); rows
        # ordered (ky, kx, cin) to match the kernel's im2col slab layout.
        return pad_c(pad_c(w, 2), 3).reshape(9 * Cp, Cp).astype(cdt)

    w1 = pack_w(params["w1"])
    w2 = pack_w(params["w2"])
    aff1 = pad_c(jnp.stack([params["g1"], params["bt1"]]).astype(jnp.float32), 1)
    aff2 = pad_c(jnp.stack([params["g2"], params["bt2"]]).astype(jnp.float32), 1)

    # VMEM budget: I/O blocks (double-buffered) + scratches + weights + f32 temps.
    itemsize = jnp.dtype(cdt).itemsize
    vmem_est = (
        4 * H * W * Cp * itemsize                         # in/out blocks, x2 buffers
        + (H + 2) * (XOFF + W + 1) * Cp * itemsize        # padded-activation scratch
        + 9 * H * W * Cp * itemsize                       # im2col slab scratch
        + 2 * 2 * (9 * Cp * Cp * itemsize + 2 * Cp * 4)   # weights + affine, x2 buffers
        + 4 * H * W * Cp * 4                              # live f32 temporaries
    )
    try:
        vmem_cap = int(pltpu.get_tpu_info().vmem_capacity_bytes)
    except Exception:
        vmem_cap = 64 * 1024 * 1024
    vmem_limit = int(min(max(int(1.3 * vmem_est), 32 * 1024 * 1024),
                         int(0.85 * vmem_cap)))           # ~15% headroom for Mosaic

    plane_spec = pl.BlockSpec((None, H, W, Cp), lambda n: (n, 0, 0, 0))
    w_spec = pl.BlockSpec((9 * Cp, Cp), lambda n: (0, 0))
    aff_spec = pl.BlockSpec((2, Cp), lambda n: (0, 0))

    out = pl.pallas_call(
        functools.partial(_residual_block_kernel, H=H, W=W, C=Cp),
        out_shape=jax.ShapeDtypeStruct((N, H, W, Cp), cdt),
        grid=(N,),
        in_specs=[plane_spec, w_spec, aff_spec, w_spec, aff_spec],
        out_specs=plane_spec,
        scratch_shapes=[
            pltpu.VMEM((H + 2, XOFF + W + 1, Cp), cdt),   # reflect-padded activation
            pltpu.VMEM((H, W, 9 * Cp), cdt),              # im2col slab
        ],
        compiler_params=pltpu.CompilerParams(
            dimension_semantics=("parallel",),
            vmem_limit_bytes=vmem_limit),
    )(xpad, w1, aff1, w2, aff2)

    if Cp != C:
        out = out[..., :C]
    return jnp.transpose(out, (0, 3, 1, 2))               # NHWC -> NCHW


# ---------------- pure-JAX reference (correctness sanity check) ----------------
def _ref_conv(x_nhwc, w_hwio, b):
    xp = jnp.pad(x_nhwc, ((0, 0), (1, 1), (1, 1), (0, 0)), mode="reflect")
    y = jax.lax.conv_general_dilated(
        xp, w_hwio, window_strides=(1, 1), padding="VALID",
        dimension_numbers=("NHWC", "HWIO", "NHWC"))
    return y + b.reshape(1, 1, 1, -1)


def _ref_instance_norm(y, gamma, beta):
    mean = jnp.mean(y, axis=(1, 2), keepdims=True)
    var = jnp.mean(jnp.square(y - mean), axis=(1, 2), keepdims=True)
    return (y - mean) * jax.lax.rsqrt(var + EPS) * gamma.reshape(1, 1, 1, -1) \
        + beta.reshape(1, 1, 1, -1)


def residual_block_reference(x_nchw, params):
    x = jnp.transpose(x_nchw, (0, 2, 3, 1))
    y = _ref_conv(x, params["w1"], params["b1"])
    y = _ref_instance_norm(y, params["g1"], params["bt1"])
    y = jnp.where(y >= 0.0, y, NEG_SLOPE * y)
    y = _ref_conv(y, params["w2"], params["b2"])
    y = _ref_instance_norm(y, params["g2"], params["bt2"])
    y = y + x
    return jnp.transpose(y, (0, 3, 1, 2))


if __name__ == "__main__":
    N, C, H, W = 2, 4, 16, 16
    key = jax.random.PRNGKey(0)
    keys = jax.random.split(key, 9)

    x = jax.random.normal(keys[0], (N, C, H, W), jnp.float32)

    # Conv2d weights in HWIO layout (PyTorch OIHW -> transpose(2, 3, 1, 0)).
    params = {
        "w1": 0.1 * jax.random.normal(keys[1], (3, 3, C, C), jnp.float32),
        "b1": 0.1 * jax.random.normal(keys[2], (C,), jnp.float32),
        "g1": 1.0 + 0.1 * jax.random.normal(keys[3], (C,), jnp.float32),
        "bt1": 0.1 * jax.random.normal(keys[4], (C,), jnp.float32),
        "w2": 0.1 * jax.random.normal(keys[5], (3, 3, C, C), jnp.float32),
        "b2": 0.1 * jax.random.normal(keys[6], (C,), jnp.float32),
        "g2": 1.0 + 0.1 * jax.random.normal(keys[7], (C,), jnp.float32),
        "bt2": 0.1 * jax.random.normal(keys[8], (C,), jnp.float32),
    }

    out = jax.block_until_ready(residual_block_forward(x, params))
    ref = jax.block_until_ready(residual_block_reference(x, params))

    assert out.shape == (N, C, H, W)
    assert out.dtype == x.dtype
    assert jnp.allclose(out, ref, atol=1e-2, rtol=1e-2), \
        float(jnp.max(jnp.abs(out - ref)))
    print("KERNEL_OK")
</pallas_src>

<mosaic_0001>
module attributes {stable_mosaic.version = 11 : i64} {
  func.func @_residual_block_kernel(%arg0: i32, %arg1: memref<1x16x16x128xf32, #tpu.memory_space<vmem>>, %arg2: memref<1152x128xf32, #tpu.memory_space<vmem>>, %arg3: memref<2x128xf32, #tpu.memory_space<vmem>>, %arg4: memref<1152x128xf32, #tpu.memory_space<vmem>>, %arg5: memref<2x128xf32, #tpu.memory_space<vmem>>, %arg6: memref<1x16x16x128xf32, #tpu.memory_space<vmem>>, %arg7: memref<18x25x128xf32, #tpu.memory_space<vmem>>, %arg8: memref<16x16x1152xf32, #tpu.memory_space<vmem>>) attributes {dimension_semantics = [#tpu.dimension_semantics<parallel>], iteration_bounds = array<i64: 2>, scalar_prefetch = 0 : i64, scratch_operands = 2 : i64, tpu.core_type = #tpu.core_type<tc>, window_params = [{transform_indices = @transform_0, window_bounds = array<i64: 1, 16, 16, 128>}, {pipeline_mode = #tpu.pipeline_mode<synchronous>, transform_indices = @transform_1, window_bounds = array<i64: 1152, 128>}, {pipeline_mode = #tpu.pipeline_mode<synchronous>, transform_indices = @transform_2, window_bounds = array<i64: 2, 128>}, {pipeline_mode = #tpu.pipeline_mode<synchronous>, transform_indices = @transform_3, window_bounds = array<i64: 1152, 128>}, {pipeline_mode = #tpu.pipeline_mode<synchronous>, transform_indices = @transform_4, window_bounds = array<i64: 2, 128>}, {transform_indices = @transform_5, window_bounds = array<i64: 1, 16, 16, 128>}]} {
    %c0 = arith.constant 0 : index
    %c0_0 = arith.constant 0 : index
    %c0_1 = arith.constant 0 : index
    %c0_2 = arith.constant 0 : index
    %0 = vector.load %arg1[%c0, %c0_0, %c0_1, %c0_2] : memref<1x16x16x128xf32, #tpu.memory_space<vmem>>, vector<1x16x16x128xf32>
    %1 = vector.shape_cast %0 : vector<1x16x16x128xf32> to vector<16x16x128xf32>
    %c1 = arith.constant 1 : index
    %c8 = arith.constant 8 : index
    %c0_3 = arith.constant 0 : index
    %2 = vector.load %arg7[%c1, %c8, %c0_3] : memref<18x25x128xf32, #tpu.memory_space<vmem>>, vector<16x16x128xf32>
    tpu.vector_store %arg7[%c1, %c8, %c0_3], %1 {strides = array<i32>} : memref<18x25x128xf32, #tpu.memory_space<vmem>>, vector<16x16x128xf32>,
    %c0_4 = arith.constant 0 : index
    %c1_5 = arith.constant 1 : index
    %c0_6 = arith.constant 0 : index
    %c0_7 = arith.constant 0 : index
    %3 = vector.load %arg1[%c0_4, %c1_5, %c0_6, %c0_7] : memref<1x16x16x128xf32, #tpu.memory_space<vmem>>, vector<1x1x16x128xf32>
    %4 = vector.shape_cast %3 : vector<1x1x16x128xf32> to vector<1x16x128xf32>
    %c0_8 = arith.constant 0 : index
    %c8_9 = arith.constant 8 : index
    %c0_10 = arith.constant 0 : index
    %5 = vector.load %arg7[%c0_8, %c8_9, %c0_10] : memref<18x25x128xf32, #tpu.memory_space<vmem>>, vector<1x16x128xf32>
    tpu.vector_store %arg7[%c0_8, %c8_9, %c0_10], %4 {strides = array<i32>} : memref<18x25x128xf32, #tpu.memory_space<vmem>>, vector<1x16x128xf32>,
    %c0_11 = arith.constant 0 : index
    %c14 = arith.constant 14 : index
    %c0_12 = arith.constant 0 : index
    %c0_13 = arith.constant 0 : index
    %6 = vector.load %arg1[%c0_11, %c14, %c0_12, %c0_13] : memref<1x16x16x128xf32, #tpu.memory_space<vmem>>, vector<1x1x16x128xf32>
    %7 = vector.shape_cast %6 : vector<1x1x16x128xf32> to vector<1x16x128xf32>
    %c17 = arith.constant 17 : index
    %c8_14 = arith.constant 8 : index
    %c0_15 = arith.constant 0 : index
    %8 = vector.load %arg7[%c17, %c8_14, %c0_15] : memref<18x25x128xf32, #tpu.memory_space<vmem>>, vector<1x16x128xf32>
    tpu.vector_store %arg7[%c17, %c8_14, %c0_15], %7 {strides = array<i32>} : memref<18x25x128xf32, #tpu.memory_space<vmem>>, vector<1x16x128xf32>,
    %c0_16 = arith.constant 0 : index
    %c9 = arith.constant 9 : index
    %c0_17 = arith.constant 0 : index
    %9 = vector.load %arg7[%c0_16, %c9, %c0_17] : memref<18x25x128xf32, #tpu.memory_space<vmem>>, vector<18x1x128xf32>
    %c0_18 = arith.constant 0 : index
    %c7 = arith.constant 7 : index
    %c0_19 = arith.constant 0 : index
    %10 = vector.load %arg7[%c0_18, %c7, %c0_19] : memref<18x25x128xf32, #tpu.memory_space<vmem>>, vector<18x1x128xf32>
    tpu.vector_store %arg7[%c0_18, %c7, %c0_19], %9 {strides = array<i32>} : memref<18x25x128xf32, #tpu.memory_space<vmem>>, vector<18x1x128xf32>,
    %c0_20 = arith.constant 0 : index
    %c22 = arith.constant 22 : index
    %c0_21 = arith.constant 0 : index
    %11 = vector.load %arg7[%c0_20, %c22, %c0_21] : memref<18x25x128xf32, #tpu.memory_space<vmem>>, vector<18x1x128xf32>
    %c0_22 = arith.constant 0 : index
    %c24 = arith.constant 24 : index
    %c0_23 = arith.constant 0 : index
    %12 = vector.load %arg7[%c0_22, %c24, %c0_23] : memref<18x25x128xf32, #tpu.memory_space<vmem>>, vector<18x1x128xf32>
    tpu.vector_store %arg7[%c0_22, %c24, %c0_23], %11 {strides = array<i32>} : memref<18x25x128xf32, #tpu.memory_space<vmem>>, vector<18x1x128xf32>,
    %c0_24 = arith.constant 0 : index
    %c0_25 = arith.constant 0 : index
    %13 = vector.load %arg2[%c0_24, %c0_25] : memref<1152x128xf32, #tpu.memory_space<vmem>>, vector<1152x128xf32>
    %c0_26 = arith.constant 0 : index
    %c7_27 = arith.constant 7 : index
    %c0_28 = arith.constant 0 : index
    %14 = vector.load %arg7[%c0_26, %c7_27, %c0_28] : memref<18x25x128xf32, #tpu.memory_space<vmem>>, vector<16x16x128xf32>
    %c0_29 = arith.constant 0 : index
    %c0_30 = arith.constant 0 : index
    %c0_31 = arith.constant 0 : index
    %15 = vector.load %arg8[%c0_29, %c0_30, %c0_31] : memref<16x16x1152xf32, #tpu.memory_space<vmem>>, vector<16x16x128xf32>
    tpu.vector_store %arg8[%c0_29, %c0_30, %c0_31], %14 {strides = array<i32>} : memref<16x16x1152xf32, #tpu.memory_space<vmem>>, vector<16x16x128xf32>,
    %c0_32 = arith.constant 0 : index
    %c8_33 = arith.constant 8 : index
    %c0_34 = arith.constant 0 : index
    %16 = vector.load %arg7[%c0_32, %c8_33, %c0_34] : memref<18x25x128xf32, #tpu.memory_space<vmem>>, vector<16x16x128xf32>
    %c0_35 = arith.constant 0 : index
    %c0_36 = arith.constant 0 : index
    %c128 = arith.constant 128 : index
    %17 = vector.load %arg8[%c0_35, %c0_36, %c128] : memref<16x16x1152xf32, #tpu.memory_space<vmem>>, vector<16x16x128xf32>
    tpu.vector_store %arg8[%c0_35, %c0_36, %c128], %16 {strides = array<i32>} : memref<16x16x1152xf32, #tpu.memory_space<vmem>>, vector<16x16x128xf32>,
    %c0_37 = arith.constant 0 : index
    %c9_38 = arith.constant 9 : index
    %c0_39 = arith.constant 0 : index
    %18 = vector.load %arg7[%c0_37, %c9_38, %c0_39] : memref<18x25x128xf32, #tpu.memory_space<vmem>>, vector<16x16x128xf32>
    %c0_40 = arith.constant 0 : index
    %c0_41 = arith.constant 0 : index
    %c256 = arith.constant 256 : index
    %19 = vector.load %arg8[%c0_40, %c0_41, %c256] : memref<16x16x1152xf32, #tpu.memory_space<vmem>>, vector<16x16x128xf32>
    tpu.vector_store %arg8[%c0_40, %c0_41, %c256], %18 {strides = array<i32>} : memref<16x16x1152xf32, #tpu.memory_space<vmem>>, vector<16x16x128xf32>,
    %c1_42 = arith.constant 1 : index
    %c7_43 = arith.constant 7 : index
    %c0_44 = arith.constant 0 : index
    %20 = vector.load %arg7[%c1_42, %c7_43, %c0_44] : memref<18x25x128xf32, #tpu.memory_space<vmem>>, vector<16x16x128xf32>
    %c0_45 = arith.constant 0 : index
    %c0_46 = arith.constant 0 : index
    %c384 = arith.constant 384 : index
    %21 = vector.load %arg8[%c0_45, %c0_46, %c384] : memref<16x16x1152xf32, #tpu.memory_space<vmem>>, vector<16x16x128xf32>
    tpu.vector_store %arg8[%c0_45, %c0_46, %c384], %20 {strides = array<i32>} : memref<16x16x1152xf32, #tpu.memory_space<vmem>>, vector<16x16x128xf32>,
    %c1_47 = arith.constant 1 : index
    %c8_48 = arith.constant 8 : index
    %c0_49 = arith.constant 0 : index
    %22 = vector.load %arg7[%c1_47, %c8_48, %c0_49] : memref<18x25x128xf32, #tpu.memory_space<vmem>>, vector<16x16x128xf32>
    %c0_50 = arith.constant 0 : index
    %c0_51 = arith.constant 0 : index
    %c512 = arith.constant 512 : index
    %23 = vector.load %arg8[%c0_50, %c0_51, %c512] : memref<16x16x1152xf32, #tpu.memory_space<vmem>>, vector<16x16x128xf32>
    tpu.vector_store %arg8[%c0_50, %c0_51, %c512], %22 {strides = array<i32>} : memref<16x16x1152xf32, #tpu.memory_space<vmem>>, vector<16x16x128xf32>,
    %c1_52 = arith.constant 1 : index
    %c9_53 = arith.constant 9 : index
    %c0_54 = arith.constant 0 : index
    %24 = vector.load %arg7[%c1_52, %c9_53, %c0_54] : memref<18x25x128xf32, #tpu.memory_space<vmem>>, vector<16x16x128xf32>
    %c0_55 = arith.constant 0 : index
    %c0_56 = arith.constant 0 : index
    %c640 = arith.constant 640 : index
    %25 = vector.load %arg8[%c0_55, %c0_56, %c640] : memref<16x16x1152xf32, #tpu.memory_space<vmem>>, vector<16x16x128xf32>
    tpu.vector_store %arg8[%c0_55, %c0_56, %c640], %24 {strides = array<i32>} : memref<16x16x1152xf32, #tpu.memory_space<vmem>>, vector<16x16x128xf32>,
    %c2 = arith.constant 2 : index
    %c7_57 = arith.constant 7 : index
    %c0_58 = arith.constant 0 : index
    %26 = vector.load %arg7[%c2, %c7_57, %c0_58] : memref<18x25x128xf32, #tpu.memory_space<vmem>>, vector<16x16x128xf32>
    %c0_59 = arith.constant 0 : index
    %c0_60 = arith.constant 0 : index
    %c768 = arith.constant 768 : index
    %27 = vector.load %arg8[%c0_59, %c0_60, %c768] : memref<16x16x1152xf32, #tpu.memory_space<vmem>>, vector<16x16x128xf32>
    tpu.vector_store %arg8[%c0_59, %c0_60, %c768], %26 {strides = array<i32>} : memref<16x16x1152xf32, #tpu.memory_space<vmem>>, vector<16x16x128xf32>,
    %c2_61 = arith.constant 2 : index
    %c8_62 = arith.constant 8 : index
    %c0_63 = arith.constant 0 : index
    %28 = vector.load %arg7[%c2_61, %c8_62, %c0_63] : memref<18x25x128xf32, #tpu.memory_space<vmem>>, vector<16x16x128xf32>
    %c0_64 = arith.constant 0 : index
    %c0_65 = arith.constant 0 : index
    %c896 = arith.constant 896 : index
    %29 = vector.load %arg8[%c0_64, %c0_65, %c896] : memref<16x16x1152xf32, #tpu.memory_space<vmem>>, vector<16x16x128xf32>
    tpu.vector_store %arg8[%c0_64, %c0_65, %c896], %28 {strides = array<i32>} : memref<16x16x1152xf32, #tpu.memory_space<vmem>>, vector<16x16x128xf32>,
    %c2_66 = arith.constant 2 : index
    %c9_67 = arith.constant 9 : index
    %c0_68 = arith.constant 0 : index
    %30 = vector.load %arg7[%c2_66, %c9_67, %c0_68] : memref<18x25x128xf32, #tpu.memory_space<vmem>>, vector<16x16x128xf32>
    %c0_69 = arith.constant 0 : index
    %c0_70 = arith.constant 0 : index
    %c1024 = arith.constant 1024 : index
    %31 = vector.load %arg8[%c0_69, %c0_70, %c1024] : memref<16x16x1152xf32, #tpu.memory_space<vmem>>, vector<16x16x128xf32>
    tpu.vector_store %arg8[%c0_69, %c0_70, %c1024], %30 {strides = array<i32>} : memref<16x16x1152xf32, #tpu.memory_space<vmem>>, vector<16x16x128xf32>,
    %c0_71 = arith.constant 0 : index
    %c0_72 = arith.constant 0 : index
    %c0_73 = arith.constant 0 : index
    %32 = vector.load %arg8[%c0_71, %c0_72, %c0_73] : memref<16x16x1152xf32, #tpu.memory_space<vmem>>, vector<16x16x1152xf32>
    %33 = vector.shape_cast %32 : vector<16x16x1152xf32> to vector<256x1152xf32>
    %cst = arith.constant dense<0.000000e+00> : vector<256x128xf32>
    %34 = tpu.matmul %33, %13, %cst {dimension_numbers = #tpu.dot_dimension_numbers<[1], [0], [0], [1], [0, 0, 1, 1], [], []>} : vector<256x1152xf32>, vector<1152x128xf32>, vector<256x128xf32> -> vector<256x128xf32>
    %c0_74 = arith.constant 0 : index
    %c0_75 = arith.constant 0 : index
    %35 = vector.load %arg3[%c0_74, %c0_75] : memref<2x128xf32, #tpu.memory_space<vmem>>, vector<2x128xf32>
    %cst_76 = arith.constant dense<0.000000e+00> : vector<128xf32>
    %36 = vector.multi_reduction <add>, %34, %cst_76 [0] : vector<256x128xf32> to vector<128xf32>
    %37 = vector.shape_cast %36 : vector<128xf32> to vector<1x128xf32>
    %cst_77 = arith.constant 3.906250e-03 : f32
    %38 = vector.broadcast %cst_77 : f32 to vector<1x128xf32>
    %39 = arith.mulf %37, %38 : vector<1x128xf32>
    %40 = arith.mulf %34, %34 : vector<256x128xf32>
    %cst_78 = arith.constant dense<0.000000e+00> : vector<128xf32>
    %41 = vector.multi_reduction <add>, %40, %cst_78 [0] : vector<256x128xf32> to vector<128xf32>
    %42 = vector.shape_cast %41 : vector<128xf32> to vector<1x128xf32>
    %cst_79 = arith.constant 3.906250e-03 : f32
    %43 = vector.broadcast %cst_79 : f32 to vector<1x128xf32>
    %44 = arith.mulf %42, %43 : vector<1x128xf32>
    %45 = arith.mulf %39, %39 : vector<1x128xf32>
    %46 = arith.subf %44, %45 : vector<1x128xf32>
    %cst_80 = arith.constant 0.000000e+00 : f32
    %47 = vector.broadcast %cst_80 : f32 to vector<1x128xf32>
    %48 = arith.maximumf %46, %47 : vector<1x128xf32>
    %49 = vector.extract_strided_slice %35 {offsets = [0, 0], sizes = [1, 128], strides = [1, 1]} : vector<2x128xf32> to vector<1x128xf32>
    %cst_81 = arith.constant 9.99999974E-6 : f32
    %50 = vector.broadcast %cst_81 : f32 to vector<1x128xf32>
    %51 = arith.addf %48, %50 : vector<1x128xf32>
    %52 = math.rsqrt %51 : vector<1x128xf32>
    %53 = arith.mulf %49, %52 : vector<1x128xf32>
    %54 = vector.extract_strided_slice %35 {offsets = [1, 0], sizes = [1, 128], strides = [1, 1]} : vector<2x128xf32> to vector<1x128xf32>
    %55 = arith.mulf %39, %53 : vector<1x128xf32>
    %56 = arith.subf %54, %55 : vector<1x128xf32>
    %57 = vector.broadcast %53 : vector<1x128xf32> to vector<256x128xf32>
    %58 = arith.mulf %34, %57 : vector<256x128xf32>
    %59 = vector.broadcast %56 : vector<1x128xf32> to vector<256x128xf32>
    %60 = arith.addf %58, %59 : vector<256x128xf32>
    %cst_82 = arith.constant 0.000000e+00 : f32
    %61 = vector.broadcast %cst_82 : f32 to vector<256x128xf32>
    %62 = arith.cmpf oge, %60, %61 : vector<256x128xf32>
    %cst_83 = arith.constant 2.000000e-01 : f32
    %63 = vector.broadcast %cst_83 : f32 to vector<256x128xf32>
    %64 = arith.mulf %63, %60 : vector<256x128xf32>
    %65 = arith.select %62, %60, %64 : vector<256x128xi1>, vector<256x128xf32>
    %66 = vector.shape_cast %65 : vector<256x128xf32> to vector<16x16x128xf32>
    %c1_84 = arith.constant 1 : index
    %c8_85 = arith.constant 8 : index
    %c0_86 = arith.constant 0 : index
    %67 = vector.load %arg7[%c1_84, %c8_85, %c0_86] : memref<18x25x128xf32, #tpu.memory_space<vmem>>, vector<16x16x128xf32>
    tpu.vector_store %arg7[%c1_84, %c8_85, %c0_86], %66 {strides = array<i32>} : memref<18x25x128xf32, #tpu.memory_space<vmem>>, vector<16x16x128xf32>,
    %68 = vector.extract_strided_slice %66 {offsets = [1, 0, 0], sizes = [1, 16, 128], strides = [1, 1, 1]} : vector<16x16x128xf32> to vector<1x16x128xf32>
    %c0_87 = arith.constant 0 : index
    %c8_88 = arith.constant 8 : index
    %c0_89 = arith.constant 0 : index
    %69 = vector.load %arg7[%c0_87, %c8_88, %c0_89] : memref<18x25x128xf32, #tpu.memory_space<vmem>>, vector<1x16x128xf32>
    tpu.vector_store %arg7[%c0_87, %c8_88, %c0_89], %68 {strides = array<i32>} : memref<18x25x128xf32, #tpu.memory_space<vmem>>, vector<1x16x128xf32>,
    %70 = vector.extract_strided_slice %66 {offsets = [14, 0, 0], sizes = [1, 16, 128], strides = [1, 1, 1]} : vector<16x16x128xf32> to vector<1x16x128xf32>
    %c17_90 = arith.constant 17 : index
    %c8_91 = arith.constant 8 : index
    %c0_92 = arith.constant 0 : index
    %71 = vector.load %arg7[%c17_90, %c8_91, %c0_92] : memref<18x25x128xf32, #tpu.memory_space<vmem>>, vector<1x16x128xf32>
    tpu.vector_store %arg7[%c17_90, %c8_91, %c0_92], %70 {strides = array<i32>} : memref<18x25x128xf32, #tpu.memory_space<vmem>>, vector<1x16x128xf32>,
    %c0_93 = arith.constant 0 : index
    %c9_94 = arith.constant 9 : index
    %c0_95 = arith.constant 0 : index
    %72 = vector.load %arg7[%c0_93, %c9_94, %c0_95] : memref<18x25x128xf32, #tpu.memory_space<vmem>>, vector<18x1x128xf32>
    %c0_96 = arith.constant 0 : index
    %c7_97 = arith.constant 7 : index
    %c0_98 = arith.constant 0 : index
    %73 = vector.load %arg7[%c0_96, %c7_97, %c0_98] : memref<18x25x128xf32, #tpu.memory_space<vmem>>, vector<18x1x128xf32>
    tpu.vector_store %arg7[%c0_96, %c7_97, %c0_98], %72 {strides = array<i32>} : memref<18x25x128xf32, #tpu.memory_space<vmem>>, vector<18x1x128xf32>,
    %c0_99 = arith.constant 0 : index
    %c22_100 = arith.constant 22 : index
    %c0_101 = arith.constant 0 : index
    %74 = vector.load %arg7[%c0_99, %c22_100, %c0_101] : memref<18x25x128xf32, #tpu.memory_space<vmem>>, vector<18x1x128xf32>
    %c0_102 = arith.constant 0 : index
    %c24_103 = arith.constant 24 : index
    %c0_104 = arith.constant 0 : index
    %75 = vector.load %arg7[%c0_102, %c24_103, %c0_104] : memref<18x25x128xf32, #tpu.memory_space<vmem>>, vector<18x1x128xf32>
    tpu.vector_store %arg7[%c0_102, %c24_103, %c0_104], %74 {strides = array<i32>} : memref<18x25x128xf32, #tpu.memory_space<vmem>>, vector<18x1x128xf32>,
    %c0_105 = arith.constant 0 : index
    %c0_106 = arith.constant 0 : index
    %76 = vector.load %arg4[%c0_105, %c0_106] : memref<1152x128xf32, #tpu.memory_space<vmem>>, vector<1152x128xf32>
    %c0_107 = arith.constant 0 : index
    %c7_108 = arith.constant 7 : index
    %c0_109 = arith.constant 0 : index
    %77 = vector.load %arg7[%c0_107, %c7_108, %c0_109] : memref<18x25x128xf32, #tpu.memory_space<vmem>>, vector<16x16x128xf32>
    %c0_110 = arith.constant 0 : index
    %c0_111 = arith.constant 0 : index
    %c0_112 = arith.constant 0 : index
    %78 = vector.load %arg8[%c0_110, %c0_111, %c0_112] : memref<16x16x1152xf32, #tpu.memory_space<vmem>>, vector<16x16x128xf32>
    tpu.vector_store %arg8[%c0_110, %c0_111, %c0_112], %77 {strides = array<i32>} : memref<16x16x1152xf32, #tpu.memory_space<vmem>>, vector<16x16x128xf32>,
    %c0_113 = arith.constant 0 : index
    %c8_114 = arith.constant 8 : index
    %c0_115 = arith.constant 0 : index
    %79 = vector.load %arg7[%c0_113, %c8_114, %c0_115] : memref<18x25x128xf32, #tpu.memory_space<vmem>>, vector<16x16x128xf32>
    %c0_116 = arith.constant 0 : index
    %c0_117 = arith.constant 0 : index
    %c128_118 = arith.constant 128 : index
    %80 = vector.load %arg8[%c0_116, %c0_117, %c128_118] : memref<16x16x1152xf32, #tpu.memory_space<vmem>>, vector<16x16x128xf32>
    tpu.vector_store %arg8[%c0_116, %c0_117, %c128_118], %79 {strides = array<i32>} : memref<16x16x1152xf32, #tpu.memory_space<vmem>>, vector<16x16x128xf32>,
    %c0_119 = arith.constant 0 : index
    %c9_120 = arith.constant 9 : index
    %c0_121 = arith.constant 0 : index
    %81 = vector.load %arg7[%c0_119, %c9_120, %c0_121] : memref<18x25x128xf32, #tpu.memory_space<vmem>>, vector<16x16x128xf32>
    %c0_122 = arith.constant 0 : index
    %c0_123 = arith.constant 0 : index
    %c256_124 = arith.constant 256 : index
    %82 = vector.load %arg8[%c0_122, %c0_123, %c256_124] : memref<16x16x1152xf32, #tpu.memory_space<vmem>>, vector<16x16x128xf32>
    tpu.vector_store %arg8[%c0_122, %c0_123, %c256_124], %81 {strides = array<i32>} : memref<16x16x1152xf32, #tpu.memory_space<vmem>>, vector<16x16x128xf32>,
    %c1_125 = arith.constant 1 : index
    %c7_126 = arith.constant 7 : index
    %c0_127 = arith.constant 0 : index
    %83 = vector.load %arg7[%c1_125, %c7_126, %c0_127] : memref<18x25x128xf32, #tpu.memory_space<vmem>>, vector<16x16x128xf32>
    %c0_128 = arith.constant 0 : index
    %c0_129 = arith.constant 0 : index
    %c384_130 = arith.constant 384 : index
    %84 = vector.load %arg8[%c0_128, %c0_129, %c384_130] : memref<16x16x1152xf32, #tpu.memory_space<vmem>>, vector<16x16x128xf32>
    tpu.vector_store %arg8[%c0_128, %c0_129, %c384_130], %83 {strides = array<i32>} : memref<16x16x1152xf32, #tpu.memory_space<vmem>>, vector<16x16x128xf32>,
    %c1_131 = arith.constant 1 : index
    %c8_132 = arith.constant 8 : index
    %c0_133 = arith.constant 0 : index
    %85 = vector.load %arg7[%c1_131, %c8_132, %c0_133] : memref<18x25x128xf32, #tpu.memory_space<vmem>>, vector<16x16x128xf32>
    %c0_134 = arith.constant 0 : index
    %c0_135 = arith.constant 0 : index
    %c512_136 = arith.constant 512 : index
    %86 = vector.load %arg8[%c0_134, %c0_135, %c512_136] : memref<16x16x1152xf32, #tpu.memory_space<vmem>>, vector<16x16x128xf32>
    tpu.vector_store %arg8[%c0_134, %c0_135, %c512_136], %85 {strides = array<i32>} : memref<16x16x1152xf32, #tpu.memory_space<vmem>>, vector<16x16x128xf32>,
    %c1_137 = arith.constant 1 : index
    %c9_138 = arith.constant 9 : index
    %c0_139 = arith.constant 0 : index
    %87 = vector.load %arg7[%c1_137, %c9_138, %c0_139] : memref<18x25x128xf32, #tpu.memory_space<vmem>>, vector<16x16x128xf32>
    %c0_140 = arith.constant 0 : index
    %c0_141 = arith.constant 0 : index
    %c640_142 = arith.constant 640 : index
    %88 = vector.load %arg8[%c0_140, %c0_141, %c640_142] : memref<16x16x1152xf32, #tpu.memory_space<vmem>>, vector<16x16x128xf32>
    tpu.vector_store %arg8[%c0_140, %c0_141, %c640_142], %87 {strides = array<i32>} : memref<16x16x1152xf32, #tpu.memory_space<vmem>>, vector<16x16x128xf32>,
    %c2_143 = arith.constant 2 : index
    %c7_144 = arith.constant 7 : index
    %c0_145 = arith.constant 0 : index
    %89 = vector.load %arg7[%c2_143, %c7_144, %c0_145] : memref<18x25x128xf32, #tpu.memory_space<vmem>>, vector<16x16x128xf32>
    %c0_146 = arith.constant 0 : index
    %c0_147 = arith.constant 0 : index
    %c768_148 = arith.constant 768 : index
    %90 = vector.load %arg8[%c0_146, %c0_147, %c768_148] : memref<16x16x1152xf32, #tpu.memory_space<vmem>>, vector<16x16x128xf32>
    tpu.vector_store %arg8[%c0_146, %c0_147, %c768_148], %89 {strides = array<i32>} : memref<16x16x1152xf32, #tpu.memory_space<vmem>>, vector<16x16x128xf32>,
    %c2_149 = arith.constant 2 : index
    %c8_150 = arith.constant 8 : index
    %c0_151 = arith.constant 0 : index
    %91 = vector.load %arg7[%c2_149, %c8_150, %c0_151] : memref<18x25x128xf32, #tpu.memory_space<vmem>>, vector<16x16x128xf32>
    %c0_152 = arith.constant 0 : index
    %c0_153 = arith.constant 0 : index
    %c896_154 = arith.constant 896 : index
    %92 = vector.load %arg8[%c0_152, %c0_153, %c896_154] : memref<16x16x1152xf32, #tpu.memory_space<vmem>>, vector<16x16x128xf32>
    tpu.vector_store %arg8[%c0_152, %c0_153, %c896_154], %91 {strides = array<i32>} : memref<16x16x1152xf32, #tpu.memory_space<vmem>>, vector<16x16x128xf32>,
    %c2_155 = arith.constant 2 : index
    %c9_156 = arith.constant 9 : index
    %c0_157 = arith.constant 0 : index
    %93 = vector.load %arg7[%c2_155, %c9_156, %c0_157] : memref<18x25x128xf32, #tpu.memory_space<vmem>>, vector<16x16x128xf32>
    %c0_158 = arith.constant 0 : index
    %c0_159 = arith.constant 0 : index
    %c1024_160 = arith.constant 1024 : index
    %94 = vector.load %arg8[%c0_158, %c0_159, %c1024_160] : memref<16x16x1152xf32, #tpu.memory_space<vmem>>, vector<16x16x128xf32>
    tpu.vector_store %arg8[%c0_158, %c0_159, %c1024_160], %93 {strides = array<i32>} : memref<16x16x1152xf32, #tpu.memory_space<vmem>>, vector<16x16x128xf32>,
    %c0_161 = arith.constant 0 : index
    %c0_162 = arith.constant 0 : index
    %c0_163 = arith.constant 0 : index
    %95 = vector.load %arg8[%c0_161, %c0_162, %c0_163] : memref<16x16x1152xf32, #tpu.memory_space<vmem>>, vector<16x16x1152xf32>
    %96 = vector.shape_cast %95 : vector<16x16x1152xf32> to vector<256x1152xf32>
    %cst_164 = arith.constant dense<0.000000e+00> : vector<256x128xf32>
    %97 = tpu.matmul %96, %76, %cst_164 {dimension_numbers = #tpu.dot_dimension_numbers<[1], [0], [0], [1], [0, 0, 1, 1], [], []>} : vector<256x1152xf32>, vector<1152x128xf32>, vector<256x128xf32> -> vector<256x128xf32>
    %c0_165 = arith.constant 0 : index
    %c0_166 = arith.constant 0 : index
    %98 = vector.load %arg5[%c0_165, %c0_166] : memref<2x128xf32, #tpu.memory_space<vmem>>, vector<2x128xf32>
    %cst_167 = arith.constant dense<0.000000e+00> : vector<128xf32>
    %99 = vector.multi_reduction <add>, %97, %cst_167 [0] : vector<256x128xf32> to vector<128xf32>
    %100 = vector.shape_cast %99 : vector<128xf32> to vector<1x128xf32>
    %cst_168 = arith.constant 3.906250e-03 : f32
    %101 = vector.broadcast %cst_168 : f32 to vector<1x128xf32>
    %102 = arith.mulf %100, %101 : vector<1x128xf32>
    %103 = arith.mulf %97, %97 : vector<256x128xf32>
    %cst_169 = arith.constant dense<0.000000e+00> : vector<128xf32>
    %104 = vector.multi_reduction <add>, %103, %cst_169 [0] : vector<256x128xf32> to vector<128xf32>
    %105 = vector.shape_cast %104 : vector<128xf32> to vector<1x128xf32>
    %cst_170 = arith.constant 3.906250e-03 : f32
    %106 = vector.broadcast %cst_170 : f32 to vector<1x128xf32>
    %107 = arith.mulf %105, %106 : vector<1x128xf32>
    %108 = arith.mulf %102, %102 : vector<1x128xf32>
    %109 = arith.subf %107, %108 : vector<1x128xf32>
    %cst_171 = arith.constant 0.000000e+00 : f32
    %110 = vector.broadcast %cst_171 : f32 to vector<1x128xf32>
    %111 = arith.maximumf %109, %110 : vector<1x128xf32>
    %112 = vector.extract_strided_slice %98 {offsets = [0, 0], sizes = [1, 128], strides = [1, 1]} : vector<2x128xf32> to vector<1x128xf32>
    %cst_172 = arith.constant 9.99999974E-6 : f32
    %113 = vector.broadcast %cst_172 : f32 to vector<1x128xf32>
    %114 = arith.addf %111, %113 : vector<1x128xf32>
    %115 = math.rsqrt %114 : vector<1x128xf32>
    %116 = arith.mulf %112, %115 : vector<1x128xf32>
    %117 = vector.extract_strided_slice %98 {offsets = [1, 0], sizes = [1, 128], strides = [1, 1]} : vector<2x128xf32> to vector<1x128xf32>
    %118 = arith.mulf %102, %116 : vector<1x128xf32>
    %119 = arith.subf %117, %118 : vector<1x128xf32>
    %120 = vector.broadcast %116 : vector<1x128xf32> to vector<256x128xf32>
    %121 = arith.mulf %97, %120 : vector<256x128xf32>
    %122 = vector.broadcast %119 : vector<1x128xf32> to vector<256x128xf32>
    %123 = arith.addf %121, %122 : vector<256x128xf32>
    %124 = vector.shape_cast %123 : vector<256x128xf32> to vector<16x16x128xf32>
    %c0_173 = arith.constant 0 : index
    %c0_174 = arith.constant 0 : index
    %c0_175 = arith.constant 0 : index
    %c0_176 = arith.constant 0 : index
    %125 = vector.load %arg1[%c0_173, %c0_174, %c0_175, %c0_176] : memref<1x16x16x128xf32, #tpu.memory_space<vmem>>, vector<1x16x16x128xf32>
    %126 = vector.shape_cast %125 : vector<1x16x16x128xf32> to vector<16x16x128xf32>
    %127 = arith.addf %124, %126 : vector<16x16x128xf32>
    %c0_177 = arith.constant 0 : index
    %c0_178 = arith.constant 0 : index
    %c0_179 = arith.constant 0 : index
    %c0_180 = arith.constant 0 : index
    %128 = vector.load %arg6[%c0_177, %c0_178, %c0_179, %c0_180] : memref<1x16x16x128xf32, #tpu.memory_space<vmem>>, vector<1x16x16x128xf32>
    %129 = vector.shape_cast %128 : vector<1x16x16x128xf32> to vector<16x16x128xf32>
    %130 = vector.shape_cast %127 : vector<16x16x128xf32> to vector<1x16x16x128xf32>
    tpu.vector_store %arg6[%c0_177, %c0_178, %c0_179, %c0_180], %130 {strides = array<i32>} : memref<1x16x16x128xf32, #tpu.memory_space<vmem>>, vector<1x16x16x128xf32>,
    return
  }
  func.func @transform_0(%arg0: i32) -> (i32, i32, i32, i32) {
    %c0_i32 = arith.constant 0 : i32
    %c0_i32_0 = arith.constant 0 : i32
    %c0_i32_1 = arith.constant 0 : i32
    %c0_i32_2 = arith.constant 0 : i32
    return %arg0, %c0_i32, %c0_i32_0, %c0_i32_1 : i32, i32, i32, i32
  }
  func.func @transform_1(%arg0: i32) -> (i32, i32) {
    %c0_i32 = arith.constant 0 : i32
    %c0_i32_0 = arith.constant 0 : i32
    %c0_i32_1 = arith.constant 0 : i32
    return %c0_i32, %c0_i32_0 : i32, i32
  }
  func.func @transform_2(%arg0: i32) -> (i32, i32) {
    %c0_i32 = arith.constant 0 : i32
    %c0_i32_0 = arith.constant 0 : i32
    %c0_i32_1 = arith.constant 0 : i32
    return %c0_i32, %c0_i32_0 : i32, i32
  }
  func.func @transform_3(%arg0: i32) -> (i32, i32) {
    %c0_i32 = arith.constant 0 : i32
    %c0_i32_0 = arith.constant 0 : i32
    %c0_i32_1 = arith.constant 0 : i32
    return %c0_i32, %c0_i32_0 : i32, i32
  }
  func.func @transform_4(%arg0: i32) -> (i32, i32) {
    %c0_i32 = arith.constant 0 : i32
    %c0_i32_0 = arith.constant 0 : i32
    %c0_i32_1 = arith.constant 0 : i32
    return %c0_i32, %c0_i32_0 : i32, i32
  }
  func.func @transform_5(%arg0: i32) -> (i32, i32, i32, i32) {
    %c0_i32 = arith.constant 0 : i32
    %c0_i32_0 = arith.constant 0 : i32
    %c0_i32_1 = arith.constant 0 : i32
    %c0_i32_2 = arith.constant 0 : i32
    return %arg0, %c0_i32, %c0_i32_0, %c0_i32_1 : i32, i32, i32, i32
  }
}

</mosaic_0001>

<bundles_post_ra>
// kernel: tpu_custom_call.1
= control target key start
LH: loop header
LB: loop body
LE: loop exit
PB: predicated region body
PF: predicated region fallthrough
CT: control target
= control target key end

     0   :  { %10 = vsyncpa [#allocation5], 0  ;;  %s8444_s0 = inlined_call_operand.hbm [shape: f32[2,16,16,128], index: 0, kind: input, shape index: {}]   ;;  %s8445_s1 = inlined_call_operand.hbm [shape: f32[1152,128], index: 1, kind: input, shape index: {}]   ;;  %s8446_s2 = inlined_call_operand.vmem [shape: f32[2,128], index: 2, kind: input, shape index: {}]   ;;  %s8447_s3 = inlined_call_operand.hbm [shape: f32[1152,128], index: 3, kind: input, shape index: {}]   ;;  %s8448_s4 = inlined_call_operand.vmem [shape: f32[2,128], index: 4, kind: input, shape index: {}]   ;;  %s8449_s5 = inlined_call_operand.hbm [shape: f32[2,16,16,128], index: 5, kind: output, shape index: {}]  }
   0x1   :  { %12 = vsyncpa [#allocation5 + $0x1], 0 }
   0x2   :  { %13 = vsyncpa [#allocation8], 0 }
   0x3   :  { %14 = vsyncpa [#allocation6], 0 }
   0x4   :  { %16 = vsyncpa [#allocation6 + $0x1], 0  ;;  %s6045_s18 = smov 0   ;;  %s6047_s19 = smov 0  }
   0x5   :  { %s6049_s20 = smov 0   ;;  %s6051_s21 = smov 0  }
   0x6 LB: > { %s6066_s22 = sadd.s32 4294967295, %s6004_s21   ;;  %s5477_s23 = sadd.s32 4294967294, %s6004_s21   ;;  %s6004_s21 = sphi %s6051_s21, %s8533_s21   ;;  %s6000_s20 = sphi %s6049_s20, %s8532_s20   ;;  %s5996_s19 = sphi %s6047_s19, %s8531_s19   ;;  %s5992_s18 = sphi %s6045_s18, %s8530_s18  }
   0x7   : > { %p42_p0 = scmp.ne.s32.totalorder %s5996_s19, %s5992_s18  ;;  %p8450_p1 = scmp.eq.s32.totalorder %s6066_s22, 0 }
   0x8   : > { %p150_p2 = scmp.eq.s32.totalorder %s6066_s22, 1  ;;  %p156_p3 = scmp.eq.s32.totalorder %s5477_s23, 1 }
   0x9   : > { %p6075_p4 = por %p8450_p1, %p42_p0  ;;  %p5478_p5 = scmp.ge.s32.totalorder %s6004_s21, 1 }
   0xa   : > { %p6080_p6 = por %p156_p3, %p42_p0  ;;  %p163_p7 = scmp.lt.s32.totalorder %s6004_s21, 3 }
   0xb   : > { %s8475_s24 = scalar_select %p6075_p4, 1, 0 }
   0xc   : > { %s8476_s25 = scalar_select %p6080_p6, 1, 0 }
   0xd   : > { %p6085_p8 = pnand %p5478_p5, %p163_p7  ;;  %s6006_s27 = smov [#allocation7]  }
   0xe   : > { %s175_s28 = sshll.u32 %s6006_s27, 4  ;;  %s6007_s30 = smov [#allocation9]   ;;  %s176_s28 = int_to_ptr.vmem [resolvable:$true] %s175_s28 }
   0xf   : > { %s8477_s26 = scalar_select %p6085_p8, 1, 0 }
  0x10   : > { %p5769_p9 = pneg %p6085_p8  ;;  %s191_s6 = sshll.u32 %s6007_s30, 4  ;;  %s192_s6 = int_to_ptr.vmem [resolvable:$true] %s191_s6 }
  0x11   : > { %s5867_s7 = scalar_lea.vmem %s176_s28, 18432  ;;  %p5875_p5 = scmp.lt.s32.totalorder %s176_s28, %s176_s28 }
  0x12   : > { %p6094_p11 = pnand %p5769_p9, %p8450_p1  ;;  %p5868_p13 = scmp.ne.s32.totalorder %s176_s28, %s5867_s7 }
  0x13   : > { %p5876_p7 = scmp.lt.s32.totalorder %s5867_s7, %s5867_s7 }
  0x14   : > { %p5858_p12 = pneg %p6094_p11 }
  0x15   : > { %p5877_p10 = por %p5876_p7, %p5875_p5 }
  0x16   : > { %p5870_p0 = pnand %p5868_p13, %p5858_p12 }
  0x18   : > { %p5871_p3 = pneg %p5870_p0 }
  0x1a   : > { %p5878_p9 = pnand %p5877_p10, %p5871_p3 }
  0x1c   : > { %5881 = shalt.err (!%p5878_p9)
}
  0x1d   : > { %s8451_s8 = smov 128   ;;  %s6009_s9 = smov 8  }
  0x1e   : > { %5772 = dma.hbm_to_vmem [thread:$0]  (!%p6094_p11), %s8445_s1, 18432, %s176_s28, [#allocation8], %s8451_s8, %s8451_s8, %s6009_s9  }
  0x1f   : > { %s5893_s12 = scalar_lea.vmem %s192_s6, 18432  ;;  %p5901_p10 = scmp.lt.s32.totalorder %s192_s6, %s192_s6 }
  0x20   : > { %p5894_p13 = scmp.ne.s32.totalorder %s192_s6, %s5893_s12  ;;  %p5902_p3 = scmp.lt.s32.totalorder %s5893_s12, %s5893_s12 }
  0x22   : > { %p5896_p0 = pnand %p5894_p13, %p5858_p12  ;;  %p5903_p7 = por %p5902_p3, %p5901_p10 }
  0x24   : > { %p5897_p5 = pneg %p5896_p0 }
  0x26   : > { %p5904_p9 = pnand %p5903_p7, %p5897_p5 }
  0x28   : > { %5907 = shalt.err (!%p5904_p9)
}
  0x29   : > { %5775 = dma.hbm_to_vmem [thread:$0]  (!%p6094_p11), %s8447_s3, 18432, %s192_s6, [#allocation8], %s8451_s8, %s8451_s8, %s6009_s9  }
  0x2a   : > { %s6123_s15 = sadd.s32 1, %s6004_s21   ;;  %s29_s16 = sadd.s32 1, %s6000_s20 }
  0x2b   : > { %s26_s17 = ssub.s32 %s6004_s21, %s6123_s15  ;;  %p36_p12 = scmp.ne.s32.totalorder %s6000_s20, %s5996_s19 }
  0x2c   : > { %p27_p13 = scmp.eq.s32.totalorder %s26_s17, 0  ;;  %p37_p0 = scmp.eq.s32.totalorder %s6004_s21, 0 }
  0x2d   : > { %p6133_p5 = por %p150_p2, %p36_p12  ;;  %p5786_p10 = scmp.lt.s32.totalorder %s6004_s21, 2 }
  0x2e   : > { %s6139_s27 = scalar_select %p27_p13, %s6000_s20, %s29_s16  }
  0x2f   : > { %s8479_s23 = scalar_select %p6133_p5, 1, 0 }
  0x30   : > { %p38_p3 = por %p37_p0, %p36_p12  ;;  %s208_s28 = sand.u32 1, %s6000_s20  }
  0x31   : > { %s5482_s29 = sshll.u32 %s208_s28, 8  ;;  %s5499_s30 = sshll.u32 %s6004_s21, 12 }
  0x32   : > { %s6146_s10 = scalar_lea.hbm %s8444_s0, %s5499_s30  ;;  %s212_s11 = scalar_lea.vmem [#allocation4], %s5482_s29 }
  0x33   : > { %s219_s12 = sshll.u32 %s212_s11, 4  ;;  %p6150_p2 = pnand %p5786_p10, %p38_p3  ;;  %s6148_s12 = int_to_ptr.vmem [resolvable:$true] %s219_s12 }
  0x34   : > { %s6154_s14 = scalar_lea.sflag [#allocation5], %s208_s28  ;;  %s5908_s16 = scalar_lea.hbm %s6146_s10, 4096 }
  0x35   : > { %p5909_p11 = scmp.ne.s32.totalorder %s6146_s10, %s5908_s16  ;;  %p5910_p7 = pneg %p6150_p2 }
  0x36   : > { %s5913_s29 = scalar_lea.hbm %s8444_s0, 8192  ;;  %p5914_p13 = scmp.lt.s32.totalorder %s6146_s10, %s8444_s0 }
  0x37   : > { %p5911_p9 = pnand %p5910_p7, %p5909_p11  ;;  %p5915_p0 = scmp.lt.s32.totalorder %s5913_s29, %s5908_s16 }
  0x39   : > { %p5912_p12 = pneg %p5911_p9  ;;  %p5916_p10 = por %p5915_p0, %p5914_p13 }
  0x3b   : > { %p5917_p3 = pnand %p5916_p10, %p5912_p12 }
  0x3d   : > { %5920 = shalt.err (!%p5917_p3)
}
  0x3e   : > { %s5921_s28 = scalar_lea.vmem %s6148_s12, 4096  ;;  %s6010_s11 = smov [#allocation4]  }
  0x3f   : > { %p5922_p1 = scmp.ne.s32.totalorder %s6148_s12, %s5921_s28  ;;  %s5926_s8 = sshll.u32 %s6010_s11, 4  ;;  %s5927_s8 = int_to_ptr.vmem [resolvable:$false] %s5926_s8 }
  0x40   : > { %s5928_s17 = scalar_lea.vmem %s5927_s8, 8192  ;;  %p5929_p9 = scmp.lt.s32.totalorder %s6148_s12, %s5927_s8 }
  0x41   : > { %p5924_p6 = pnand %p5922_p1, %p5910_p7  ;;  %p5930_p5 = scmp.lt.s32.totalorder %s5928_s17, %s5921_s28 }
  0x43   : > { %p5925_p11 = pneg %p5924_p6  ;;  %p5931_p4 = por %p5930_p5, %p5929_p9 }
  0x45   : > { %p5932_p8 = pnand %p5931_p4, %p5925_p11 }
  0x47   : > { %5935 = shalt.err (!%p5932_p8)
}
  0x48   : > { %s8481_s16 = smov 128   ;;  %p8482_p1 = scmp.ne.s32.totalorder %s8477_s26, 0 }
  0x49   : > { %5779 = dma.hbm_to_vmem [thread:$0]  (!%p6150_p2), %s6146_s10, 4096, %s6148_s12, %s6154_s14, %s8481_s16, %s8481_s16, %s6009_s9  }
  0x4a   : > { %231 = sbr.rel (%p8482_p1) target bundleno = 1362 (0x552), region = 40 }
  0x4f   : > { %s6181_s30 = sand.u32 1, %s5996_s19   ;;  %p8483_p4 = scmp.ne.s32.totalorder %s8475_s24, 0 }
  0x50   : > { %s5486_s8 = sshll.u32 %s6181_s30, 8  ;;  %s234_s29 = scalar_lea.sflag [#allocation5], %s6181_s30 }
  0x51   : > { %s6187_s13 = scalar_lea.vmem [#allocation4], %s5486_s8 }
  0x52   : > { %5979 = dma.done.wait (%p8483_p4), %s234_s29, 4096  }
  0x53   : > { %5981 = vsyncadd (%p8483_p4), %s234_s29, 4294963200  ;;  %p8484_p6 = scmp.eq.s32.totalorder %s6066_s22, 0 }
  0x55   : > { %5983 = dma.done.wait (%p8484_p6), [#allocation8], 36864   ;;  %p8485_p8 = pmov %p8484_p6 }
  0x56   : > { %v6011_v0 = vmov 0.0   ;;  %v435_v1 = vld [vmem:[#allocation7 + $0x78] sm:$0xff]  ;;  %v434_v3 = vld [vmem:[#allocation7 + $0x70] sm:$0xff]  ;;  %v433_v5 = vld [vmem:[#allocation7 + $0x68] sm:$0xff]  ;;  %s8255_s12 = scalar_lea.vmem [#allocation10], %s5486_s8  ;;  %s5500_s14 = sshll.u32 %s6066_s22, 12 }
  0x57   : > { %5985 = vsyncadd (%p8485_p8), [#allocation8], 4294930432  ;;  %1429 = vmatprep.subr.mxu0 %v6011_v0  ;;  %1654 = vmatprep.subr.mxu1 %v6011_v0  ;;  %v467_v2 = vld [vmem:[#allocation7 + $0x178] sm:$0xff]  ;;  %v466_v4 = vld [vmem:[#allocation7 + $0x170] sm:$0xff]  ;;  %s5385_s6 = sshll.u32 %s8255_s12, 4  ;;  %s8383_s11 = scalar_lea.hbm %s8449_s5, %s5500_s14  ;;  %s8387_s6 = int_to_ptr.vmem [resolvable:$true] %s5385_s6 }
  0x58   : > { %1430 = vmatpush1.msra.mxu0 %v435_v1  ;;  %1655 = vmatpush1.msra.mxu1 %v467_v2  ;;  %v465_v6 = vld [vmem:[#allocation7 + $0x168] sm:$0xff]  ;;  %v432_v7 = vld [vmem:[#allocation7 + $0x60] sm:$0xff]  ;;  %v431_v9 = vld [vmem:[#allocation7 + $0x58] sm:$0xff]  ;;  %s5372_s22 = scalar_lea.sflag [#allocation6], %s6181_s30  ;;  %s5936_s17 = scalar_lea.vmem %s8387_s6, 4096 }
  0x59   : > { %1431 = vmatprep.subr.mxu0 %v6011_v0  ;;  %1656 = vmatprep.subr.mxu1 %v6011_v0  ;;  %v464_v8 = vld [vmem:[#allocation7 + $0x160] sm:$0xff]  ;;  %v463_v10 = vld [vmem:[#allocation7 + $0x158] sm:$0xff]  ;;  %v430_v11 = vld [vmem:[#allocation7 + $0x50] sm:$0xff]  ;;  %p5937_p5 = scmp.ne.s32.totalorder %s8387_s6, %s5936_s17  ;;  %p8527_p2 = scmp.ne.s32.totalorder %s8479_s23, 0 }
  0x5a   : > { %1432 = vmatpush1.msra.mxu0 %v434_v3  ;;  %1657 = vmatpush1.msra.mxu1 %v466_v4  ;;  %v462_v12 = vld [vmem:[#allocation7 + $0x150] sm:$0xff]  ;;  %v429_v13 = vld [vmem:[#allocation7 + $0x48] sm:$0xff]  ;;  %v428_v15 = vld [vmem:[#allocation7 + $0x40] sm:$0xff]  ;;  %s6012_s16 = smov [#allocation10]  }
  0x5b   : > { %1433 = vmatprep.subr.mxu0 %v6011_v0  ;;  %1658 = vmatprep.subr.mxu1 %v6011_v0  ;;  %v461_v14 = vld [vmem:[#allocation7 + $0x148] sm:$0xff]  ;;  %v460_v16 = vld [vmem:[#allocation7 + $0x140] sm:$0xff]  ;;  %v427_v17 = vld [vmem:[#allocation7 + $0x38] sm:$0xff]  ;;  %p5938_p7 = pnand %p5937_p5, %p8527_p2  ;;  %s5940_s8 = sshll.u32 %s6012_s16, 4  ;;  %s5941_s8 = int_to_ptr.vmem [resolvable:$false] %s5940_s8 }
  0x5c   : > { %1434 = vmatpush1.msra.mxu0 %v433_v5  ;;  %1659 = vmatpush1.msra.mxu1 %v465_v6  ;;  %v459_v18 = vld [vmem:[#allocation7 + $0x138] sm:$0xff]  ;;  %v426_v19 = vld [vmem:[#allocation7 + $0x30] sm:$0xff]  ;;  %v425_v21 = vld [vmem:[#allocation7 + $0x28] sm:$0xff]  ;;  %s5942_s29 = scalar_lea.vmem %s5941_s8, 8192  ;;  %p5943_p13 = scmp.lt.s32.totalorder %s8387_s6, %s5941_s8 }
  0x5d   : > { %1435 = vmatprep.subr.mxu0 %v6011_v0  ;;  %1660 = vmatprep.subr.mxu1 %v6011_v0  ;;  %v458_v20 = vld [vmem:[#allocation7 + $0x130] sm:$0xff]  ;;  %v457_v22 = vld [vmem:[#allocation7 + $0x128] sm:$0xff]  ;;  %v424_v23 = vld [vmem:[#allocation7 + $0x20] sm:$0xff]  ;;  %p5939_p12 = pneg %p5938_p7  ;;  %p5944_p0 = scmp.lt.s32.totalorder %s5942_s29, %s5936_s17 }
  0x5e   : > { %1436 = vmatpush1.msra.mxu0 %v432_v7  ;;  %1661 = vmatpush1.msra.mxu1 %v464_v8  ;;  %v456_v24 = vld [vmem:[#allocation7 + $0x120] sm:$0xff]  ;;  %v423_v25 = vld [vmem:[#allocation7 + $0x18] sm:$0xff]  ;;  %v6220_v26 = vld [vmem:[%s6187_s13 + $0x10] sm:$0xff] }
  0x5f   : > { %1437 = vmatprep.subr.mxu0 %v6011_v0  ;;  %1662 = vmatprep.subr.mxu1 %v6011_v0  ;;  %v6223_v27 = vld [vmem:[%s6187_s13] sm:$0xff]  ;;  %v455_v28 = vld [vmem:[#allocation7 + $0x118] sm:$0xff]  ;;  %340 = vst [vmem:[#allocation2 + $0x8] sm:$0xff] %v6220_v26  ;;  %v6233_v30 = vld [vmem:[%s6187_s13 + $0x8] sm:$0xff]  ;;  %p5945_p10 = por %p5944_p0, %p5943_p13 }
  0x60   : > { %1438 = vmatpush1.msra.mxu0 %v431_v9  ;;  %1663 = vmatpush1.msra.mxu1 %v463_v10  ;;  %305 = vst [vmem:[#allocation2 + $0x28] sm:$0xff] %v6223_v27  ;;  %v6230_v29 = vld [vmem:[%s6187_s13 + $0x18] sm:$0xff]  ;;  %307 = vst [vmem:[#allocation2 + $0x48] sm:$0xff] %v6220_v26  ;;  %v422_v31 = vld [vmem:[#allocation7 + $0x10] sm:$0xff] }
  0x61   : > { %1439 = vmatprep.subr.mxu0 %v6011_v0  ;;  %1664 = vmatprep.subr.mxu1 %v6011_v0  ;;  %341 = vst [vmem:[#allocation2 + $0x10] sm:$0xff] %v6230_v29  ;;  %306 = vst [vmem:[#allocation2 + $0x30] sm:$0xff] %v6233_v30  ;;  %v454_v32 = vld [vmem:[#allocation7 + $0x110] sm:$0xff]  ;;  %v6242_v33 = vld [vmem:[%s6187_s13 + $0x20] sm:$0xff]  ;;  %p5946_p3 = pnand %p5945_p10, %p5939_p12 }
  0x62   : > { %1440 = vmatpush1.msra.mxu0 %v430_v11  ;;  %1665 = vmatpush1.msra.mxu1 %v462_v12  ;;  %308 = vst [vmem:[#allocation2 + $0x50] sm:$0xff] %v6230_v29  ;;  %v6245_v34 = vld [vmem:[%s6187_s13 + $0x28] sm:$0xff]  ;;  %309 = vst [vmem:[#allocation2 + $0x68] sm:$0xff] %v6242_v33  ;;  %v6250_v36 = vld [vmem:[%s6187_s13 + $0x30] sm:$0xff] }
  0x63   : > { %1441 = vmatprep.subr.mxu0 %v6011_v0  ;;  %1666 = vmatprep.subr.mxu1 %v6011_v0  ;;  %v421_v35 = vld [vmem:[#allocation7 + $0x8] sm:$0xff]  ;;  %310 = vst [vmem:[#allocation2 + $0x70] sm:$0xff] %v6245_v34  ;;  %311 = vst [vmem:[#allocation2 + $0x88] sm:$0xff] %v6250_v36  ;;  %v6256_v38 = vld [vmem:[%s6187_s13 + $0x38] sm:$0xff] }
  0x64   : > { %1442 = vmatpush1.msra.mxu0 %v429_v13  ;;  %1667 = vmatpush1.msra.mxu1 %v461_v14  ;;  %v453_v37 = vld [vmem:[#allocation7 + $0x108] sm:$0xff]  ;;  %v6259_v39 = vld [vmem:[%s6187_s13 + $0x40] sm:$0xff]  ;;  %312 = vst [vmem:[#allocation2 + $0x90] sm:$0xff] %v6256_v38  ;;  %v6270_v43 = vld [vmem:[%s6187_s13 + $0x50] sm:$0xff] }
  0x65   : > { %1443 = vmatprep.subr.mxu0 %v6011_v0  ;;  %1668 = vmatprep.subr.mxu1 %v6011_v0  ;;  %v420_v40 = vld [vmem:[#allocation7] sm:$0xff]  ;;  %313 = vst [vmem:[#allocation2 + $0xa8] sm:$0xff] %v6259_v39  ;;  %v6264_v41 = vld [vmem:[%s6187_s13 + $0x48] sm:$0xff]  ;;  %v6273_v44 = vld [vmem:[%s6187_s13 + $0x58] sm:$0xff] }
  0x66   : > { %1444 = vmatpush1.msra.mxu0 %v428_v15  ;;  %1669 = vmatpush1.msra.mxu1 %v460_v16  ;;  %v452_v42 = vld [vmem:[#allocation7 + $0x100] sm:$0xff]  ;;  %314 = vst [vmem:[#allocation2 + $0xb0] sm:$0xff] %v6264_v41  ;;  %v348_v45 = vld [vmem:[#allocation2 + $0x9] sm:$0x1]  ;;  %315 = vst [vmem:[#allocation2 + $0xc8] sm:$0xff] %v6270_v43 }
  0x67   : > { %1445 = vmatprep.subr.mxu0 %v6011_v0  ;;  %1670 = vmatprep.subr.mxu1 %v6011_v0  ;;  %v349_v46 = vld [vmem:[#allocation2 + $0x29] sm:$0x1]  ;;  %316 = vst [vmem:[#allocation2 + $0xd0] sm:$0xff] %v6273_v44  ;;  %v451_v48 = vld [vmem:[#allocation7 + $0xf8] sm:$0xff]  ;;  %366 = vst [vmem:[#allocation2 + $0x7] sm:$0x1] %v348_v45 }
  0x68   : > { %1446 = vmatpush1.msra.mxu0 %v427_v17  ;;  %1671 = vmatpush1.msra.mxu1 %v459_v18  ;;  %v350_v47 = vld [vmem:[#allocation2 + $0x49] sm:$0x1]  ;;  %v483_v49 = vld [vmem:[#allocation7 + $0x1f8] sm:$0xff]  ;;  %367 = vst [vmem:[#allocation2 + $0x27] sm:$0x1] %v349_v46  ;;  %v450_v50 = vld [vmem:[#allocation7 + $0xf0] sm:$0xff] }
  0x69   : > { %1447 = vmatprep.subr.mxu0 %v6011_v0  ;;  %1672 = vmatprep.subr.mxu1 %v6011_v0  ;;  %368 = vst [vmem:[#allocation2 + $0x47] sm:$0x1] %v350_v47  ;;  %v384_v51 = vld [vmem:[#allocation2 + $0x16] sm:$0x1]  ;;  %v351_v54 = vld [vmem:[#allocation2 + $0x69] sm:$0x1] }
  0x6a   : > { %1448 = vmatpush1.msra.mxu0 %v426_v19  ;;  %1673 = vmatpush1.msra.mxu1 %v458_v20  ;;  %v482_v52 = vld [vmem:[#allocation7 + $0x1f0] sm:$0xff]  ;;  %402 = vst [vmem:[#allocation2 + $0x18] sm:$0x1] %v384_v51  ;;  %369 = vst [vmem:[#allocation2 + $0x67] sm:$0x1] %v351_v54  ;;  %v449_v57 = vld [vmem:[#allocation7 + $0xe8] sm:$0xff] }
  0x6b   : > { %1449 = vmatprep.subr.mxu0 %v6011_v0  ;;  %1674 = vmatprep.subr.mxu1 %v6011_v0  ;;  %v385_v53 = vld [vmem:[#allocation2 + $0x36] sm:$0x1]  ;;  %v352_v56 = vld [vmem:[#allocation2 + $0x89] sm:$0x1]  ;;  %v448_v60 = vld [vmem:[#allocation7 + $0xe0] sm:$0xff] }
  0x6c   : > { %1450 = vmatpush1.msra.mxu0 %v425_v21  ;;  %1675 = vmatpush1.msra.mxu1 %v457_v22  ;;  %403 = vst [vmem:[#allocation2 + $0x38] sm:$0x1] %v385_v53  ;;  %v386_v55 = vld [vmem:[#allocation2 + $0x56] sm:$0x1]  ;;  %v481_v58 = vld [vmem:[#allocation7 + $0x1e8] sm:$0xff]  ;;  %v480_v62 = vld [vmem:[#allocation7 + $0x1e0] sm:$0xff] }
  0x6d   : > { %1451 = vmatprep.subr.mxu0 %v6011_v0  ;;  %1676 = vmatprep.subr.mxu1 %v6011_v0  ;;  %404 = vst [vmem:[#allocation2 + $0x58] sm:$0x1] %v386_v55  ;;  %370 = vst [vmem:[#allocation2 + $0x87] sm:$0x1] %v352_v56  ;;  %v387_v59 = vld [vmem:[#allocation2 + $0x76] sm:$0x1] }
  0x6e   : > { %1452 = vmatpush1.msra.mxu0 %v424_v23  ;;  %1677 = vmatpush1.msra.mxu1 %v456_v24  ;;  %405 = vst [vmem:[#allocation2 + $0x78] sm:$0x1] %v387_v59  ;;  %v353_v61 = vld [vmem:[#allocation2 + $0xa9] sm:$0x1]  ;;  %v388_v63 = vld [vmem:[#allocation2 + $0x96] sm:$0x1] }
  0x6f   : > { %1453 = vmatprep.subr.mxu0 %v6011_v0  ;;  %1678 = vmatprep.subr.mxu1 %v6011_v0  ;;  %371 = vst [vmem:[#allocation2 + $0xa7] sm:$0x1] %v353_v61  ;;  %v354_v1 = vld [vmem:[#allocation2 + $0xc9] sm:$0x1]  ;;  %406 = vst [vmem:[#allocation2 + $0x98] sm:$0x1] %v388_v63 }
  0x70   : > { %1454 = vmatpush1.msra.mxu0 %v423_v25  ;;  %1679 = vmatpush1.msra.mxu1 %v455_v28  ;;  %372 = vst [vmem:[#allocation2 + $0xc7] sm:$0x1] %v354_v1  ;;  %v447_v2 = vld [vmem:[#allocation7 + $0xd8] sm:$0xff]  ;;  %v389_v4 = vld [vmem:[#allocation2 + $0xb6] sm:$0x1]  ;;  %v6288_v5 = vld [vmem:[%s6187_s13 + $0x60] sm:$0xff] }
  0x71   : > { %1455 = vmatprep.subr.mxu0 %v6011_v0  ;;  %1680 = vmatprep.subr.mxu1 %v6011_v0  ;;  %v479_v3 = vld [vmem:[#allocation7 + $0x1d8] sm:$0xff]  ;;  %407 = vst [vmem:[#allocation2 + $0xb8] sm:$0x1] %v389_v4  ;;  %v446_v6 = vld [vmem:[#allocation7 + $0xd0] sm:$0xff]  ;;  %317 = vst [vmem:[#allocation2 + $0xe8] sm:$0xff] %v6288_v5 }
  0x72   : > { %1456 = vmatpush1.msra.mxu0 %v422_v31  ;;  %1681 = vmatpush1.msra.mxu1 %v454_v32  ;;  %v478_v7 = vld [vmem:[#allocation7 + $0x1d0] sm:$0xff]  ;;  %v6294_v8 = vld [vmem:[%s6187_s13 + $0x68] sm:$0xff]  ;;  %v444_v13 = vld [vmem:[#allocation7 + $0xc0] sm:$0xff] }
  0x73   : > { %1457 = vmatprep.subr.mxu0 %v6011_v0  ;;  %1682 = vmatprep.subr.mxu1 %v6011_v0  ;;  %v445_v9 = vld [vmem:[#allocation7 + $0xc8] sm:$0xff]  ;;  %318 = vst [vmem:[#allocation2 + $0xf0] sm:$0xff] %v6294_v8  ;;  %v390_v11 = vld [vmem:[#allocation2 + $0xd6] sm:$0x1]  ;;  %v476_v14 = vld [vmem:[#allocation7 + $0x1c0] sm:$0xff] }
  0x74   : > { %1458 = vmatpush1.msra.mxu0 %v421_v35  ;;  %1683 = vmatpush1.msra.mxu1 %v453_v37  ;;  %v477_v10 = vld [vmem:[#allocation7 + $0x1c8] sm:$0xff]  ;;  %408 = vst [vmem:[#allocation2 + $0xd8] sm:$0x1] %v390_v11  ;;  %v6300_v12 = vld [vmem:[%s6187_s13 + $0x70] sm:$0xff]  ;;  %v6306_v15 = vld [vmem:[%s6187_s13 + $0x78] sm:$0xff] }
  0x75   : > { %1459 = vmatprep.subr.mxu0 %v6011_v0  ;;  %1684 = vmatprep.subr.mxu1 %v6011_v0  ;;  %319 = vst [vmem:[#allocation2 + $0x108] sm:$0xff] %v6300_v12  ;;  %320 = vst [vmem:[#allocation2 + $0x110] sm:$0xff] %v6306_v15  ;;  %v6310_v16 = vld [vmem:[%s6187_s13 + $0x80] sm:$0xff]  ;;  %v443_v17 = vld [vmem:[#allocation7 + $0xb8] sm:$0xff] }
  0x76   : > { %1460 = vmatpush1.msra.mxu0 %v420_v40  ;;  %1685 = vmatpush1.msra.mxu1 %v452_v42  ;;  %v475_v18 = vld [vmem:[#allocation7 + $0x1b8] sm:$0xff]  ;;  %321 = vst [vmem:[#allocation2 + $0x128] sm:$0xff] %v6310_v16  ;;  %v6316_v19 = vld [vmem:[%s6187_s13 + $0x88] sm:$0xff]  ;;  %v442_v21 = vld [vmem:[#allocation7 + $0xb0] sm:$0xff] }
  0x77   : > { %1461 = vmatprep.subr.mxu0 %v6011_v0  ;;  %1686 = vmatprep.subr.mxu1 %v6011_v0  ;;  %322 = vst [vmem:[#allocation2 + $0x130] sm:$0xff] %v6316_v19  ;;  %v474_v22 = vld [vmem:[#allocation7 + $0x1b0] sm:$0xff]  ;;  %v441_v25 = vld [vmem:[#allocation7 + $0xa8] sm:$0xff]  ;;  %v6328_v32 = vld [vmem:[%s6187_s13 + $0x98] sm:$0xff] }
  0x78   : > { %1462 = vmatpush2.msra.mxu0 %v451_v48  ;;  %1687 = vmatpush2.msra.mxu1 %v483_v49  ;;  %v355_v20 = vld [vmem:[#allocation2 + $0xe9] sm:$0x1]  ;;  %v6322_v23 = vld [vmem:[%s6187_s13 + $0x90] sm:$0xff]  ;;  %v440_v35 = vld [vmem:[#allocation7 + $0xa0] sm:$0xff]  ;;  %324 = vst [vmem:[#allocation2 + $0x150] sm:$0xff] %v6328_v32 }
  0x79   : > { %1463 = vmatprep.subr.mxu0 %v6011_v0  ;;  %1688 = vmatprep.subr.mxu1 %v6011_v0  ;;  %373 = vst [vmem:[#allocation2 + $0xe7] sm:$0x1] %v355_v20  ;;  %323 = vst [vmem:[#allocation2 + $0x148] sm:$0xff] %v6322_v23  ;;  %v473_v28 = vld [vmem:[#allocation7 + $0x1a8] sm:$0xff]  ;;  %v472_v37 = vld [vmem:[#allocation7 + $0x1a0] sm:$0xff] }
  0x7a   : > { %1464 = vmatpush2.msra.mxu0 %v450_v50  ;;  %1689 = vmatpush2.msra.mxu1 %v482_v52  ;;  %v391_v24 = vld [vmem:[#allocation2 + $0xf6] sm:$0x1]  ;;  %v439_v45 = vld [vmem:[#allocation7 + $0x98] sm:$0xff]  ;;  %v6336_v48 = vld [vmem:[%s6187_s13 + $0xa0] sm:$0xff] }
  0x7b   : > { %1465 = vmatprep.subr.mxu0 %v6011_v0  ;;  %1690 = vmatprep.subr.mxu1 %v6011_v0  ;;  %409 = vst [vmem:[#allocation2 + $0xf8] sm:$0x1] %v391_v24  ;;  %v471_v46 = vld [vmem:[#allocation7 + $0x198] sm:$0xff]  ;;  %v438_v49 = vld [vmem:[#allocation7 + $0x90] sm:$0xff]  ;;  %325 = vst [vmem:[#allocation2 + $0x168] sm:$0xff] %v6336_v48 }
  0x7c   : > { %1466 = vmatpush2.msra.mxu0 %v449_v57  ;;  %1691 = vmatpush2.msra.mxu1 %v481_v58  ;;  %v356_v31 = vld [vmem:[#allocation2 + $0x109] sm:$0x1]  ;;  %v392_v40 = vld [vmem:[#allocation2 + $0x116] sm:$0x1]  ;;  %v436_v56 = vld [vmem:[#allocation7 + $0x80] sm:$0xff] }
  0x7d   : > { %1467 = vmatprep.subr.mxu0 %v6011_v0  ;;  %1692 = vmatprep.subr.mxu1 %v6011_v0  ;;  %374 = vst [vmem:[#allocation2 + $0x107] sm:$0x1] %v356_v31  ;;  %v357_v42 = vld [vmem:[#allocation2 + $0x129] sm:$0x1]  ;;  %410 = vst [vmem:[#allocation2 + $0x118] sm:$0x1] %v392_v40 }
  0x7e   : > { %1468 = vmatpush2.msra.mxu0 %v448_v60  ;;  %1693 = vmatpush2.msra.mxu1 %v480_v62  ;;  %375 = vst [vmem:[#allocation2 + $0x127] sm:$0x1] %v357_v42  ;;  %v393_v47 = vld [vmem:[#allocation2 + $0x136] sm:$0x1]  ;;  %v6342_v52 = vld [vmem:[%s6187_s13 + $0xa8] sm:$0xff]  ;;  %v468_v59 = vld [vmem:[#allocation7 + $0x180] sm:$0xff] }
  0x7f   : > { %1469 = vmatprep.subr.mxu0 %v6011_v0  ;;  %1694 = vmatprep.subr.mxu1 %v6011_v0  ;;  %411 = vst [vmem:[#allocation2 + $0x138] sm:$0x1] %v393_v47  ;;  %v470_v50 = vld [vmem:[#allocation7 + $0x190] sm:$0xff]  ;;  %v437_v53 = vld [vmem:[#allocation7 + $0x88] sm:$0xff]  ;;  %326 = vst [vmem:[#allocation2 + $0x170] sm:$0xff] %v6342_v52 }
  0x80   : > { %1470 = vmatpush2.msra.mxu0 %v447_v2  ;;  %1695 = vmatpush2.msra.mxu1 %v479_v3  ;;  %v358_v51 = vld [vmem:[#allocation2 + $0x149] sm:$0x1]  ;;  %v6348_v55 = vld [vmem:[%s6187_s13 + $0xb0] sm:$0xff]  ;;  %v6356_v61 = vld [vmem:[%s6187_s13 + $0xb8] sm:$0xff] }
  0x81   : > { %1471 = vmatprep.subr.mxu0 %v6011_v0  ;;  %1696 = vmatprep.subr.mxu1 %v6011_v0  ;;  %376 = vst [vmem:[#allocation2 + $0x147] sm:$0x1] %v358_v51  ;;  %v469_v54 = vld [vmem:[#allocation7 + $0x188] sm:$0xff]  ;;  %327 = vst [vmem:[#allocation2 + $0x188] sm:$0xff] %v6348_v55  ;;  %v394_v57 = vld [vmem:[#allocation2 + $0x156] sm:$0x1] }
  0x82   : > { %1472 = vmatpush2.msra.mxu0 %v446_v6  ;;  %1697 = vmatpush2.msra.mxu1 %v478_v7  ;;  %v564_v58 = vld [vmem:[#allocation2 + $0x7] sm:$0xff]  ;;  %412 = vst [vmem:[#allocation2 + $0x158] sm:$0x1] %v394_v57  ;;  %v499_v63 = vld [vmem:[#allocation7 + $0x278] sm:$0xff]  ;;  %328 = vst [vmem:[#allocation2 + $0x190] sm:$0xff] %v6356_v61 }
  0x83   : > { %1473 = vmatprep.subr.mxu0 %v6011_v0  ;;  %1698 = vmatprep.subr.mxu1 %v6011_v0  ;;  %v756_v60 = vld [vmem:[#allocation2 + $0x27] sm:$0xff]  ;;  %v757_v2 = vld [vmem:[#allocation2 + $0x2f] sm:$0xff] }
  0x84   : > { %1474 = vmatpush2.msra.mxu0 %v445_v9  ;;  %1699 = vmatpush2.msra.mxu1 %v477_v10  ;;  %v692_v62 = vld [vmem:[#allocation2 + $0x9] sm:$0xff]  ;;  %v6361_v3 = vld [vmem:[%s6187_s13 + $0xc0] sm:$0xff]  ;;  %v693_v10 = vld [vmem:[#allocation2 + $0x11] sm:$0xff] }
  0x85   : > { %1475 = vmatprep.subr.mxu0 %v6011_v0  ;;  %1700 = vmatprep.subr.mxu1 %v6011_v0  ;;  %v359_v1 = vld [vmem:[#allocation2 + $0x169] sm:$0x1]  ;;  %v565_v4 = vld [vmem:[#allocation2 + $0xf] sm:$0xff]  ;;  %329 = vst [vmem:[#allocation2 + $0x1a8] sm:$0xff] %v6361_v3  ;;  %v492_v47 = vld [vmem:[#allocation7 + $0x240] sm:$0xff] }
  0x86   : > { %1476 = vmatpush2.msra.mxu0 %v444_v13  ;;  %1701 = vmatpush2.msra.mxu1 %v476_v14  ;;  %377 = vst [vmem:[#allocation2 + $0x167] sm:$0x1] %v359_v1  ;;  %v395_v6 = vld [vmem:[#allocation2 + $0x176] sm:$0x1]  ;;  %v6367_v11 = vld [vmem:[%s6187_s13 + $0xc8] sm:$0xff] }
  0x87   : > { %1477 = vmatprep.subr.mxu0 %v6011_v0  ;;  %1702 = vmatprep.subr.mxu1 %v6011_v0  ;;  %v498_v7 = vld [vmem:[#allocation7 + $0x270] sm:$0xff]  ;;  %413 = vst [vmem:[#allocation2 + $0x178] sm:$0x1] %v395_v6  ;;  %v758_v13 = vld [vmem:[#allocation2 + $0x47] sm:$0xff]  ;;  %330 = vst [vmem:[#allocation2 + $0x1b0] sm:$0xff] %v6367_v11 }
  0x88   : > { %1478 = vmatpush2.msra.mxu0 %v443_v17  ;;  %1703 = vmatpush2.msra.mxu1 %v475_v18  ;;  %v360_v9 = vld [vmem:[#allocation2 + $0x189] sm:$0x1]  ;;  %v6372_v17 = vld [vmem:[%s6187_s13 + $0xd0] sm:$0xff]  ;;  %v496_v18 = vld [vmem:[#allocation7 + $0x260] sm:$0xff] }
  0x89   : > { %1479 = vmatprep.subr.mxu0 %v6011_v0  ;;  %1704 = vmatprep.subr.mxu1 %v6011_v0  ;;  %378 = vst [vmem:[#allocation2 + $0x187] sm:$0x1] %v360_v9  ;;  %v497_v14 = vld [vmem:[#allocation7 + $0x268] sm:$0xff]  ;;  %331 = vst [vmem:[#allocation2 + $0x1c8] sm:$0xff] %v6372_v17  ;;  %v396_v20 = vld [vmem:[#allocation2 + $0x196] sm:$0x1] }
  0x8a   : > { %1480 = vmatpush2.msra.mxu0 %v442_v21  ;;  %1705 = vmatpush2.msra.mxu1 %v474_v22  ;;  %v694_v21 = vld [vmem:[#allocation2 + $0x29] sm:$0xff]  ;;  %414 = vst [vmem:[#allocation2 + $0x198] sm:$0x1] %v396_v20  ;;  %v6378_v22 = vld [vmem:[%s6187_s13 + $0xd8] sm:$0xff] }
  0x8b   : > { %1481 = vmatprep.subr.mxu0 %v6011_v0  ;;  %1706 = vmatprep.subr.mxu1 %v6011_v0  ;;  %v759_v24 = vld [vmem:[#allocation2 + $0x4f] sm:$0xff]  ;;  %332 = vst [vmem:[#allocation2 + $0x1d0] sm:$0xff] %v6378_v22  ;;  %v764_v6 = vld [vmem:[#allocation2 + $0xa7] sm:$0xff] }
  0x8c   : > { %1482 = vmatpush2.msra.mxu0 %v441_v25  ;;  %1707 = vmatpush2.msra.mxu1 %v473_v28  ;;  %v495_v25 = vld [vmem:[#allocation7 + $0x258] sm:$0xff]  ;;  %v6384_v28 = vld [vmem:[%s6187_s13 + $0xe0] sm:$0xff]  ;;  %v494_v31 = vld [vmem:[#allocation7 + $0x250] sm:$0xff] }
  0x8d   : > { %1483 = vmatprep.subr.mxu0 %v6011_v0  ;;  %1708 = vmatprep.subr.mxu1 %v6011_v0  ;;  %333 = vst [vmem:[#allocation2 + $0x1e8] sm:$0xff] %v6384_v28  ;;  %346 = vst [vmem:[#allocation2 + $0x228] sm:$0xff] %v6384_v28  ;;  %v761_v51 = vld [vmem:[#allocation2 + $0x6f] sm:$0xff] }
  0x8e   : > { %1484 = vmatpush2.msra.mxu0 %v440_v35  ;;  %1709 = vmatpush2.msra.mxu1 %v472_v37  ;;  %v695_v35 = vld [vmem:[#allocation2 + $0x31] sm:$0xff]  ;;  %v493_v37 = vld [vmem:[#allocation7 + $0x248] sm:$0xff] }
  0x8f   : > { %1485 = vmatprep.subr.mxu0 %v6011_v0  ;;  %1710 = vmatprep.subr.mxu1 %v6011_v0  ;;  %v397_v40 = vld [vmem:[#allocation2 + $0x1b6] sm:$0x1]  ;;  %v6414_v9 = vld [vmem:[#allocation2 + $0x89] sm:$0xff] }
  0x90   : > { %1486 = vmatpush2.msra.mxu0 %v439_v45  ;;  %1711 = vmatpush2.msra.mxu1 %v471_v46  ;;  %v362_v42 = vld [vmem:[#allocation2 + $0x1c9] sm:$0x1]  ;;  %415 = vst [vmem:[#allocation2 + $0x1b8] sm:$0x1] %v397_v40  ;;  %v302_v46 = vld [vmem:[%s6187_s13 + $0xf0] sm:$0xff] }
  0x91   : > { %1487 = vmatprep.subr.mxu0 %v6011_v0  ;;  %1712 = vmatprep.subr.mxu1 %v6011_v0  ;;  %v6391_v45 = vld [vmem:[%s6187_s13 + $0xe8] sm:$0xff]  ;;  %380 = vst [vmem:[#allocation2 + $0x1c7] sm:$0x1] %v362_v42  ;;  %335 = vst [vmem:[#allocation2 + $0x208] sm:$0xff] %v302_v46  ;;  %v697_v57 = vld [vmem:[#allocation2 + $0x51] sm:$0xff] }
  0x92   : > { %1488 = vmatpush2.msra.mxu0 %v438_v49  ;;  %1713 = vmatpush2.msra.mxu1 %v470_v50  ;;  %334 = vst [vmem:[#allocation2 + $0x1f0] sm:$0xff] %v6391_v45  ;;  %347 = vst [vmem:[#allocation2 + $0x230] sm:$0xff] %v6391_v45  ;;  %v696_v49 = vld [vmem:[#allocation2 + $0x49] sm:$0xff]  ;;  %v398_v50 = vld [vmem:[#allocation2 + $0x1d6] sm:$0x1] }
  0x93   : > { %1489 = vmatprep.subr.mxu0 %v6011_v0  ;;  %1714 = vmatprep.subr.mxu1 %v6011_v0  ;;  %416 = vst [vmem:[#allocation2 + $0x1d8] sm:$0x1] %v398_v50  ;;  %v763_v1 = vld [vmem:[#allocation2 + $0x8f] sm:$0xff]  ;;  %v6465_v46 = vld [vmem:[#allocation2 + $0x107] sm:$0xff] }
  0x94   : > { %1490 = vmatpush2.msra.mxu0 %v437_v53  ;;  %1715 = vmatpush2.msra.mxu1 %v469_v54  ;;  %v303_v53 = vld [vmem:[%s6187_s13 + $0xf8] sm:$0xff]  ;;  %v363_v54 = vld [vmem:[#allocation2 + $0x1e9] sm:$0x1]  ;;  %v514_v20 = vld [vmem:[#allocation7 + $0x2f0] sm:$0xff] }
  0x95   : > { %1491 = vmatprep.subr.mxu0 %v6011_v0  ;;  %1493 = vmatprep.mubr.f32.mxu0 %v6220_v26  ;;  %336 = vst [vmem:[#allocation2 + $0x210] sm:$0xff] %v303_v53  ;;  %381 = vst [vmem:[#allocation2 + $0x1e7] sm:$0x1] %v363_v54  ;;  %v6454_v40 = vld [vmem:[#allocation2 + $0xef] sm:$0xff]  ;;  %v6484_v53 = vld [vmem:[#allocation2 + $0x127] sm:$0xff] }
  0x96   : > { %1492 = vmatpush2.msra.mxu0 %v436_v56  ;;  %1716 = vmatprep.subr.mxu1 %v6011_v0  ;;  %v490_v56 = vld [vmem:[#allocation7 + $0x230] sm:$0xff] }
  0x97   : > { %1494 = vmatmul.mubr.f32.vlgmr.msra.gmra.mxu0 %v564_v58  ;;  %1717 = vmatpush2.msra.mxu1 %v468_v59  ;;  %v762_v58 = vld [vmem:[#allocation2 + $0x87] sm:$0xff]  ;;  %v6461_v42 = vld [vmem:[#allocation2 + $0xd1] sm:$0xff] }
  0x98   : > { %1718 = vmatprep.mubr.f32.mxu1 %v756_v60  ;;  %1879 = vmatprep.subr.mxu0 %v6011_v0  ;;  %v489_v59 = vld [vmem:[#allocation7 + $0x228] sm:$0xff]  ;;  %v510_v54 = vld [vmem:[#allocation7 + $0x2d0] sm:$0xff] }
  0x99   : > { %1719 = vmatmul.mubr.f32.vlgmr.msra.gmra.mxu1 %v692_v62  ;;  %1880 = vmatpush1.msra.mxu0 %v499_v63  ;;  %v488_v62 = vld [vmem:[#allocation7 + $0x220] sm:$0xff]  ;;  %v698_v63 = vld [vmem:[#allocation2 + $0x69] sm:$0xff] }
  0x9a   : > { %1498 = vmatprep.mubr.f32.mxu0 %v6230_v29  ;;  %1723 = vmatprep.mubr.f32.mxu1 %v757_v2  ;;  %v6474_v50 = vld [vmem:[#allocation2 + $0x10f] sm:$0xff] }
  0x9b   : > { %1499 = vmatmul.mubr.f32.gmra.mxu0 %v565_v4  ;;  %1881 = vmatprep.subr.mxu0 %v6011_v0  ;;  %v6408_v4 = vld [vmem:[#allocation2 + $0x71] sm:$0xff] }
  0x9c   : > { %1882 = vmatpush1.msra.mxu0 %v498_v7  ;;  %1503 = vmatprep.mubr.f32.mxu0 %v6223_v27  ;;  %v361_v27 = vld [vmem:[#allocation2 + $0x1a9] sm:$0x1] }
  0x9d   : > { %1724 = vmatmul.mubr.f32.gmra.mxu1 %v693_v10  ;;  %1883 = vmatprep.subr.mxu0 %v6011_v0  ;;  %379 = vst [vmem:[#allocation2 + $0x1a7] sm:$0x1] %v361_v27  ;;  %v485_v7 = vld [vmem:[#allocation7 + $0x208] sm:$0xff] }
  0x9e   : > { %1728 = vmatprep.mubr.f32.mxu1 %v758_v13  ;;  %1884 = vmatpush1.msra.mxu0 %v497_v14  ;;  %v6416_v10 = vld [vmem:[#allocation2 + $0xaf] sm:$0xff] }
  0x9f   : > { %1504 = vmatmul.mubr.f32.gmra.mxu0 %v756_v60  ;;  %1885 = vmatprep.subr.mxu0 %v6011_v0  ;;  %v399_v60 = vld [vmem:[#allocation2 + $0x1f6] sm:$0x1]  ;;  %v513_v27 = vld [vmem:[#allocation7 + $0x2e8] sm:$0xff] }
  0xa0   : > { %1508 = vmatprep.mubr.f32.mxu0 %v6233_v30  ;;  %1886 = vmatpush1.msra.mxu0 %v496_v18  ;;  %v760_v30 = vld [vmem:[#allocation2 + $0x67] sm:$0xff]  ;;  %417 = vst [vmem:[#allocation2 + $0x1f8] sm:$0x1] %v399_v60  ;;  %v6423_v14 = vld [vmem:[#allocation2 + $0x91] sm:$0xff] }
  0xa1   : > { %1729 = vmatmul.mubr.f32.gmra.mxu1 %v694_v21  ;;  %1887 = vmatprep.subr.mxu0 %v6011_v0  ;;  %v6425_v18 = vld [vmem:[#allocation2 + $0xc7] sm:$0xff] }
  0xa2   : > { %1733 = vmatprep.mubr.f32.mxu1 %v759_v24  ;;  %1888 = vmatpush1.msra.mxu0 %v495_v25  ;;  %v6432_v21 = vld [vmem:[#allocation2 + $0xa9] sm:$0xff]  ;;  %v520_v60 = vld [vmem:[#allocation7 + $0x320] sm:$0xff] }
  0xa3   : > { %1509 = vmatmul.mubr.f32.gmra.mxu0 %v757_v2  ;;  %1889 = vmatprep.subr.mxu0 %v6011_v0  ;;  %v487_v2 = vld [vmem:[#allocation7 + $0x218] sm:$0xff]  ;;  %v529_v25 = vld [vmem:[#allocation7 + $0x368] sm:$0xff] }
  0xa4   : > { %1513 = vmatprep.mubr.f32.mxu0 %v6220_v26  ;;  %1890 = vmatpush1.msra.mxu0 %v494_v31  ;;  %v491_v26 = vld [vmem:[#allocation7 + $0x238] sm:$0xff]  ;;  %v6444_v31 = vld [vmem:[#allocation2 + $0xe7] sm:$0xff] }
  0xa5   : > { %1734 = vmatmul.mubr.f32.gmra.mxu1 %v695_v35  ;;  %1891 = vmatprep.subr.mxu0 %v6011_v0  ;;  %v528_v35 = vld [vmem:[#allocation7 + $0x360] sm:$0xff] }
  0xa6   : > { %1738 = vmatprep.mubr.f32.mxu1 %v760_v30  ;;  %1892 = vmatpush1.msra.mxu0 %v493_v37  ;;  %v6451_v37 = vld [vmem:[#allocation2 + $0xc9] sm:$0xff] }
  0xa7   : > { %1514 = vmatmul.mubr.f32.gmra.mxu0 %v758_v13  ;;  %1893 = vmatprep.subr.mxu0 %v6011_v0  ;;  %v515_v13 = vld [vmem:[#allocation7 + $0x2f8] sm:$0xff] }
  0xa8   : > { %1518 = vmatprep.mubr.f32.mxu0 %v6230_v29  ;;  %1894 = vmatpush1.msra.mxu0 %v492_v47  ;;  %v364_v29 = vld [vmem:[#allocation2 + $0x209] sm:$0x1] }
  0xa9   : > { %1739 = vmatmul.mubr.f32.gmra.mxu1 %v696_v49  ;;  %1895 = vmatprep.subr.mxu0 %v6011_v0  ;;  %382 = vst [vmem:[#allocation2 + $0x207] sm:$0x1] %v364_v29  ;;  %v525_v47 = vld [vmem:[#allocation7 + $0x348] sm:$0xff]  ;;  %v511_v49 = vld [vmem:[#allocation7 + $0x2d8] sm:$0xff] }
  0xaa   : > { %1743 = vmatprep.mubr.f32.mxu1 %v761_v51  ;;  %1896 = vmatpush1.msra.mxu0 %v491_v26  ;;  %v6481_v26 = vld [vmem:[#allocation2 + $0xf1] sm:$0xff]  ;;  %v6504_v29 = vld [vmem:[#allocation2 + $0x147] sm:$0xff] }
  0xab   : > { %1519 = vmatmul.mubr.f32.gmra.mxu0 %v759_v24  ;;  %1897 = vmatprep.subr.mxu0 %v6011_v0  ;;  %v6435_v24 = vld [vmem:[#allocation2 + $0xcf] sm:$0xff] }
  0xac   : > { %1523 = vmatprep.mubr.f32.mxu0 %v6242_v33  ;;  %1898 = vmatpush1.msra.mxu0 %v490_v56  ;;  %v486_v33 = vld [vmem:[#allocation7 + $0x210] sm:$0xff] }
  0xad   : > { %1744 = vmatmul.mubr.f32.gmra.mxu1 %v697_v57  ;;  %1899 = vmatprep.subr.mxu0 %v6011_v0  ;;  %v6491_v56 = vld [vmem:[#allocation2 + $0x109] sm:$0xff] }
  0xae   : > { %1748 = vmatprep.mubr.f32.mxu1 %v762_v58  ;;  %1900 = vmatpush1.msra.mxu0 %v489_v59  ;;  %v6495_v57 = vld [vmem:[#allocation2 + $0x12f] sm:$0xff] }
  0xaf   : > { %1524 = vmatmul.mubr.f32.gmra.mxu0 %v760_v30  ;;  %1901 = vmatprep.subr.mxu0 %v6011_v0  ;;  %v512_v30 = vld [vmem:[#allocation7 + $0x2e0] sm:$0xff]  ;;  %v509_v59 = vld [vmem:[#allocation7 + $0x2c8] sm:$0xff] }
  0xb0   : > { %1528 = vmatprep.mubr.f32.mxu0 %v6245_v34  ;;  %1902 = vmatpush1.msra.mxu0 %v488_v62  ;;  %v484_v34 = vld [vmem:[#allocation7 + $0x200] sm:$0xff]  ;;  %v6511_v62 = vld [vmem:[#allocation2 + $0x129] sm:$0xff] }
  0xb1   : > { %1749 = vmatmul.mubr.f32.gmra.mxu1 %v698_v63  ;;  %1903 = vmatprep.subr.mxu0 %v6011_v0  ;;  %v6514_v63 = vld [vmem:[#allocation2 + $0x14f] sm:$0xff] }
  0xb2   : > { %1753 = vmatprep.mubr.f32.mxu1 %v763_v1  ;;  %1904 = vmatpush1.msra.mxu0 %v487_v2  ;;  %v6521_v2 = vld [vmem:[#allocation2 + $0x131] sm:$0xff] }
  0xb3   : > { %1529 = vmatmul.mubr.f32.gmra.mxu0 %v761_v51  ;;  %1905 = vmatprep.subr.mxu0 %v6011_v0  ;;  %v524_v51 = vld [vmem:[#allocation7 + $0x340] sm:$0xff] }
  0xb4   : > { %1533 = vmatprep.mubr.f32.mxu0 %v6250_v36  ;;  %1906 = vmatpush1.msra.mxu0 %v486_v33  ;;  %v531_v36 = vld [vmem:[#allocation7 + $0x378] sm:$0xff]  ;;  %v6525_v33 = vld [vmem:[#allocation2 + $0x167] sm:$0xff] }
  0xb5   : > { %1754 = vmatmul.mubr.f32.gmra.mxu1 %v6408_v4  ;;  %1907 = vmatprep.subr.mxu0 %v6011_v0 }
  0xb6   : > { %1758 = vmatprep.mubr.f32.mxu1 %v764_v6  ;;  %1908 = vmatpush1.msra.mxu0 %v485_v7  ;;  %v507_v7 = vld [vmem:[#allocation7 + $0x2b8] sm:$0xff] }
  0xb7   : > { %1534 = vmatmul.mubr.f32.gmra.mxu0 %v762_v58  ;;  %1909 = vmatprep.subr.mxu0 %v6011_v0  ;;  %v521_v58 = vld [vmem:[#allocation7 + $0x328] sm:$0xff] }
  0xb8   : > { %1538 = vmatprep.mubr.f32.mxu0 %v6256_v38  ;;  %1910 = vmatpush1.msra.mxu0 %v484_v34  ;;  %v530_v38 = vld [vmem:[#allocation7 + $0x370] sm:$0xff] }
  0xb9   : > { %1759 = vmatmul.mubr.f32.gmra.mxu1 %v6414_v9  ;;  %1911 = vmatprep.subr.mxu0 %v6011_v0  ;;  %v6534_v34 = vld [vmem:[#allocation2 + $0x16f] sm:$0xff] }
  0xba   : > { %1763 = vmatprep.mubr.f32.mxu1 %v6416_v10  ;;  %1912 = vmatpush2.msra.mxu0 %v515_v13  ;;  %v516_v13 = vld [vmem:[#allocation7 + $0x300] sm:$0xff] }
  0xbb   : > { %1539 = vmatmul.mubr.f32.gmra.mxu0 %v763_v1  ;;  %2104 = vmatprep.subr.mxu1 %v6011_v0  ;;  %v508_v1 = vld [vmem:[#allocation7 + $0x2c0] sm:$0xff] }
  0xbc   : > { %1543 = vmatprep.mubr.f32.mxu0 %v6259_v39  ;;  %2105 = vmatpush1.msra.mxu1 %v531_v36  ;;  %v6441_v39 = vld [vmem:[#allocation2 + $0xb1] sm:$0xff] }
  0xbd   : > { %1764 = vmatmul.mubr.f32.gmra.mxu1 %v6423_v14  ;;  %1913 = vmatprep.subr.mxu0 %v6011_v0  ;;  %v6541_v36 = vld [vmem:[#allocation2 + $0x151] sm:$0xff] }
  0xbe   : > { %1768 = vmatprep.mubr.f32.mxu1 %v6425_v18  ;;  %2106 = vmatprep.subr.mxu1 %v6011_v0 }
  0xbf   : > { %1544 = vmatmul.mubr.f32.gmra.mxu0 %v764_v6  ;;  %2107 = vmatpush1.msra.mxu1 %v530_v38  ;;  %v517_v6 = vld [vmem:[#allocation7 + $0x308] sm:$0xff] }
  0xc0   : > { %1548 = vmatprep.mubr.f32.mxu0 %v6264_v41  ;;  %1914 = vmatpush2.msra.mxu0 %v514_v20  ;;  %v527_v41 = vld [vmem:[#allocation7 + $0x358] sm:$0xff]  ;;  %v6544_v38 = vld [vmem:[#allocation2 + $0x187] sm:$0xff]  ;;  %v506_v20 = vld [vmem:[#allocation7 + $0x2b0] sm:$0xff] }
  0xc1   : > { %1769 = vmatmul.mubr.f32.gmra.mxu1 %v6432_v21  ;;  %2108 = vmatprep.subr.mxu1 %v6011_v0 }
  0xc2   : > { %1773 = vmatprep.mubr.f32.mxu1 %v6435_v24  ;;  %2109 = vmatpush1.msra.mxu1 %v529_v25  ;;  %v6551_v25 = vld [vmem:[#allocation2 + $0x169] sm:$0xff] }
  0xc3   : > { %1549 = vmatmul.mubr.f32.gmra.mxu0 %v6416_v10  ;;  %1915 = vmatprep.subr.mxu0 %v6011_v0 }
  0xc4   : > { %1553 = vmatprep.mubr.f32.mxu0 %v6270_v43  ;;  %2110 = vmatprep.subr.mxu1 %v6011_v0  ;;  %v526_v43 = vld [vmem:[#allocation7 + $0x350] sm:$0xff] }
  0xc5   : > { %1774 = vmatmul.mubr.f32.gmra.mxu1 %v6441_v39  ;;  %1916 = vmatpush2.msra.mxu0 %v513_v27  ;;  %v6555_v27 = vld [vmem:[#allocation2 + $0x18f] sm:$0xff] }
  0xc6   : > { %1778 = vmatprep.mubr.f32.mxu1 %v6444_v31  ;;  %2111 = vmatpush1.msra.mxu1 %v528_v35  ;;  %v545_v35 = vld [vmem:[#allocation7 + $0x3e8] sm:$0xff] }
  0xc7   : > { %1554 = vmatmul.mubr.f32.gmra.mxu0 %v6425_v18  ;;  %2112 = vmatprep.subr.mxu1 %v6011_v0 }
  0xc8   : > { %1558 = vmatprep.mubr.f32.mxu0 %v6273_v44  ;;  %2113 = vmatpush1.msra.mxu1 %v527_v41  ;;  %v6471_v44 = vld [vmem:[#allocation2 + $0xe9] sm:$0xff] }
  0xc9   : > { %1779 = vmatmul.mubr.f32.gmra.mxu1 %v6451_v37  ;;  %1917 = vmatprep.subr.mxu0 %v6011_v0  ;;  %v505_v41 = vld [vmem:[#allocation7 + $0x2a8] sm:$0xff] }
  0xca   : > { %1783 = vmatprep.mubr.f32.mxu1 %v6454_v40  ;;  %2114 = vmatprep.subr.mxu1 %v6011_v0 }
  0xcb   : > { %1559 = vmatmul.mubr.f32.gmra.mxu0 %v6435_v24  ;;  %2115 = vmatpush1.msra.mxu1 %v526_v43  ;;  %v6564_v43 = vld [vmem:[#allocation2 + $0x1a7] sm:$0xff] }
  0xcc   : > { %1563 = vmatprep.mubr.f32.mxu0 %v6288_v5  ;;  %1918 = vmatpush2.msra.mxu0 %v512_v30  ;;  %v523_v5 = vld [vmem:[#allocation7 + $0x338] sm:$0xff]  ;;  %v544_v30 = vld [vmem:[#allocation7 + $0x3e0] sm:$0xff] }
  0xcd   : > { %1784 = vmatmul.mubr.f32.gmra.mxu1 %v6461_v42  ;;  %2116 = vmatprep.subr.mxu1 %v6011_v0 }
  0xce   : > { %1788 = vmatprep.mubr.f32.mxu1 %v6465_v46  ;;  %2117 = vmatpush1.msra.mxu1 %v525_v47  ;;  %v6571_v47 = vld [vmem:[#allocation2 + $0x189] sm:$0xff] }
  0xcf   : > { %1564 = vmatmul.mubr.f32.gmra.mxu0 %v6444_v31  ;;  %1919 = vmatprep.subr.mxu0 %v6011_v0 }
  0xd0   : > { %1568 = vmatprep.mubr.f32.mxu0 %v6294_v8  ;;  %2118 = vmatprep.subr.mxu1 %v6011_v0  ;;  %v522_v8 = vld [vmem:[#allocation7 + $0x330] sm:$0xff] }
  0xd1   : > { %1789 = vmatmul.mubr.f32.gmra.mxu1 %v6471_v44  ;;  %1920 = vmatpush2.msra.mxu0 %v511_v49  ;;  %v6574_v49 = vld [vmem:[#allocation2 + $0x1af] sm:$0xff] }
  0xd2   : > { %1793 = vmatprep.mubr.f32.mxu1 %v6474_v50  ;;  %2119 = vmatpush1.msra.mxu1 %v524_v51  ;;  %v504_v51 = vld [vmem:[#allocation7 + $0x2a0] sm:$0xff] }
  0xd3   : > { %1569 = vmatmul.mubr.f32.gmra.mxu0 %v6454_v40  ;;  %2120 = vmatprep.subr.mxu1 %v6011_v0 }
  0xd4   : > { %1573 = vmatprep.mubr.f32.mxu0 %v6300_v12  ;;  %2121 = vmatpush1.msra.mxu1 %v523_v5  ;;  %v6501_v12 = vld [vmem:[#allocation2 + $0x111] sm:$0xff] }
  0xd5   : > { %1794 = vmatmul.mubr.f32.gmra.mxu1 %v6481_v26  ;;  %1921 = vmatprep.subr.mxu0 %v6011_v0  ;;  %v6581_v5 = vld [vmem:[#allocation2 + $0x191] sm:$0xff] }
  0xd6   : > { %1798 = vmatprep.mubr.f32.mxu1 %v6484_v53  ;;  %2122 = vmatprep.subr.mxu1 %v6011_v0 }
  0xd7   : > { %1574 = vmatmul.mubr.f32.gmra.mxu0 %v6465_v46  ;;  %2123 = vmatpush1.msra.mxu1 %v522_v8  ;;  %v6585_v8 = vld [vmem:[#allocation2 + $0x1c7] sm:$0xff] }
  0xd8   : > { %1578 = vmatprep.mubr.f32.mxu0 %v6306_v15  ;;  %1922 = vmatpush2.msra.mxu0 %v510_v54  ;;  %v519_v15 = vld [vmem:[#allocation7 + $0x318] sm:$0xff]  ;;  %v541_v54 = vld [vmem:[#allocation7 + $0x3c8] sm:$0xff] }
  0xd9   : > { %1799 = vmatmul.mubr.f32.gmra.mxu1 %v6491_v56  ;;  %2124 = vmatprep.subr.mxu1 %v6011_v0 }
  0xda   : > { %1803 = vmatprep.mubr.f32.mxu1 %v6495_v57  ;;  %2125 = vmatpush1.msra.mxu1 %v521_v58  ;;  %v503_v58 = vld [vmem:[#allocation7 + $0x298] sm:$0xff] }
  0xdb   : > { %1579 = vmatmul.mubr.f32.gmra.mxu0 %v6474_v50  ;;  %1923 = vmatprep.subr.mxu0 %v6011_v0 }
  0xdc   : > { %1583 = vmatprep.mubr.f32.mxu0 %v6310_v16  ;;  %2126 = vmatprep.subr.mxu1 %v6011_v0  ;;  %v518_v16 = vld [vmem:[#allocation7 + $0x310] sm:$0xff] }
  0xdd   : > { %1804 = vmatmul.mubr.f32.gmra.mxu1 %v6501_v12  ;;  %1924 = vmatpush2.msra.mxu0 %v509_v59  ;;  %v6594_v59 = vld [vmem:[#allocation2 + $0x1cf] sm:$0xff] }
  0xde   : > { %1808 = vmatprep.mubr.f32.mxu1 %v6504_v29  ;;  %2127 = vmatpush1.msra.mxu1 %v520_v60  ;;  %v540_v60 = vld [vmem:[#allocation7 + $0x3c0] sm:$0xff] }
  0xdf   : > { %1584 = vmatmul.mubr.f32.gmra.mxu0 %v6484_v53  ;;  %2128 = vmatprep.subr.mxu1 %v6011_v0 }
  0xe0   : > { %1588 = vmatprep.mubr.f32.mxu0 %v6316_v19  ;;  %2129 = vmatpush1.msra.mxu1 %v519_v15  ;;  %v6531_v19 = vld [vmem:[#allocation2 + $0x149] sm:$0xff]  ;;  %v6601_v15 = vld [vmem:[#allocation2 + $0x1b1] sm:$0xff] }
  0xe1   : > { %1809 = vmatmul.mubr.f32.gmra.mxu1 %v6511_v62  ;;  %1925 = vmatprep.subr.mxu0 %v6011_v0 }
  0xe2   : > { %1813 = vmatprep.mubr.f32.mxu1 %v6514_v63  ;;  %2130 = vmatprep.subr.mxu1 %v6011_v0 }
  0xe3   : > { %1589 = vmatmul.mubr.f32.gmra.mxu0 %v6495_v57  ;;  %2131 = vmatpush1.msra.mxu1 %v518_v16  ;;  %v6604_v16 = vld [vmem:[#allocation2 + $0x1e7] sm:$0xff] }
  0xe4   : > { %1593 = vmatprep.mubr.f32.mxu0 %v6322_v23  ;;  %1926 = vmatpush2.msra.mxu0 %v508_v1  ;;  %v547_v23 = vld [vmem:[#allocation7 + $0x3f8] sm:$0xff]  ;;  %v502_v1 = vld [vmem:[#allocation7 + $0x290] sm:$0xff] }
  0xe5   : > { %1814 = vmatmul.mubr.f32.gmra.mxu1 %v6521_v2  ;;  %2132 = vmatprep.subr.mxu1 %v6011_v0 }
  0xe6   : > { %1818 = vmatprep.mubr.f32.mxu1 %v6525_v33  ;;  %2133 = vmatpush1.msra.mxu1 %v517_v6  ;;  %v6611_v6 = vld [vmem:[#allocation2 + $0x1c9] sm:$0xff] }
  0xe7   : > { %1594 = vmatmul.mubr.f32.gmra.mxu0 %v6504_v29  ;;  %1927 = vmatprep.subr.mxu0 %v6011_v0 }
  0xe8   : > { %1598 = vmatprep.mubr.f32.mxu0 %v6328_v32  ;;  %2134 = vmatprep.subr.mxu1 %v6011_v0  ;;  %v546_v32 = vld [vmem:[#allocation7 + $0x3f0] sm:$0xff] }
  0xe9   : > { %1819 = vmatmul.mubr.f32.gmra.mxu1 %v6531_v19  ;;  %1928 = vmatpush2.msra.mxu0 %v507_v7  ;;  %v6615_v7 = vld [vmem:[#allocation2 + $0x1ef] sm:$0xff] }
  0xea   : > { %1823 = vmatprep.mubr.f32.mxu1 %v6534_v34  ;;  %2135 = vmatpush1.msra.mxu1 %v516_v13  ;;  %v537_v13 = vld [vmem:[#allocation7 + $0x3a8] sm:$0xff] }
  0xeb   : > { %1599 = vmatmul.mubr.f32.gmra.mxu0 %v6514_v63  ;;  %2136 = vmatprep.subr.mxu1 %v6011_v0 }
  0xec   : > { %1603 = vmatprep.mubr.f32.mxu0 %v6336_v48  ;;  %2137 = vmatpush2.msra.mxu1 %v547_v23  ;;  %v6561_v48 = vld [vmem:[#allocation2 + $0x171] sm:$0xff]  ;;  %v501_v23 = vld [vmem:[#allocation7 + $0x288] sm:$0xff] }
  0xed   : > { %1824 = vmatmul.mubr.f32.gmra.mxu1 %v6541_v36  ;;  %1929 = vmatprep.subr.mxu0 %v6011_v0 }
  0xee   : > { %1828 = vmatprep.mubr.f32.mxu1 %v6544_v38  ;;  %2138 = vmatprep.subr.mxu1 %v6011_v0 }
  0xef   : > { %1604 = vmatmul.mubr.f32.gmra.mxu0 %v6525_v33  ;;  %2139 = vmatpush2.msra.mxu1 %v546_v32  ;;  %v365_v32 = vld [vmem:[#allocation2 + $0x229] sm:$0x1] }
  0xf0   : > { %1608 = vmatprep.mubr.f32.mxu0 %v6342_v52  ;;  %1930 = vmatpush2.msra.mxu0 %v506_v20  ;;  %v543_v52 = vld [vmem:[#allocation7 + $0x3d8] sm:$0xff]  ;;  %v6624_v20 = vld [vmem:[#allocation2 + $0x207] sm:$0xff]  ;;  %383 = vst [vmem:[#allocation2 + $0x227] sm:$0x1] %v365_v32  ;;  %v821_v32 = vld [vmem:[#allocation2 + $0x30] sm:$0xff] }
  0xf1   : > { %1829 = vmatmul.mubr.f32.gmra.mxu1 %v6551_v25  ;;  %2140 = vmatprep.subr.mxu1 %v6011_v0 }
  0xf2   : > { %1833 = vmatprep.mubr.f32.mxu1 %v6555_v27  ;;  %2141 = vmatpush2.msra.mxu1 %v545_v35  ;;  %v536_v35 = vld [vmem:[#allocation7 + $0x3a0] sm:$0xff] }
  0xf3   : > { %1609 = vmatmul.mubr.f32.gmra.mxu0 %v6534_v34  ;;  %1931 = vmatprep.subr.mxu0 %v6011_v0 }
  0xf4   : > { %1613 = vmatprep.mubr.f32.mxu0 %v6348_v55  ;;  %2142 = vmatprep.subr.mxu1 %v6011_v0  ;;  %v542_v55 = vld [vmem:[#allocation7 + $0x3d0] sm:$0xff] }
  0xf5   : > { %1834 = vmatmul.mubr.f32.gmra.mxu1 %v6561_v48  ;;  %1932 = vmatpush2.msra.mxu0 %v505_v41  ;;  %v535_v41 = vld [vmem:[#allocation7 + $0x398] sm:$0xff] }
  0xf6   : > { %1838 = vmatprep.mubr.f32.mxu1 %v6564_v43  ;;  %2143 = vmatpush2.msra.mxu1 %v544_v30  ;;  %v6631_v30 = vld [vmem:[#allocation2 + $0x1e9] sm:$0xff] }
  0xf7   : > { %1614 = vmatmul.mubr.f32.gmra.mxu0 %v6544_v38  ;;  %2144 = vmatprep.subr.mxu1 %v6011_v0 }
  0xf8   : > { %1618 = vmatprep.mubr.f32.mxu0 %v6356_v61  ;;  %2145 = vmatpush2.msra.mxu1 %v543_v52  ;;  %v6591_v61 = vld [vmem:[#allocation2 + $0x1a9] sm:$0xff] }
  0xf9   : > { %1839 = vmatmul.mubr.f32.gmra.mxu1 %v6571_v47  ;;  %1933 = vmatprep.subr.mxu0 %v6011_v0  ;;  %v6635_v52 = vld [vmem:[#allocation2 + $0x20f] sm:$0xff] }
  0xfa   : > { %1843 = vmatprep.mubr.f32.mxu1 %v6574_v49  ;;  %2146 = vmatprep.subr.mxu1 %v6011_v0 }
  0xfb   : > { %1619 = vmatmul.mubr.f32.gmra.mxu0 %v6555_v27  ;;  %2147 = vmatpush2.msra.mxu1 %v542_v55  ;;  %v500_v55 = vld [vmem:[#allocation7 + $0x280] sm:$0xff] }
  0xfc   : > { %1623 = vmatprep.mubr.f32.mxu0 %v6361_v3  ;;  %1934 = vmatpush2.msra.mxu0 %v504_v51  ;;  %v539_v3 = vld [vmem:[#allocation7 + $0x3b8] sm:$0xff] }
  0xfd   : > { %1844 = vmatmul.mubr.f32.gmra.mxu1 %v6581_v5  ;;  %2148 = vmatprep.subr.mxu1 %v6011_v0  ;;  %v6642_v51 = vld [vmem:[#allocation2 + $0x1f1] sm:$0xff] }
  0xfe   : > { %1848 = vmatprep.mubr.f32.mxu1 %v6585_v8  ;;  %2149 = vmatpush2.msra.mxu1 %v541_v54  ;;  %v884_v54 = vld [vmem:[#allocation2 + $0x29] sm:$0xff] }
  0xff   : > { %1624 = vmatmul.mubr.f32.gmra.mxu0 %v6564_v43  ;;  %1935 = vmatprep.subr.mxu0 %v6011_v0 }
 0x100   : > { %1628 = vmatprep.mubr.f32.mxu0 %v6367_v11  ;;  %2150 = vmatprep.subr.mxu1 %v6011_v0  ;;  %v538_v11 = vld [vmem:[#allocation7 + $0x3b0] sm:$0xff] }
 0x101   : > { %1849 = vmatmul.mubr.f32.gmra.mxu1 %v6591_v61  ;;  %1936 = vmatpush2.msra.mxu0 %v503_v58  ;;  %v533_v58 = vld [vmem:[#allocation7 + $0x388] sm:$0xff] }
 0x102   : > { %1853 = vmatprep.mubr.f32.mxu1 %v6594_v59  ;;  %2151 = vmatpush2.msra.mxu1 %v540_v60  ;;  %v563_v60 = vld [vmem:[#allocation7 + $0x478] sm:$0xff] }
 0x103   : > { %1629 = vmatmul.mubr.f32.gmra.mxu0 %v6574_v49  ;;  %2152 = vmatprep.subr.mxu1 %v6011_v0 }
 0x104   : > { %1633 = vmatprep.mubr.f32.mxu0 %v6372_v17  ;;  %2153 = vmatpush2.msra.mxu1 %v539_v3  ;;  %v6621_v17 = vld [vmem:[#allocation2 + $0x1d1] sm:$0xff]  ;;  %v532_v3 = vld [vmem:[#allocation7 + $0x380] sm:$0xff] }
 0x105   : > { %1854 = vmatmul.mubr.f32.gmra.mxu1 %v6601_v15  ;;  %1937 = vmatprep.subr.mxu0 %v6011_v0 }
 0x106   : > { %1858 = vmatprep.mubr.f32.mxu1 %v6604_v16  ;;  %2154 = vmatprep.subr.mxu1 %v6011_v0 }
 0x107   : > { %1634 = vmatmul.mubr.f32.gmra.mxu0 %v6585_v8  ;;  %2155 = vmatpush2.msra.mxu1 %v538_v11  ;;  %v1013_v11 = vld [vmem:[#allocation2 + $0x48] sm:$0xff] }
 0x108   : > { %1638 = vmatprep.mubr.f32.mxu0 %v6378_v22  ;;  %1938 = vmatpush2.msra.mxu0 %v502_v1  ;;  %v400_v22 = vld [vmem:[#allocation2 + $0x216] sm:$0x1]  ;;  %v949_v1 = vld [vmem:[#allocation2 + $0x47] sm:$0xff] }
 0x109   : > { %1859 = vmatmul.mubr.f32.gmra.mxu1 %v6611_v6  ;;  %2156 = vmatprep.subr.mxu1 %v6011_v0  ;;  %418 = vst [vmem:[#allocation2 + $0x218] sm:$0x1] %v400_v22  ;;  %v6648_v22 = vld [vmem:[#allocation2 + $0x49] sm:$0xff] }
 0x10a   : > { %1863 = vmatprep.mubr.f32.mxu1 %v6615_v7  ;;  %2157 = vmatpush2.msra.mxu1 %v537_v13  ;;  %v885_v13 = vld [vmem:[#allocation2 + $0x31] sm:$0xff] }
 0x10b   : > { %1639 = vmatmul.mubr.f32.gmra.mxu0 %v6594_v59  ;;  %1939 = vmatprep.subr.mxu0 %v6011_v0 }
 0x10c   : > { %1643 = vmatprep.mubr.f32.mxu0 %v6384_v28  ;;  %2158 = vmatprep.subr.mxu1 %v6011_v0  ;;  %v534_v28 = vld [vmem:[#allocation7 + $0x390] sm:$0xff] }
 0x10d   : > { %1864 = vmatmul.mubr.f32.gmra.mxu1 %v6621_v17  ;;  %1940 = vmatpush2.msra.mxu0 %v501_v23  ;;  %v1014_v23 = vld [vmem:[#allocation2 + $0x50] sm:$0xff] }
 0x10e   : > { %1868 = vmatprep.mubr.f32.mxu1 %v6624_v20  ;;  %2159 = vmatpush2.msra.mxu1 %v536_v35  ;;  %v562_v35 = vld [vmem:[#allocation7 + $0x470] sm:$0xff] }
 0x10f   : > { %1644 = vmatmul.mubr.f32.gmra.mxu0 %v6604_v16  ;;  %2160 = vmatprep.subr.mxu1 %v6011_v0 }
 0x110   : > { %1648 = vmatprep.mubr.f32.mxu0 %v6391_v45  ;;  %2161 = vmatpush2.msra.mxu1 %v535_v41  ;;  %v820_v45 = vld [vmem:[#allocation2 + $0x28] sm:$0xff] }
 0x111   : > { %1869 = vmatmul.mubr.f32.gmra.mxu1 %v6631_v30  ;;  %1941 = vmatprep.subr.mxu0 %v6011_v0  ;;  %v950_v41 = vld [vmem:[#allocation2 + $0x4f] sm:$0xff] }
 0x112   : > { %1873 = vmatprep.mubr.f32.mxu1 %v6635_v52  ;;  %2162 = vmatprep.subr.mxu1 %v6011_v0 }
 0x113   : > { %1649 = vmatmul.mubr.f32.gmra.mxu0 %v6615_v7  ;;  %2163 = vmatpush2.msra.mxu1 %v534_v28  ;;  %v561_v28 = vld [vmem:[#allocation7 + $0x468] sm:$0xff] }
 0x114   : > { %1942 = vmatpush2.msra.mxu0 %v500_v55  ;;  %2164 = vmatprep.subr.mxu1 %v6011_v0  ;;  %v1015_v55 = vld [vmem:[#allocation2 + $0x68] sm:$0xff] }
 0x115   : > { %1874 = vmatmul.mubr.f32.gmra.mxu1 %v6642_v51  ;;  %1943 = vmatprep.mubr.f32.mxu0 %v884_v54  ;;  %v560_v54 = vld [vmem:[#allocation7 + $0x460] sm:$0xff] }
 0x116   : > { %2165 = vmatpush2.msra.mxu1 %v533_v58  ;;  %5597 = vmatprep.subr.mxu0 %v563_v60  ;;  %v6651_v58 = vld [vmem:[#allocation2 + $0x51] sm:$0xff] }
 0x117   : > { %1944 = vmatmul.mubr.f32.vlgmr.msra.gmra.mxu0 %v820_v45  ;;  %2166 = vmatprep.subr.mxu1 %v6011_v0  ;;  %v559_v45 = vld [vmem:[#allocation7 + $0x458] sm:$0xff] }
 0x118   : > { %2167 = vmatpush2.msra.mxu1 %v532_v3  ;;  %2168 = vmatprep.mubr.f32.mxu1 %v1013_v11  ;;  %v1016_v3 = vld [vmem:[#allocation2 + $0x70] sm:$0xff] }
 0x119   : > { %5598 = vmatpush3.msra.mxu0 %v563_v60  ;;  %2169 = vmatmul.mubr.f32.vlgmr.msra.gmra.mxu1 %v949_v1  ;;  %v951_v60 = vld [vmem:[#allocation2 + $0x67] sm:$0xff]  ;;  %v558_v1 = vld [vmem:[#allocation7 + $0x450] sm:$0xff] }
 0x11a   : > { %1948 = vmatprep.mubr.f32.mxu0 %v885_v13  ;;  %2173 = vmatprep.mubr.f32.mxu1 %v1014_v23  ;;  %v6654_v13 = vld [vmem:[#allocation2 + $0x69] sm:$0xff] }
 0x11b   : > { %1949 = vmatmul.mubr.f32.gmra.mxu0 %v821_v32  ;;  %5599 = vmatprep.subr.mxu0 %v562_v35  ;;  %v952_v32 = vld [vmem:[#allocation2 + $0x6f] sm:$0xff] }
 0x11c   : > { %1953 = vmatprep.mubr.f32.mxu0 %v6648_v22  ;;  %5600 = vmatpush3.msra.mxu0 %v562_v35  ;;  %v557_v35 = vld [vmem:[#allocation7 + $0x448] sm:$0xff] }
 0x11d   : > { %2174 = vmatmul.mubr.f32.gmra.mxu1 %v950_v41  ;;  %5601 = vmatprep.subr.mxu0 %v561_v28  ;;  %v1017_v41 = vld [vmem:[#allocation2 + $0x88] sm:$0xff] }
 0x11e   : > { %2178 = vmatprep.mubr.f32.mxu1 %v1015_v55  ;;  %5602 = vmatpush3.msra.mxu0 %v561_v28  ;;  %v953_v28 = vld [vmem:[#allocation2 + $0x87] sm:$0xff] }
 0x11f   : > { %1954 = vmatmul.mubr.f32.gmra.mxu0 %v1013_v11  ;;  %5603 = vmatprep.subr.mxu0 %v560_v54  ;;  %v556_v11 = vld [vmem:[#allocation7 + $0x440] sm:$0xff] }
 0x120   : > { %1958 = vmatprep.mubr.f32.mxu0 %v6651_v58  ;;  %5604 = vmatpush3.msra.mxu0 %v560_v54  ;;  %v555_v54 = vld [vmem:[#allocation7 + $0x438] sm:$0xff] }
 0x121   : > { %2179 = vmatmul.mubr.f32.gmra.mxu1 %v951_v60  ;;  %5605 = vmatprep.subr.mxu0 %v559_v45  ;;  %v1018_v60 = vld [vmem:[#allocation2 + $0x90] sm:$0xff] }
 0x122   : > { %2183 = vmatprep.mubr.f32.mxu1 %v1016_v3  ;;  %5606 = vmatpush3.msra.mxu0 %v559_v45  ;;  %v554_v45 = vld [vmem:[#allocation7 + $0x430] sm:$0xff] }
 0x123   : > { %1959 = vmatmul.mubr.f32.gmra.mxu0 %v1014_v23  ;;  %5607 = vmatprep.subr.mxu0 %v558_v1  ;;  %v954_v23 = vld [vmem:[#allocation2 + $0x8f] sm:$0xff] }
 0x124   : > { %1963 = vmatprep.mubr.f32.mxu0 %v6654_v13  ;;  %5608 = vmatpush3.msra.mxu0 %v558_v1  ;;  %v553_v1 = vld [vmem:[#allocation7 + $0x428] sm:$0xff] }
 0x125   : > { %2184 = vmatmul.mubr.f32.gmra.mxu1 %v952_v32  ;;  %5609 = vmatprep.subr.mxu0 %v557_v35  ;;  %v1019_v32 = vld [vmem:[#allocation2 + $0xa8] sm:$0xff] }
 0x126   : > { %2188 = vmatprep.mubr.f32.mxu1 %v1017_v41  ;;  %5610 = vmatpush3.msra.mxu0 %v557_v35  ;;  %v552_v35 = vld [vmem:[#allocation7 + $0x420] sm:$0xff] }
 0x127   : > { %1964 = vmatmul.mubr.f32.gmra.mxu0 %v1015_v55  ;;  %5611 = vmatprep.subr.mxu0 %v556_v11  ;;  %v955_v55 = vld [vmem:[#allocation2 + $0xa7] sm:$0xff] }
 0x128   : > { %1968 = vmatprep.mubr.f32.mxu0 %v6408_v4  ;;  %5612 = vmatpush3.msra.mxu0 %v556_v11  ;;  %v551_v4 = vld [vmem:[#allocation7 + $0x418] sm:$0xff]  ;;  %v550_v11 = vld [vmem:[#allocation7 + $0x410] sm:$0xff] }
 0x129   : > { %2189 = vmatmul.mubr.f32.gmra.mxu1 %v953_v28  ;;  %5613 = vmatprep.subr.mxu0 %v555_v54  ;;  %v548_v28 = vld [vmem:[#allocation7 + $0x400] sm:$0xff] }
 0x12a   : > { %2193 = vmatprep.mubr.f32.mxu1 %v1018_v60  ;;  %5614 = vmatpush3.msra.mxu0 %v555_v54  ;;  %v5835_v54 = vld [vmem:[#allocation2 + $0xd0] sm:$0xff] }
 0x12b   : > { %1969 = vmatmul.mubr.f32.gmra.mxu0 %v1016_v3  ;;  %5615 = vmatprep.subr.mxu0 %v554_v45  ;;  %v5833_v3 = vld [vmem:[#allocation2 + $0xb0] sm:$0xff] }
 0x12c   : > { %1973 = vmatprep.mubr.f32.mxu0 %v6414_v9  ;;  %5616 = vmatpush3.msra.mxu0 %v554_v45  ;;  %v549_v9 = vld [vmem:[#allocation7 + $0x408] sm:$0xff] }
 0x12d   : > { %2194 = vmatmul.mubr.f32.gmra.mxu1 %v954_v23  ;;  %5617 = vmatprep.subr.mxu0 %v553_v1 }
 0x12e   : > { %2198 = vmatprep.mubr.f32.mxu1 %v1019_v32  ;;  %5618 = vmatpush3.msra.mxu0 %v553_v1 }
 0x12f   : > { %1974 = vmatmul.mubr.f32.gmra.mxu0 %v1017_v41  ;;  %5619 = vmatprep.subr.mxu0 %v552_v35  ;;  %v5834_v41 = vld [vmem:[#allocation2 + $0xc8] sm:$0xff] }
 0x130   : > { %1978 = vmatprep.mubr.f32.mxu0 %v6423_v14  ;;  %5620 = vmatpush3.msra.mxu0 %v552_v35  ;;  %v829_v14 = vld [vmem:[#allocation2 + $0xb0] sm:$0xff] }
 0x131   : > { %2199 = vmatmul.mubr.f32.gmra.mxu1 %v955_v55  ;;  %5621 = vmatprep.subr.mxu0 %v551_v4 }
 0x132   : > { %2203 = vmatprep.mubr.f32.mxu1 %v5833_v3  ;;  %5622 = vmatpush3.msra.mxu0 %v551_v4 }
 0x133   : > { %1979 = vmatmul.mubr.f32.gmra.mxu0 %v1018_v60  ;;  %5623 = vmatprep.subr.mxu0 %v550_v11  ;;  %v5838_v60 = vld [vmem:[#allocation2 + $0x108] sm:$0xff] }
 0x134   : > { %1983 = vmatprep.mubr.f32.mxu0 %v6432_v21  ;;  %5624 = vmatpush3.msra.mxu0 %v550_v11  ;;  %v5836_v21 = vld [vmem:[#allocation2 + $0xe8] sm:$0xff] }
 0x135   : > { %2204 = vmatmul.mubr.f32.gmra.mxu1 %v6416_v10  ;;  %5625 = vmatprep.subr.mxu0 %v549_v9  ;;  %v830_v10 = vld [vmem:[#allocation2 + $0xc8] sm:$0xff] }
 0x136   : > { %2208 = vmatprep.mubr.f32.mxu1 %v5834_v41  ;;  %5626 = vmatpush3.msra.mxu0 %v549_v9 }
 0x137   : > { %1984 = vmatmul.mubr.f32.gmra.mxu0 %v1019_v32  ;;  %5627 = vmatprep.subr.mxu0 %v548_v28 }
 0x138   : > { %1988 = vmatprep.mubr.f32.mxu0 %v6441_v39  ;;  %5628 = vmatpush3.msra.mxu0 %v548_v28  ;;  %v831_v39 = vld [vmem:[#allocation2 + $0xd0] sm:$0xff] }
 0x139   : > { %2209 = vmatmul.mubr.f32.gmra.mxu1 %v6425_v18  ;;  %3958 = vmatprep.subr.mxu1 %v6011_v0  ;;  %v5837_v18 = vld [vmem:[#allocation2 + $0xf0] sm:$0xff] }
 0x13a   : > { %2213 = vmatprep.mubr.f32.mxu1 %v5835_v54  ;;  %4183 = vmatprep.subr.mxu0 %v6011_v0 }
 0x13b   : > { %1989 = vmatmul.mubr.f32.gmra.mxu0 %v829_v14 }
 0x13c   : > { %1993 = vmatprep.mubr.f32.mxu0 %v6451_v37  ;;  %v5840_v37 = vld [vmem:[#allocation2 + $0x128] sm:$0xff] }
 0x13d   : > { %2214 = vmatmul.mubr.f32.gmra.mxu1 %v6435_v24  ;;  %v5839_v24 = vld [vmem:[#allocation2 + $0x110] sm:$0xff] }
 0x13e   : > { %2218 = vmatprep.mubr.f32.mxu1 %v5836_v21 }
 0x13f   : > { %1994 = vmatmul.mubr.f32.gmra.mxu0 %v830_v10 }
 0x140   : > { %1998 = vmatprep.mubr.f32.mxu0 %v6461_v42  ;;  %v5842_v42 = vld [vmem:[#allocation2 + $0x148] sm:$0xff] }
 0x141   : > { %2219 = vmatmul.mubr.f32.gmra.mxu1 %v6444_v31  ;;  %v401_v31 = vld [vmem:[#allocation2 + $0x236] sm:$0x1] }
 0x142   : > { %2223 = vmatprep.mubr.f32.mxu1 %v5837_v18  ;;  %419 = vst [vmem:[#allocation2 + $0x238] sm:$0x1] %v401_v31 }
 0x143   : > { %1999 = vmatmul.mubr.f32.gmra.mxu0 %v831_v39 }
 0x144   : > { %2003 = vmatprep.mubr.f32.mxu0 %v6471_v44 }
 0x145   : > { %2224 = vmatmul.mubr.f32.gmra.mxu1 %v6454_v40  ;;  %v5841_v40 = vld [vmem:[#allocation2 + $0x130] sm:$0xff] }
 0x146   : > { %2228 = vmatprep.mubr.f32.mxu1 %v5838_v60 }
 0x147   : > { %2004 = vmatmul.mubr.f32.gmra.mxu0 %v5836_v21 }
 0x148   : > { %2008 = vmatprep.mubr.f32.mxu0 %v6481_v26 }
 0x149   : > { %2229 = vmatmul.mubr.f32.gmra.mxu1 %v6465_v46 }
 0x14a   : > { %2233 = vmatprep.mubr.f32.mxu1 %v5839_v24 }
 0x14b   : > { %2009 = vmatmul.mubr.f32.gmra.mxu0 %v5837_v18 }
 0x14c   : > { %2013 = vmatprep.mubr.f32.mxu0 %v6491_v56 }
 0x14d   : > { %2234 = vmatmul.mubr.f32.gmra.mxu1 %v6474_v50 }
 0x14e   : > { %2238 = vmatprep.mubr.f32.mxu1 %v5840_v37 }
 0x14f   : > { %2014 = vmatmul.mubr.f32.gmra.mxu0 %v5838_v60 }
 0x150   : > { %2018 = vmatprep.mubr.f32.mxu0 %v6501_v12 }
 0x151   : > { %2239 = vmatmul.mubr.f32.gmra.mxu1 %v6484_v53  ;;  %v5843_v53 = vld [vmem:[#allocation2 + $0x150] sm:$0xff] }
 0x152   : > { %2243 = vmatprep.mubr.f32.mxu1 %v5841_v40 }
 0x153   : > { %2019 = vmatmul.mubr.f32.gmra.mxu0 %v5839_v24 }
 0x154   : > { %2023 = vmatprep.mubr.f32.mxu0 %v6511_v62 }
 0x155   : > { %2244 = vmatmul.mubr.f32.gmra.mxu1 %v6495_v57 }
 0x156   : > { %2248 = vmatprep.mubr.f32.mxu1 %v5842_v42 }
 0x157   : > { %v1495_v46 = vpop.f32.mrf.mxu0  ;;  %2024 = vmatmul.mubr.f32.gmra.mxu0 %v5840_v37 }
 0x158   : > { %2028 = vmatprep.mubr.f32.mxu0 %v6521_v2  ;;  %v5844_v2 = vld [vmem:[#allocation2 + $0x168] sm:$0xff] }
 0x159   : > { %v1720_v44 = vpop.f32.mrf.mxu1  ;;  %v1497_v50 = vpop.f32.mrf.mxu0  ;;  %2249 = vmatmul.mubr.f32.gmra.mxu1 %v6504_v29 }
 0x15a   : > { %v6682_v26 = vadd.f32 %v1720_v44, %v1495_v46  ;;  %2253 = vmatprep.mubr.f32.mxu1 %v5843_v53 }
 0x15b   : > { %v1722_v56 = vpop.f32.mrf.mxu1  ;;  %v1500_v12 = vpop.f32.mrf.mxu0  ;;  %2029 = vmatmul.mubr.f32.gmra.mxu0 %v5841_v40 }
 0x15c   : > { %2033 = vmatprep.mubr.f32.mxu0 %v6531_v19  ;;  %v5845_v19 = vld [vmem:[#allocation2 + $0x170] sm:$0xff] }
 0x15d   : > { %v1725_v57 = vpop.f32.mrf.mxu1  ;;  %v1502_v62 = vpop.f32.mrf.mxu0  ;;  %2254 = vmatmul.mubr.f32.gmra.mxu1 %v6514_v63 }
 0x15e   : > { %v6686_v45 = vadd.f32 %v1725_v57, %v1500_v12  ;;  %2258 = vmatprep.mubr.f32.mxu1 %v5844_v2 }
 0x15f   : > { %v1727_v23 = vpop.f32.mrf.mxu1  ;;  %v1505_v1 = vpop.f32.mrf.mxu0  ;;  %2034 = vmatmul.mubr.f32.gmra.mxu0 %v5842_v42 }
 0x160   : > { %2038 = vmatprep.mubr.f32.mxu0 %v6541_v36  ;;  %v5846_v36 = vld [vmem:[#allocation2 + $0x188] sm:$0xff] }
 0x161   : > { %v1730_v29 = vpop.f32.mrf.mxu1  ;;  %v1507_v32 = vpop.f32.mrf.mxu0  ;;  %2259 = vmatmul.mubr.f32.gmra.mxu1 %v6525_v33 }
 0x162   : > { %v6690_v35 = vadd.f32 %v1730_v29, %v1505_v1  ;;  %2263 = vmatprep.mubr.f32.mxu1 %v5845_v19 }
 0x163   : > { %v1732_v55 = vpop.f32.mrf.mxu1  ;;  %v1510_v4 = vpop.f32.mrf.mxu0  ;;  %2039 = vmatmul.mubr.f32.gmra.mxu0 %v5843_v53 }
 0x164   : > { %2043 = vmatprep.mubr.f32.mxu0 %v6551_v25  ;;  %v5847_v25 = vld [vmem:[#allocation2 + $0x190] sm:$0xff] }
 0x165   : > { %v1735_v63 = vpop.f32.mrf.mxu1  ;;  %v1512_v11 = vpop.f32.mrf.mxu0  ;;  %2264 = vmatmul.mubr.f32.gmra.mxu1 %v6534_v34 }
 0x166   : > { %v6694_v3 = vadd.f32 %v1735_v63, %v1510_v4  ;;  %2268 = vmatprep.mubr.f32.mxu1 %v5846_v36 }
 0x167   : > { %v1737_v9 = vpop.f32.mrf.mxu1  ;;  %v1515_v28 = vpop.f32.mrf.mxu0  ;;  %2044 = vmatmul.mubr.f32.gmra.mxu0 %v5844_v2 }
 0x168   : > { %2048 = vmatprep.mubr.f32.mxu0 %v6561_v48  ;;  %v5848_v48 = vld [vmem:[#allocation2 + $0x1a8] sm:$0xff] }
 0x169   : > { %v1740_v33 = vpop.f32.mrf.mxu1  ;;  %v1517_v41 = vpop.f32.mrf.mxu0  ;;  %2269 = vmatmul.mubr.f32.gmra.mxu1 %v6544_v38 }
 0x16a   : > { %v6698_v14 = vadd.f32 %v1740_v33, %v1515_v28  ;;  %2273 = vmatprep.mubr.f32.mxu1 %v5847_v25  ;;  %v6730_v28 = vld [vmem:[#allocation2 + $0x209] sm:$0xff] }
 0x16b   : > { %v1742_v54 = vpop.f32.mrf.mxu1  ;;  %v1520_v10 = vpop.f32.mrf.mxu0  ;;  %2049 = vmatmul.mubr.f32.gmra.mxu0 %v5845_v19  ;;  %v5855_v33 = vld [vmem:[#allocation2 + $0x210] sm:$0xff] }
 0x16c   : > { %2053 = vmatprep.mubr.f32.mxu0 %v6571_v47  ;;  %v5849_v47 = vld [vmem:[#allocation2 + $0x1b0] sm:$0xff] }
 0x16d   : > { %v1745_v34 = vpop.f32.mrf.mxu1  ;;  %v1522_v21 = vpop.f32.mrf.mxu0  ;;  %2274 = vmatmul.mubr.f32.gmra.mxu1 %v6555_v27 }
 0x16e   : > { %v6702_v39 = vadd.f32 %v1745_v34, %v1520_v10  ;;  %2278 = vmatprep.mubr.f32.mxu1 %v5848_v48 }
 0x16f   : > { %v1747_v18 = vpop.f32.mrf.mxu1  ;;  %v1525_v60 = vpop.f32.mrf.mxu0  ;;  %2054 = vmatmul.mubr.f32.gmra.mxu0 %v5846_v36 }
 0x170   : > { %2058 = vmatprep.mubr.f32.mxu0 %v6581_v5  ;;  %v5850_v5 = vld [vmem:[#allocation2 + $0x1c8] sm:$0xff] }
 0x171   : > { %v1750_v38 = vpop.f32.mrf.mxu1  ;;  %v1527_v24 = vpop.f32.mrf.mxu0  ;;  %2279 = vmatmul.mubr.f32.gmra.mxu1 %v6564_v43 }
 0x172   : > { %v6706_v31 = vadd.f32 %v1750_v38, %v1525_v60  ;;  %2283 = vmatprep.mubr.f32.mxu1 %v5849_v47  ;;  %v980_v38 = vld [vmem:[#allocation2 + $0x22f] sm:$0xff] }
 0x173   : > { %v1752_v37 = vpop.f32.mrf.mxu1  ;;  %v1530_v40 = vpop.f32.mrf.mxu0  ;;  %2059 = vmatmul.mubr.f32.gmra.mxu0 %v5847_v25 }
 0x174   : > { %2063 = vmatprep.mubr.f32.mxu0 %v6591_v61  ;;  %v5851_v61 = vld [vmem:[#allocation2 + $0x1d0] sm:$0xff] }
 0x175   : > { %v1755_v27 = vpop.f32.mrf.mxu1  ;;  %v1532_v42 = vpop.f32.mrf.mxu0  ;;  %2284 = vmatmul.mubr.f32.gmra.mxu1 %v6574_v49 }
 0x176   : > { %v6710_v46 = vadd.f32 %v1755_v27, %v1530_v40  ;;  %2288 = vmatprep.mubr.f32.mxu1 %v5850_v5 }
 0x177   : > { %v1757_v44 = vpop.f32.mrf.mxu1  ;;  %v1535_v50 = vpop.f32.mrf.mxu0  ;;  %2064 = vmatmul.mubr.f32.gmra.mxu0 %v5848_v48 }
 0x178   : > { %2068 = vmatprep.mubr.f32.mxu0 %v6601_v15  ;;  %v5852_v15 = vld [vmem:[#allocation2 + $0x1e8] sm:$0xff] }
 0x179   : > { %v1760_v43 = vpop.f32.mrf.mxu1  ;;  %v1537_v53 = vpop.f32.mrf.mxu0  ;;  %2289 = vmatmul.mubr.f32.gmra.mxu1 %v6585_v8 }
 0x17a   : > { %v6714_v56 = vadd.f32 %v1760_v43, %v1535_v50  ;;  %2293 = vmatprep.mubr.f32.mxu1 %v5851_v61  ;;  %v1081_v43 = vld [vmem:[#allocation2 + $0x89] sm:$0xff] }
 0x17b   : > { %v1762_v12 = vpop.f32.mrf.mxu1  ;;  %v1540_v57 = vpop.f32.mrf.mxu0  ;;  %2069 = vmatmul.mubr.f32.gmra.mxu0 %v5849_v47 }
 0x17c   : > { %2073 = vmatprep.mubr.f32.mxu0 %v6611_v6  ;;  %v5853_v6 = vld [vmem:[#allocation2 + $0x1f0] sm:$0xff] }
 0x17d   : > { %v1765_v49 = vpop.f32.mrf.mxu1  ;;  %v1542_v62 = vpop.f32.mrf.mxu0  ;;  %2294 = vmatmul.mubr.f32.gmra.mxu1 %v6594_v59 }
 0x17e   : > { %v6718_v2 = vadd.f32 %v1765_v49, %v1540_v57  ;;  %2298 = vmatprep.mubr.f32.mxu1 %v5852_v15  ;;  %v1083_v62 = vld [vmem:[#allocation2 + $0xa9] sm:$0xff] }
 0x17f   : > { %v1767_v23 = vpop.f32.mrf.mxu1  ;;  %v1545_v1 = vpop.f32.mrf.mxu0  ;;  %2074 = vmatmul.mubr.f32.gmra.mxu0 %v5850_v5  ;;  %v1080_v5 = vld [vmem:[#allocation2 + $0x71] sm:$0xff] }
 0x180   : > { %2078 = vmatprep.mubr.f32.mxu0 %v6621_v17  ;;  %v5854_v17 = vld [vmem:[#allocation2 + $0x208] sm:$0xff] }
 0x181   : > { %v1770_v8 = vpop.f32.mrf.mxu1  ;;  %v1547_v29 = vpop.f32.mrf.mxu0  ;;  %2299 = vmatmul.mubr.f32.gmra.mxu1 %v6604_v16 }
 0x182   : > { %v6722_v32 = vadd.f32 %v1770_v8, %v1545_v1  ;;  %2303 = vmatprep.mubr.f32.mxu1 %v5853_v6  ;;  %v1085_v29 = vld [vmem:[#allocation2 + $0xc9] sm:$0xff] }
 0x183   : > { %v1772_v19 = vpop.f32.mrf.mxu1  ;;  %v1550_v55 = vpop.f32.mrf.mxu0  ;;  %2079 = vmatmul.mubr.f32.gmra.mxu0 %v5851_v61 }
 0x184   : > { %2083 = vmatprep.mubr.f32.mxu0 %v6631_v30 }
 0x185   : > { %v1775_v59 = vpop.f32.mrf.mxu1  ;;  %v1552_v4 = vpop.f32.mrf.mxu0  ;;  %2304 = vmatmul.mubr.f32.gmra.mxu1 %v6615_v7 }
 0x186   : > { %v6726_v63 = vadd.f32 %v1775_v59, %v1550_v55  ;;  %2308 = vmatprep.mubr.f32.mxu1 %v5854_v17  ;;  %v1086_v59 = vld [vmem:[#allocation2 + $0xd1] sm:$0xff] }
 0x187   : > { %v1777_v11 = vpop.f32.mrf.mxu1  ;;  %v1555_v36 = vpop.f32.mrf.mxu0  ;;  %2084 = vmatmul.mubr.f32.gmra.mxu0 %v5852_v15 }
 0x188   : > { %2088 = vmatprep.mubr.f32.mxu0 %v6642_v51  ;;  %v6736_v51 = vld [vmem:[#allocation2 + $0x211] sm:$0xff]  ;;  %v1087_v11 = vld [vmem:[#allocation2 + $0xe9] sm:$0xff] }
 0x189   : > { %v1780_v16 = vpop.f32.mrf.mxu1  ;;  %v1557_v9 = vpop.f32.mrf.mxu0  ;;  %2309 = vmatmul.mubr.f32.gmra.mxu1 %v6624_v20  ;;  %v979_v20 = vld [vmem:[#allocation2 + $0x227] sm:$0xff] }
 0x18a   : > { %v6732_v30 = vadd.f32 %v1780_v16, %v1555_v36  ;;  %2313 = vmatprep.mubr.f32.mxu1 %v5855_v33 }
 0x18b   : > { %v1782_v7 = vpop.f32.mrf.mxu1  ;;  %v1560_v41 = vpop.f32.mrf.mxu0  ;;  %2089 = vmatmul.mubr.f32.gmra.mxu0 %v5853_v6 }
 0x18c   : > { %2093 = vmatprep.mubr.f32.mxu0 %v6730_v28 }
 0x18d   : > { %v1785_v25 = vpop.f32.mrf.mxu1  ;;  %v1562_v54 = vpop.f32.mrf.mxu0  ;;  %2314 = vmatmul.mubr.f32.gmra.mxu1 %v6635_v52 }
 0x18e   : > { %v6738_v10 = vadd.f32 %v1785_v25, %v1560_v41  ;;  %2318 = vmatprep.mubr.f32.mxu1 %v5852_v15  ;;  %v1089_v25 = vld [vmem:[#allocation2 + $0x109] sm:$0xff] }
 0x18f   : > { %v1787_v34 = vpop.f32.mrf.mxu1  ;;  %v1565_v21 = vpop.f32.mrf.mxu0  ;;  %2094 = vmatmul.mubr.f32.gmra.mxu0 %v5854_v17 }
 0x190   : > { %2098 = vmatprep.mubr.f32.mxu0 %v6736_v51 }
 0x191   : > { %v1790_v48 = vpop.f32.mrf.mxu1  ;;  %v1567_v18 = vpop.f32.mrf.mxu0  ;;  %2319 = vmatmul.mubr.f32.gmra.mxu1 %v979_v20 }
 0x192   : > { %v6741_v60 = vadd.f32 %v1790_v48, %v1565_v21  ;;  %2323 = vmatprep.mubr.f32.mxu1 %v5853_v6  ;;  %v1090_v21 = vld [vmem:[#allocation2 + $0x111] sm:$0xff] }
 0x193   : > { %v1792_v24 = vpop.f32.mrf.mxu1  ;;  %v1570_v52 = vpop.f32.mrf.mxu0  ;;  %2099 = vmatmul.mubr.f32.gmra.mxu0 %v5855_v33  ;;  %v1088_v33 = vld [vmem:[#allocation2 + $0xf1] sm:$0xff] }
 0x194   : > { %5629 = vmatprep.mubr.f32.mxu0 %v6648_v22  ;;  %v1082_v22 = vld [vmem:[#allocation2 + $0x91] sm:$0xff] }
 0x195   : > { %v1795_v47 = vpop.f32.mrf.mxu1  ;;  %v1572_v37 = vpop.f32.mrf.mxu0  ;;  %2324 = vmatmul.mubr.f32.gmra.mxu1 %v980_v38  ;;  %v1091_v38 = vld [vmem:[#allocation2 + $0x129] sm:$0xff] }
 0x196   : > { %v6744_v40 = vadd.f32 %v1795_v47, %v1570_v52  ;;  %v1092_v37 = vld [vmem:[#allocation2 + $0x131] sm:$0xff] }
 0x197   : > { %v1797_v27 = vpop.f32.mrf.mxu1  ;;  %v1575_v42 = vpop.f32.mrf.mxu0  ;;  %5630 = vmatmul.mubr.f32.vlgmr.msra.gmra.mxu0 %v6651_v58 }
 0x198   : > { %5632 = vmatprep.mubr.f32.mxu0 %v6654_v13  ;;  %v1084_v13 = vld [vmem:[#allocation2 + $0xb1] sm:$0xff] }
 0x199   : > { %v1800_v44 = vpop.f32.mrf.mxu1  ;;  %v1577_v50 = vpop.f32.mrf.mxu0 }
 0x19a   : > { %v6748_v53 = vadd.f32 %v1800_v44, %v1575_v42 }
 0x19b   : > { %v1802_v61 = vpop.f32.mrf.mxu1  ;;  %v1580_v12 = vpop.f32.mrf.mxu0  ;;  %5633 = vmatmul.mubr.f32.gmra.mxu0 %v1080_v5  ;;  %v1093_v5 = vld [vmem:[#allocation2 + $0x149] sm:$0xff] }
 0x19c   : > { %5635 = vmatprep.mubr.f32.mxu0 %v1081_v43  ;;  %v1094_v61 = vld [vmem:[#allocation2 + $0x151] sm:$0xff] }
 0x19d   : > { %v1805_v57 = vpop.f32.mrf.mxu1  ;;  %v1582_v49 = vpop.f32.mrf.mxu0 }
 0x19e   : > { %v6750_v15 = vadd.f32 %v1805_v57, %v1580_v12  ;;  %v1095_v57 = vld [vmem:[#allocation2 + $0x169] sm:$0xff] }
 0x19f   : > { %v1807_v23 = vpop.f32.mrf.mxu1  ;;  %v1585_v58 = vpop.f32.mrf.mxu0  ;;  %5636 = vmatmul.mubr.f32.gmra.mxu0 %v1082_v22 }
 0x1a0   : > { %5638 = vmatprep.mubr.f32.mxu0 %v1083_v62 }
 0x1a1   : > { %v1810_v1 = vpop.f32.mrf.mxu1  ;;  %v1587_v8 = vpop.f32.mrf.mxu0 }
 0x1a2   : > { %v6752_v6 = vadd.f32 %v1810_v1, %v1585_v58  ;;  %v1096_v58 = vld [vmem:[#allocation2 + $0x171] sm:$0xff]  ;;  %v1097_v8 = vld [vmem:[#allocation2 + $0x189] sm:$0xff] }
 0x1a3   : > { %v1812_v19 = vpop.f32.mrf.mxu1  ;;  %v1590_v55 = vpop.f32.mrf.mxu0  ;;  %5639 = vmatmul.mubr.f32.gmra.mxu0 %v1084_v13 }
 0x1a4   : > { %5641 = vmatprep.mubr.f32.mxu0 %v1085_v29 }
 0x1a5   : > { %v1815_v4 = vpop.f32.mrf.mxu1  ;;  %v1592_v17 = vpop.f32.mrf.mxu0 }
 0x1a6   : > { %v6754_v36 = vadd.f32 %v1815_v4, %v1590_v55 }
 0x1a7   : > { %v1817_v16 = vpop.f32.mrf.mxu1  ;;  %v1595_v9 = vpop.f32.mrf.mxu0  ;;  %5642 = vmatmul.mubr.f32.gmra.mxu0 %v1086_v59  ;;  %v1098_v59 = vld [vmem:[#allocation2 + $0x191] sm:$0xff] }
 0x1a8   : > { %5644 = vmatprep.mubr.f32.mxu0 %v1087_v11  ;;  %v1099_v11 = vld [vmem:[#allocation2 + $0x1a9] sm:$0xff] }
 0x1a9   : > { %v1820_v7 = vpop.f32.mrf.mxu1  ;;  %v1597_v41 = vpop.f32.mrf.mxu0 }
 0x1aa   : > { %v6756_v54 = vadd.f32 %v1820_v7, %v1595_v9  ;;  %v1100_v7 = vld [vmem:[#allocation2 + $0x1b1] sm:$0xff] }
 0x1ab   : > { %v1822_v20 = vpop.f32.mrf.mxu1  ;;  %v1600_v34 = vpop.f32.mrf.mxu0  ;;  %5645 = vmatmul.mubr.f32.gmra.mxu0 %v1088_v33 }
 0x1ac   : > { %5647 = vmatprep.mubr.f32.mxu0 %v1089_v25  ;;  %v1101_v20 = vld [vmem:[#allocation2 + $0x1c9] sm:$0xff] }
 0x1ad   : > { %v1825_v48 = vpop.f32.mrf.mxu1  ;;  %v1602_v18 = vpop.f32.mrf.mxu0 }
 0x1ae   : > { %v6758_v24 = vadd.f32 %v1825_v48, %v1600_v34  ;;  %v1102_v18 = vld [vmem:[#allocation2 + $0x1d1] sm:$0xff] }
 0x1af   : > { %v1827_v52 = vpop.f32.mrf.mxu1  ;;  %v1605_v47 = vpop.f32.mrf.mxu0  ;;  %5648 = vmatmul.mubr.f32.gmra.mxu0 %v1090_v21 }
 0x1b0   : > { %5650 = vmatprep.mubr.f32.mxu0 %v1091_v38 }
 0x1b1   : > { %v1830_v27 = vpop.f32.mrf.mxu1  ;;  %v1607_v42 = vpop.f32.mrf.mxu0 }
 0x1b2   : > { %v6760_v44 = vadd.f32 %v1830_v27, %v1605_v47  ;;  %v1103_v47 = vld [vmem:[#allocation2 + $0x1e9] sm:$0xff] }
 0x1b3   : > { %v1832_v50 = vpop.f32.mrf.mxu1  ;;  %v1610_v43 = vpop.f32.mrf.mxu0  ;;  %5651 = vmatmul.mubr.f32.gmra.mxu0 %v1092_v37 }
 0x1b4   : > { %5653 = vmatprep.mubr.f32.mxu0 %v1093_v5  ;;  %v1104_v5 = vld [vmem:[#allocation2 + $0x1f1] sm:$0xff] }
 0x1b5   : > { %v1835_v12 = vpop.f32.mrf.mxu1  ;;  %v1612_v22 = vpop.f32.mrf.mxu0 }
 0x1b6   : > { %v6762_v49 = vadd.f32 %v1835_v12, %v1610_v43 }
 0x1b7   : > { %v1837_v62 = vpop.f32.mrf.mxu1  ;;  %v1615_v23 = vpop.f32.mrf.mxu0  ;;  %5654 = vmatmul.mubr.f32.gmra.mxu0 %v1094_v61 }
 0x1b8   : > { %5656 = vmatprep.mubr.f32.mxu0 %v1095_v57 }
 0x1b9   : > { %v1840_v13 = vpop.f32.mrf.mxu1  ;;  %v1617_v1 = vpop.f32.mrf.mxu0 }
 0x1ba   : > { %v6764_v29 = vadd.f32 %v1840_v13, %v1615_v23  ;;  %v1107_v23 = vld [vmem:[#allocation2 + $0x229] sm:$0xff] }
 0x1bb   : > { %v1842_v19 = vpop.f32.mrf.mxu1  ;;  %v1620_v55 = vpop.f32.mrf.mxu0  ;;  %5657 = vmatmul.mubr.f32.gmra.mxu0 %v1096_v58 }
 0x1bc   : > { %5659 = vmatprep.mubr.f32.mxu0 %v1097_v8  ;;  %v1108_v8 = vld [vmem:[#allocation2 + $0x231] sm:$0xff] }
 0x1bd   : > { %v1845_v4 = vpop.f32.mrf.mxu1  ;;  %v1622_v17 = vpop.f32.mrf.mxu0 }
 0x1be   : > { %v6766_v16 = vadd.f32 %v1845_v4, %v1620_v55 }
 0x1bf   : > { %v1847_v9 = vpop.f32.mrf.mxu1  ;;  %v1625_v33 = vpop.f32.mrf.mxu0  ;;  %5660 = vmatmul.mubr.f32.gmra.mxu0 %v1098_v59 }
 0x1c0   : > { %5662 = vmatprep.mubr.f32.mxu0 %v1099_v11 }
 0x1c1   : > { %v1850_v41 = vpop.f32.mrf.mxu1  ;;  %v1627_v25 = vpop.f32.mrf.mxu0 }
 0x1c2   : > { %v6768_v34 = vadd.f32 %v1850_v41, %v1625_v33 }
 0x1c3   : > { %v1852_v21 = vpop.f32.mrf.mxu1  ;;  %v1630_v48 = vpop.f32.mrf.mxu0  ;;  %5663 = vmatmul.mubr.f32.gmra.mxu0 %v1100_v7 }
 0x1c4   : > { %5665 = vmatprep.mubr.f32.mxu0 %v1101_v20 }
 0x1c5   : > { %v1855_v38 = vpop.f32.mrf.mxu1  ;;  %v1632_v52 = vpop.f32.mrf.mxu0 }
 0x1c6   : > { %v6770_v37 = vadd.f32 %v1855_v38, %v1630_v48 }
 0x1c7   : > { %v1857_v27 = vpop.f32.mrf.mxu1  ;;  %v1635_v42 = vpop.f32.mrf.mxu0  ;;  %5666 = vmatmul.mubr.f32.gmra.mxu0 %v1102_v18 }
 0x1c8   : > { %5668 = vmatprep.mubr.f32.mxu0 %v1103_v47 }
 0x1c9   : > { %v1860_v50 = vpop.f32.mrf.mxu1  ;;  %v1637_v43 = vpop.f32.mrf.mxu0 }
 0x1ca   : > { %v6772_v61 = vadd.f32 %v1860_v50, %v1635_v42 }
 0x1cb   : > { %v1862_v12 = vpop.f32.mrf.mxu1  ;;  %v1640_v22 = vpop.f32.mrf.mxu0  ;;  %5669 = vmatmul.mubr.f32.gmra.mxu0 %v1104_v5 }
 0x1cc   : > { %5671 = vmatprep.mubr.f32.mxu0 %v6730_v28 }
 0x1cd   : > { %v1865_v57 = vpop.f32.mrf.mxu1  ;;  %v1642_v62 = vpop.f32.mrf.mxu0 }
 0x1ce   : > { %v6775_v58 = vadd.f32 %v1865_v57, %v1640_v22 }
 0x1cf   : > { %v1867_v13 = vpop.f32.mrf.mxu1  ;;  %v1645_v1 = vpop.f32.mrf.mxu0  ;;  %5672 = vmatmul.mubr.f32.gmra.mxu0 %v6736_v51 }
 0x1d0   : > { %5674 = vmatprep.mubr.f32.mxu0 %v1107_v23 }
 0x1d1   : > { %v1870_v19 = vpop.f32.mrf.mxu1  ;;  %v1647_v55 = vpop.f32.mrf.mxu0 }
 0x1d2   : > { %v6778_v59 = vadd.f32 %v1870_v19, %v1645_v1  ;;  %v2964_v1 = vld [vmem:[#allocation9 + $0x70] sm:$0xff] }
 0x1d3   : > { %v1872_v4 = vpop.f32.mrf.mxu1  ;;  %v1650_v17 = vpop.f32.mrf.mxu0  ;;  %5675 = vmatmul.mubr.f32.gmra.mxu0 %v1108_v8 }
 0x1d5   : > { %v1875_v11 = vpop.f32.mrf.mxu1  ;;  %v1652_v28 = vpop.f32.mrf.mxu0 }
 0x1d6   : > { %v6780_v9 = vadd.f32 %v1875_v11, %v1650_v17  ;;  %v2963_v11 = vld [vmem:[#allocation9 + $0x68] sm:$0xff] }
 0x1d7   : > { %v1877_v33 = vpop.f32.mrf.mxu1  ;;  %v1945_v7 = vpop.f32.mrf.mxu0 }
 0x1d8   : > { %v1946_v41 = vadd.f32 %v1945_v7, %v6682_v26  ;;  %v2965_v26 = vld [vmem:[#allocation9 + $0x78] sm:$0xff] }
 0x1d9   : > { %v1947_v25 = vpop.f32.mrf.mxu0  ;;  %v2170_v20 = vpop.f32.mrf.mxu1  ;;  %3959 = vmatpush1.msra.mxu1 %v2965_v26 }
 0x1da   : > { %v6783_v51 = vadd.f32 %v2170_v20, %v1946_v41  ;;  %3960 = vmatprep.subr.mxu1 %v6011_v0  ;;  %v2962_v20 = vld [vmem:[#allocation9 + $0x60] sm:$0xff] }
 0x1db   : > { %v1950_v21 = vpop.f32.mrf.mxu0  ;;  %v2172_v48 = vpop.f32.mrf.mxu1  ;;  %3961 = vmatpush1.msra.mxu1 %v2964_v1 }
 0x1dc   : > { %v1951_v18 = vadd.f32 %v1950_v21, %v6686_v45  ;;  %3962 = vmatprep.subr.mxu1 %v6011_v0 }
 0x1dd   : > { %v1952_v38 = vpop.f32.mrf.mxu0  ;;  %v2175_v52 = vpop.f32.mrf.mxu1  ;;  %3963 = vmatpush1.msra.mxu1 %v2963_v11 }
 0x1de   : > { %v6786_v47 = vadd.f32 %v2175_v52, %v1951_v18  ;;  %3964 = vmatprep.subr.mxu1 %v6011_v0 }
 0x1df   : > { %v1955_v27 = vpop.f32.mrf.mxu0  ;;  %v2177_v42 = vpop.f32.mrf.mxu1  ;;  %3965 = vmatpush1.msra.mxu1 %v2962_v20 }
 0x1e0   : > { %v1956_v5 = vadd.f32 %v1955_v27, %v6690_v35  ;;  %3966 = vmatprep.subr.mxu1 %v6011_v0  ;;  %v2961_v27 = vld [vmem:[#allocation9 + $0x58] sm:$0xff] }
 0x1e1   : > { %v1957_v50 = vpop.f32.mrf.mxu0  ;;  %v2180_v43 = vpop.f32.mrf.mxu1  ;;  %3967 = vmatpush1.msra.mxu1 %v2961_v27 }
 0x1e2   : > { %v6789_v12 = vadd.f32 %v2180_v43, %v1956_v5  ;;  %3968 = vmatprep.subr.mxu1 %v6011_v0 }
 0x1e3   : > { %v1960_v22 = vpop.f32.mrf.mxu0  ;;  %v2182_v57 = vpop.f32.mrf.mxu1 }
 0x1e4   : > { %v1961_v62 = vadd.f32 %v1960_v22, %v6694_v3  ;;  %v2960_v22 = vld [vmem:[#allocation9 + $0x50] sm:$0xff] }
 0x1e5   : > { %v1962_v45 = vpop.f32.mrf.mxu0  ;;  %v2185_v23 = vpop.f32.mrf.mxu1  ;;  %3969 = vmatpush1.msra.mxu1 %v2960_v22 }
 0x1e6   : > { %v6793_v13 = vadd.f32 %v2185_v23, %v1961_v62  ;;  %3970 = vmatprep.subr.mxu1 %v6011_v0 }
 0x1e7   : > { %v1965_v8 = vpop.f32.mrf.mxu0  ;;  %v2187_v19 = vpop.f32.mrf.mxu1 }
 0x1e8   : > { %v1966_v35 = vadd.f32 %v1965_v8, %v6698_v14  ;;  %v2959_v8 = vld [vmem:[#allocation9 + $0x48] sm:$0xff] }
 0x1e9   : > { %v1967_v55 = vpop.f32.mrf.mxu0  ;;  %v2190_v4 = vpop.f32.mrf.mxu1  ;;  %3971 = vmatpush1.msra.mxu1 %v2959_v8 }
 0x1ea   : > { %v6797_v17 = vadd.f32 %v2190_v4, %v1966_v35  ;;  %3972 = vmatprep.subr.mxu1 %v6011_v0 }
 0x1eb   : > { %v1970_v3 = vpop.f32.mrf.mxu0  ;;  %v2192_v28 = vpop.f32.mrf.mxu1 }
 0x1ec   : > { %v1971_v33 = vadd.f32 %v1970_v3, %v6702_v39  ;;  %v2958_v3 = vld [vmem:[#allocation9 + $0x40] sm:$0xff] }
 0x1ed   : > { %v1972_v7 = vpop.f32.mrf.mxu0  ;;  %v2195_v41 = vpop.f32.mrf.mxu1  ;;  %3973 = vmatpush1.msra.mxu1 %v2958_v3 }
 0x1ee   : > { %v6801_v25 = vadd.f32 %v2195_v41, %v1971_v33  ;;  %3974 = vmatprep.subr.mxu1 %v6011_v0 }
 0x1ef   : > { %v1975_v14 = vpop.f32.mrf.mxu0  ;;  %v2197_v21 = vpop.f32.mrf.mxu1 }
 0x1f0   : > { %v1976_v48 = vadd.f32 %v1975_v14, %v6706_v31  ;;  %v2957_v14 = vld [vmem:[#allocation9 + $0x38] sm:$0xff] }
 0x1f1   : > { %v1977_v18 = vpop.f32.mrf.mxu0  ;;  %v2200_v38 = vpop.f32.mrf.mxu1  ;;  %3975 = vmatpush1.msra.mxu1 %v2957_v14 }
 0x1f2   : > { %v6805_v52 = vadd.f32 %v2200_v38, %v1976_v48  ;;  %3976 = vmatprep.subr.mxu1 %v6011_v0 }
 0x1f3   : > { %v1980_v39 = vpop.f32.mrf.mxu0  ;;  %v2202_v42 = vpop.f32.mrf.mxu1 }
 0x1f4   : > { %v1981_v5 = vadd.f32 %v1980_v39, %v6710_v46  ;;  %v2956_v39 = vld [vmem:[#allocation9 + $0x30] sm:$0xff] }
 0x1f5   : > { %v1982_v50 = vpop.f32.mrf.mxu0  ;;  %v2205_v43 = vpop.f32.mrf.mxu1  ;;  %3977 = vmatpush1.msra.mxu1 %v2956_v39 }
 0x1f6   : > { %v6809_v26 = vadd.f32 %v2205_v43, %v1981_v5  ;;  %3978 = vmatprep.subr.mxu1 %v6011_v0 }
 0x1f7   : > { %v1985_v31 = vpop.f32.mrf.mxu0  ;;  %v2207_v57 = vpop.f32.mrf.mxu1 }
 0x1f8   : > { %v1986_v62 = vadd.f32 %v1985_v31, %v6714_v56  ;;  %v2955_v31 = vld [vmem:[#allocation9 + $0x28] sm:$0xff] }
 0x1f9   : > { %v1987_v45 = vpop.f32.mrf.mxu0  ;;  %v2210_v23 = vpop.f32.mrf.mxu1  ;;  %3979 = vmatpush1.msra.mxu1 %v2955_v31 }
 0x1fa   : > { %v6813_v1 = vadd.f32 %v2210_v23, %v1986_v62  ;;  %3980 = vmatprep.subr.mxu1 %v6011_v0 }
 0x1fb   : > { %v1990_v46 = vpop.f32.mrf.mxu0  ;;  %v2212_v19 = vpop.f32.mrf.mxu1 }
 0x1fc   : > { %v1991_v35 = vadd.f32 %v1990_v46, %v6718_v2  ;;  %v2954_v46 = vld [vmem:[#allocation9 + $0x20] sm:$0xff] }
 0x1fd   : > { %v1992_v55 = vpop.f32.mrf.mxu0  ;;  %v2215_v4 = vpop.f32.mrf.mxu1  ;;  %3981 = vmatpush1.msra.mxu1 %v2954_v46 }
 0x1fe   : > { %v6817_v11 = vadd.f32 %v2215_v4, %v1991_v35  ;;  %3982 = vmatprep.subr.mxu1 %v6011_v0 }
 0x1ff   : > { %v1995_v56 = vpop.f32.mrf.mxu0  ;;  %v2217_v28 = vpop.f32.mrf.mxu1 }
 0x200   : > { %v1996_v33 = vadd.f32 %v1995_v56, %v6722_v32  ;;  %v2953_v56 = vld [vmem:[#allocation9 + $0x18] sm:$0xff] }
 0x201   : > { %v1997_v7 = vpop.f32.mrf.mxu0  ;;  %v2220_v41 = vpop.f32.mrf.mxu1  ;;  %3983 = vmatpush1.msra.mxu1 %v2953_v56 }
 0x202   : > { %v6821_v20 = vadd.f32 %v2220_v41, %v1996_v33  ;;  %3984 = vmatprep.subr.mxu1 %v6011_v0 }
 0x203   : > { %v2000_v2 = vpop.f32.mrf.mxu0  ;;  %v2222_v21 = vpop.f32.mrf.mxu1 }
 0x204   : > { %v2001_v48 = vadd.f32 %v2000_v2, %v6726_v63  ;;  %v2952_v2 = vld [vmem:[#allocation9 + $0x10] sm:$0xff] }
 0x205   : > { %v2002_v18 = vpop.f32.mrf.mxu0  ;;  %v2225_v38 = vpop.f32.mrf.mxu1  ;;  %3985 = vmatpush1.msra.mxu1 %v2952_v2 }
 0x206   : > { %v6825_v27 = vadd.f32 %v2225_v38, %v2001_v48  ;;  %3986 = vmatprep.subr.mxu1 %v6011_v0 }
 0x207   : > { %v2005_v32 = vpop.f32.mrf.mxu0  ;;  %v2227_v42 = vpop.f32.mrf.mxu1 }
 0x208   : > { %v2006_v5 = vadd.f32 %v2005_v32, %v6732_v30 }
 0x209   : > { %v2007_v50 = vpop.f32.mrf.mxu0  ;;  %v2230_v43 = vpop.f32.mrf.mxu1 }
 0x20a   : > { %v6829_v22 = vadd.f32 %v2230_v43, %v2006_v5 }
 0x20b   : > { %v2010_v63 = vpop.f32.mrf.mxu0  ;;  %v2232_v57 = vpop.f32.mrf.mxu1 }
 0x20c   : > { %v2011_v62 = vadd.f32 %v2010_v63, %v6738_v10 }
 0x20d   : > { %v2012_v45 = vpop.f32.mrf.mxu0  ;;  %v2235_v23 = vpop.f32.mrf.mxu1 }
 0x20e   : > { %v6833_v8 = vadd.f32 %v2235_v23, %v2011_v62 }
 0x20f   : > { %v2015_v30 = vpop.f32.mrf.mxu0  ;;  %v2237_v19 = vpop.f32.mrf.mxu1 }
 0x210   : > { %v2016_v35 = vadd.f32 %v2015_v30, %v6741_v60 }
 0x211   : > { %v2017_v55 = vpop.f32.mrf.mxu0  ;;  %v2240_v4 = vpop.f32.mrf.mxu1 }
 0x212   : > { %v6837_v3 = vadd.f32 %v2240_v4, %v2016_v35 }
 0x213   : > { %v2020_v10 = vpop.f32.mrf.mxu0  ;;  %v2242_v28 = vpop.f32.mrf.mxu1 }
 0x214   : > { %v2021_v33 = vadd.f32 %v2020_v10, %v6744_v40 }
 0x215   : > { %v2022_v7 = vpop.f32.mrf.mxu0  ;;  %v2245_v41 = vpop.f32.mrf.mxu1 }
 0x216   : > { %v6841_v14 = vadd.f32 %v2245_v41, %v2021_v33 }
 0x217   : > { %v2025_v60 = vpop.f32.mrf.mxu0  ;;  %v2247_v21 = vpop.f32.mrf.mxu1 }
 0x218   : > { %v2026_v48 = vadd.f32 %v2025_v60, %v6748_v53 }
 0x219   : > { %v2027_v18 = vpop.f32.mrf.mxu0  ;;  %v2250_v38 = vpop.f32.mrf.mxu1 }
 0x21a   : > { %v6845_v39 = vadd.f32 %v2250_v38, %v2026_v48 }
 0x21b   : > { %v2030_v32 = vpop.f32.mrf.mxu0  ;;  %v2252_v40 = vpop.f32.mrf.mxu1 }
 0x21c   : > { %v2031_v42 = vadd.f32 %v2030_v32, %v6750_v15 }
 0x21d   : > { %v2032_v5 = vpop.f32.mrf.mxu0  ;;  %v2255_v50 = vpop.f32.mrf.mxu1 }
 0x21e   : > { %v6848_v43 = vadd.f32 %v2255_v50, %v2031_v42 }
 0x21f   : > { %v2035_v31 = vpop.f32.mrf.mxu0  ;;  %v2257_v63 = vpop.f32.mrf.mxu1 }
 0x220   : > { %v2036_v57 = vadd.f32 %v2035_v31, %v6752_v6 }
 0x221   : > { %v2037_v62 = vpop.f32.mrf.mxu0  ;;  %v2260_v53 = vpop.f32.mrf.mxu1 }
 0x222   : > { %v6851_v45 = vadd.f32 %v2260_v53, %v2036_v57 }
 0x223   : > { %v2040_v23 = vpop.f32.mrf.mxu0  ;;  %v2262_v46 = vpop.f32.mrf.mxu1 }
 0x224   : > { %v2041_v30 = vadd.f32 %v2040_v23, %v6754_v36 }
 0x225   : > { %v2042_v19 = vpop.f32.mrf.mxu0  ;;  %v2265_v35 = vpop.f32.mrf.mxu1 }
 0x226   : > { %v6854_v55 = vadd.f32 %v2265_v35, %v2041_v30 }
 0x227   : > { %v2045_v15 = vpop.f32.mrf.mxu0  ;;  %v2267_v4 = vpop.f32.mrf.mxu1 }
 0x228   : > { %v2046_v56 = vadd.f32 %v2045_v15, %v6756_v54 }
 0x229   : > { %v2047_v10 = vpop.f32.mrf.mxu0  ;;  %v2270_v28 = vpop.f32.mrf.mxu1 }
 0x22a   : > { %v6857_v33 = vadd.f32 %v2270_v28, %v2046_v56  ;;  %v2997_v10 = vld [vmem:[#allocation9 + $0x178] sm:$0xff] }
 0x22b   : > { %v2050_v6 = vpop.f32.mrf.mxu0  ;;  %v2272_v7 = vpop.f32.mrf.mxu1  ;;  %4184 = vmatpush1.msra.mxu0 %v2997_v10 }
 0x22c   : > { %v2051_v41 = vadd.f32 %v2050_v6, %v6758_v24  ;;  %4185 = vmatprep.subr.mxu0 %v6011_v0  ;;  %v2996_v7 = vld [vmem:[#allocation9 + $0x170] sm:$0xff] }
 0x22d   : > { %v2052_v2 = vpop.f32.mrf.mxu0  ;;  %v2275_v60 = vpop.f32.mrf.mxu1  ;;  %4186 = vmatpush1.msra.mxu0 %v2996_v7 }
 0x22e   : > { %v6860_v21 = vadd.f32 %v2275_v60, %v2051_v41  ;;  %4187 = vmatprep.subr.mxu0 %v6011_v0  ;;  %v2995_v60 = vld [vmem:[#allocation9 + $0x168] sm:$0xff] }
 0x22f   : > { %v2055_v36 = vpop.f32.mrf.mxu0  ;;  %v2277_v48 = vpop.f32.mrf.mxu1  ;;  %4188 = vmatpush1.msra.mxu0 %v2995_v60 }
 0x230   : > { %v2056_v18 = vadd.f32 %v2055_v36, %v6760_v44  ;;  %4189 = vmatprep.subr.mxu0 %v6011_v0 }
 0x231   : > { %v2057_v38 = vpop.f32.mrf.mxu0  ;;  %v2280_v32 = vpop.f32.mrf.mxu1 }
 0x232   : > { %v6863_v40 = vadd.f32 %v2280_v32, %v2056_v18 }
 0x233   : > { %v2060_v54 = vpop.f32.mrf.mxu0  ;;  %v2282_v42 = vpop.f32.mrf.mxu1 }
 0x234   : > { %v2061_v5 = vadd.f32 %v2060_v54, %v6762_v49  ;;  %v2993_v42 = vld [vmem:[#allocation9 + $0x158] sm:$0xff] }
 0x235   : > { %v2062_v50 = vpop.f32.mrf.mxu0  ;;  %v2285_v31 = vpop.f32.mrf.mxu1 }
 0x236   : > { %v6866_v63 = vadd.f32 %v2285_v31, %v2061_v5 }
 0x237   : > { %v2065_v24 = vpop.f32.mrf.mxu0  ;;  %v2287_v57 = vpop.f32.mrf.mxu1 }
 0x238   : > { %v2066_v62 = vadd.f32 %v2065_v24, %v6764_v29 }
 0x239   : > { %v2067_v53 = vpop.f32.mrf.mxu0  ;;  %v2290_v23 = vpop.f32.mrf.mxu1 }
 0x23a   : > { %v6869_v46 = vadd.f32 %v2290_v23, %v2066_v62  ;;  %v2991_v53 = vld [vmem:[#allocation9 + $0x148] sm:$0xff] }
 0x23b   : > { %v2070_v44 = vpop.f32.mrf.mxu0  ;;  %v2292_v30 = vpop.f32.mrf.mxu1 }
 0x23c   : > { %v2071_v19 = vadd.f32 %v2070_v44, %v6766_v16 }
 0x23d   : > { %v2072_v35 = vpop.f32.mrf.mxu0  ;;  %v2295_v15 = vpop.f32.mrf.mxu1 }
 0x23e   : > { %v6872_v4 = vadd.f32 %v2295_v15, %v2071_v19 }
 0x23f   : > { %v2075_v49 = vpop.f32.mrf.mxu0  ;;  %v2297_v56 = vpop.f32.mrf.mxu1 }
 0x240   : > { %v2076_v28 = vadd.f32 %v2075_v49, %v6768_v34  ;;  %v2994_v34 = vld [vmem:[#allocation9 + $0x160] sm:$0xff]  ;;  %v2989_v49 = vld [vmem:[#allocation9 + $0x138] sm:$0xff] }
 0x241   : > { %v2077_v6 = vpop.f32.mrf.mxu0  ;;  %v2300_v29 = vpop.f32.mrf.mxu1  ;;  %4190 = vmatpush1.msra.mxu0 %v2994_v34 }
 0x242   : > { %v6876_v41 = vadd.f32 %v2300_v29, %v2076_v28  ;;  %4191 = vmatprep.subr.mxu0 %v6011_v0 }
 0x243   : > { %v2080_v2 = vpop.f32.mrf.mxu0  ;;  %v2302_v16 = vpop.f32.mrf.mxu1  ;;  %4192 = vmatpush1.msra.mxu0 %v2993_v42 }
 0x244   : > { %v2081_v36 = vadd.f32 %v2080_v2, %v6770_v37  ;;  %4193 = vmatprep.subr.mxu0 %v6011_v0  ;;  %v2992_v37 = vld [vmem:[#allocation9 + $0x150] sm:$0xff]  ;;  %v2987_v2 = vld [vmem:[#allocation9 + $0x128] sm:$0xff] }
 0x245   : > { %v2082_v48 = vpop.f32.mrf.mxu0  ;;  %v2305_v18 = vpop.f32.mrf.mxu1  ;;  %4194 = vmatpush1.msra.mxu0 %v2992_v37  ;;  %v2983_v37 = vld [vmem:[#allocation9 + $0x108] sm:$0xff] }
 0x246   : > { %v6881_v38 = vadd.f32 %v2305_v18, %v2081_v36  ;;  %4195 = vmatprep.subr.mxu0 %v6011_v0 }
 0x247   : > { %v2085_v32 = vpop.f32.mrf.mxu0  ;;  %v2307_v54 = vpop.f32.mrf.mxu1  ;;  %4196 = vmatpush1.msra.mxu0 %v2991_v53 }
 0x248   : > { %v2086_v5 = vadd.f32 %v2085_v32, %v6772_v61  ;;  %4197 = vmatprep.subr.mxu0 %v6011_v0  ;;  %v2990_v61 = vld [vmem:[#allocation9 + $0x140] sm:$0xff]  ;;  %v2985_v32 = vld [vmem:[#allocation9 + $0x118] sm:$0xff] }
 0x249   : > { %v2087_v50 = vpop.f32.mrf.mxu0  ;;  %v2310_v31 = vpop.f32.mrf.mxu1  ;;  %4198 = vmatpush1.msra.mxu0 %v2990_v61  ;;  %v2981_v61 = vld [vmem:[#allocation9 + $0xf8] sm:$0xff] }
 0x24a   : > { %v6886_v24 = vadd.f32 %v2310_v31, %v2086_v5  ;;  %4199 = vmatprep.subr.mxu0 %v6011_v0  ;;  %v2951_v50 = vld [vmem:[#allocation9 + $0x8] sm:$0xff] }
 0x24b   : > { %v2090_v57 = vpop.f32.mrf.mxu0  ;;  %v2312_v62 = vpop.f32.mrf.mxu1  ;;  %4200 = vmatpush1.msra.mxu0 %v2989_v49  ;;  %3987 = vmatpush1.msra.mxu1 %v2951_v50 }
 0x24c   : > { %v2091_v23 = vadd.f32 %v2090_v57, %v6775_v58  ;;  %4201 = vmatprep.subr.mxu0 %v6011_v0  ;;  %v2988_v58 = vld [vmem:[#allocation9 + $0x130] sm:$0xff]  ;;  %3988 = vmatprep.subr.mxu1 %v6011_v0 }
 0x24d   : > { %v2092_v44 = vpop.f32.mrf.mxu0  ;;  %v2315_v30 = vpop.f32.mrf.mxu1  ;;  %4202 = vmatpush1.msra.mxu0 %v2988_v58  ;;  %v3012_v58 = vld [vmem:[#allocation9 + $0x1f0] sm:$0xff] }
 0x24e   : > { %v6891_v19 = vadd.f32 %v2315_v30, %v2091_v23  ;;  %4203 = vmatprep.subr.mxu0 %v6011_v0 }
 0x24f   : > { %v2095_v35 = vpop.f32.mrf.mxu0  ;;  %v2317_v15 = vpop.f32.mrf.mxu1  ;;  %4204 = vmatpush1.msra.mxu0 %v2987_v2 }
 0x250   : > { %v2096_v56 = vadd.f32 %v2095_v35, %v6778_v59  ;;  %4205 = vmatprep.subr.mxu0 %v6011_v0  ;;  %v2986_v59 = vld [vmem:[#allocation9 + $0x120] sm:$0xff]  ;;  %v3013_v15 = vld [vmem:[#allocation9 + $0x1f8] sm:$0xff] }
 0x251   : > { %v2097_v10 = vpop.f32.mrf.mxu0  ;;  %v2320_v28 = vpop.f32.mrf.mxu1  ;;  %4206 = vmatpush1.msra.mxu0 %v2986_v59 }
 0x252   : > { %v6896_v6 = vadd.f32 %v2320_v28, %v2096_v56  ;;  %4207 = vmatprep.subr.mxu0 %v6011_v0 }
 0x253   : > { %v2100_v29 = vpop.f32.mrf.mxu0  ;;  %v2322_v7 = vpop.f32.mrf.mxu1  ;;  %4208 = vmatpush1.msra.mxu0 %v2985_v32  ;;  %v3011_v32 = vld [vmem:[#allocation9 + $0x1e8] sm:$0xff] }
 0x254   : > { %v2101_v16 = vadd.f32 %v2100_v29, %v6780_v9  ;;  %4209 = vmatprep.subr.mxu0 %v6011_v0  ;;  %v2984_v9 = vld [vmem:[#allocation9 + $0x110] sm:$0xff] }
 0x255   : > { %v2102_v60 = vpop.f32.mrf.mxu0  ;;  %v2325_v36 = vpop.f32.mrf.mxu1  ;;  %4210 = vmatpush1.msra.mxu0 %v2984_v9 }
 0x256   : > { %v6901_v48 = vadd.f32 %v2325_v36, %v2101_v16  ;;  %4211 = vmatprep.subr.mxu0 %v6011_v0  ;;  %v2979_v60 = vld [vmem:[#allocation9 + $0xe8] sm:$0xff] }
 0x257   : > { %v5631_v18 = vpop.f32.mrf.mxu0  ;;  %v2327_v34 = vpop.f32.mrf.mxu1  ;;  %4212 = vmatpush1.msra.mxu0 %v2983_v37 }
 0x258   : > { %v6905_v54 = vadd.f32 %v5631_v18, %v6786_v47  ;;  %v2950_v47 = vld [vmem:[#allocation9] sm:$0xff]  ;;  %4213 = vmatprep.subr.mxu0 %v6011_v0 }
 0x259   : > { %v2395_v42 = vpop.f32.mrf.mxu0  ;;  %3989 = vmatpush1.msra.mxu1 %v2950_v47  ;;  %v2978_v34 = vld [vmem:[#allocation9 + $0xe0] sm:$0xff] }
 0x25a   : > { %v6909_v5 = vadd.f32 %v2395_v42, %v6783_v51  ;;  %v2594_v62 = vmul.f32 %v6905_v54, %v6905_v54  ;;  %v2982_v51 = vld [vmem:[#allocation9 + $0x100] sm:$0xff]  ;;  %3990 = vmatprep.subr.mxu1 %v6011_v0 }
 0x25b   : > { %v5634_v31 = vpop.f32.mrf.mxu0  ;;  %4214 = vmatpush1.msra.mxu0 %v2982_v51  ;;  %3991 = vmatpush2.msra.mxu1 %v2981_v61 }
 0x25c   : > { %v2593_v57 = vmul.f32 %v6909_v5, %v6909_v5  ;;  %v2555_v23 = vadd.f32 %v6905_v54, %v6909_v5  ;;  %v6921_v44 = vadd.f32 %v5634_v31, %v6793_v13  ;;  %4215 = vmatprep.subr.mxu0 %v6011_v0  ;;  %3992 = vmatprep.subr.mxu1 %v6011_v0  ;;  %v2980_v13 = vld [vmem:[#allocation9 + $0xf0] sm:$0xff] }
 0x25d   : > { %v2405_v53 = vpop.f32.mrf.mxu0  ;;  %4216 = vmatpush2.msra.mxu0 %v3013_v15  ;;  %3993 = vmatpush2.msra.mxu1 %v2980_v13 }
 0x25e   : > { %v6924_v30 = vadd.f32 %v2405_v53, %v6789_v12  ;;  %v2625_v49 = vadd.f32 %v2594_v62, %v2593_v57  ;;  %4217 = vmatprep.subr.mxu0 %v6011_v0  ;;  %v2596_v29 = vmul.f32 %v6921_v44, %v6921_v44  ;;  %3994 = vmatprep.subr.mxu1 %v6011_v0  ;;  %v2977_v57 = vld [vmem:[#allocation9 + $0xd8] sm:$0xff] }
 0x25f   : > { %v5637_v35 = vpop.f32.mrf.mxu0  ;;  %3995 = vmatpush2.msra.mxu1 %v2979_v60  ;;  %4218 = vmatpush2.msra.mxu0 %v3012_v58 }
 0x260   : > { %v2556_v56 = vadd.f32 %v2555_v23, %v6924_v30  ;;  %v2595_v10 = vmul.f32 %v6924_v30, %v6924_v30  ;;  %v6933_v12 = vadd.f32 %v5637_v35, %v6801_v25  ;;  %3996 = vmatprep.subr.mxu1 %v6011_v0  ;;  %4219 = vmatprep.subr.mxu0 %v6011_v0  ;;  %v3010_v23 = vld [vmem:[#allocation9 + $0x1e0] sm:$0xff] }
 0x261   : > { %v2415_v28 = vpop.f32.mrf.mxu0  ;;  %3997 = vmatpush2.msra.mxu1 %v2978_v34  ;;  %4220 = vmatpush2.msra.mxu0 %v3011_v32  ;;  %v2972_v34 = vld [vmem:[#allocation9 + $0xb0] sm:$0xff] }
 0x262   : > { %v2626_v7 = vadd.f32 %v2625_v49, %v2595_v10  ;;  %v6939_v2 = vadd.f32 %v2415_v28, %v6797_v17  ;;  %v2557_v16 = vadd.f32 %v2556_v56, %v6921_v44  ;;  %v2598_v17 = vmul.f32 %v6933_v12, %v6933_v12  ;;  %3998 = vmatprep.subr.mxu1 %v6011_v0  ;;  %v2975_v10 = vld [vmem:[#allocation9 + $0xc8] sm:$0xff] }
 0x263   : > { %v5640_v36 = vpop.f32.mrf.mxu0  ;;  %3999 = vmatpush2.msra.mxu1 %v2977_v57  ;;  %4221 = vmatprep.subr.mxu0 %v6011_v0 }
 0x264   : > { %v2558_v25 = vadd.f32 %v2557_v16, %v6939_v2  ;;  %v2597_v59 = vmul.f32 %v6939_v2, %v6939_v2  ;;  %v2627_v18 = vadd.f32 %v2626_v7, %v2596_v29  ;;  %v6951_v50 = vadd.f32 %v5640_v36, %v6809_v26  ;;  %4000 = vmatprep.subr.mxu1 %v6011_v0  ;;  %v2976_v26 = vld [vmem:[#allocation9 + $0xd0] sm:$0xff]  ;;  %v2974_v29 = vld [vmem:[#allocation9 + $0xc0] sm:$0xff]  ;;  %v3009_v7 = vld [vmem:[#allocation9 + $0x1d8] sm:$0xff] }
 0x265   : > { %v2425_v42 = vpop.f32.mrf.mxu0  ;;  %4001 = vmatpush2.msra.mxu1 %v2976_v26  ;;  %4222 = vmatpush2.msra.mxu0 %v3010_v23  ;;  %v2970_v26 = vld [vmem:[#allocation9 + $0xa0] sm:$0xff] }
 0x266   : > { %v2628_v9 = vadd.f32 %v2627_v18, %v2597_v59  ;;  %v6954_v31 = vadd.f32 %v2425_v42, %v6805_v52  ;;  %v2559_v37 = vadd.f32 %v2558_v25, %v6933_v12  ;;  %v2600_v35 = vmul.f32 %v6951_v50, %v6951_v50  ;;  %4002 = vmatprep.subr.mxu1 %v6011_v0  ;;  %v2973_v18 = vld [vmem:[#allocation9 + $0xb8] sm:$0xff] }
 0x267   : > { %v5643_v47 = vpop.f32.mrf.mxu0  ;;  %4003 = vmatpush2.msra.mxu1 %v2975_v10  ;;  %4223 = vmatprep.subr.mxu0 %v6011_v0  ;;  %v3006_v10 = vld [vmem:[#allocation9 + $0x1c0] sm:$0xff] }
 0x268   : > { %v2560_v62 = vadd.f32 %v2559_v37, %v6954_v31  ;;  %v2599_v53 = vmul.f32 %v6954_v31, %v6954_v31  ;;  %v2629_v51 = vadd.f32 %v2628_v9, %v2598_v17  ;;  %v6963_v52 = vadd.f32 %v5643_v47, %v6817_v11  ;;  %4004 = vmatprep.subr.mxu1 %v6011_v0 }
 0x269   : > { %v2435_v61 = vpop.f32.mrf.mxu0  ;;  %4005 = vmatpush2.msra.mxu1 %v2974_v29  ;;  %4224 = vmatpush2.msra.mxu0 %v3009_v7  ;;  %v2969_v29 = vld [vmem:[#allocation9 + $0x98] sm:$0xff] }
 0x26a   : > { %v2630_v15 = vadd.f32 %v2629_v51, %v2599_v53  ;;  %v6969_v49 = vadd.f32 %v2435_v61, %v6813_v1  ;;  %v2561_v56 = vadd.f32 %v2560_v62, %v6951_v50  ;;  %v2602_v1 = vmul.f32 %v6963_v52, %v6963_v52  ;;  %4006 = vmatprep.subr.mxu1 %v6011_v0 }
 0x26b   : > { %v5646_v13 = vpop.f32.mrf.mxu0  ;;  %4007 = vmatpush2.msra.mxu1 %v2973_v18  ;;  %4225 = vmatprep.subr.mxu0 %v6011_v0  ;;  %v3004_v18 = vld [vmem:[#allocation9 + $0x1b0] sm:$0xff] }
 0x26c   : > { %v2562_v11 = vadd.f32 %v2561_v56, %v6969_v49  ;;  %v2601_v28 = vmul.f32 %v6969_v49, %v6969_v49  ;;  %v2631_v58 = vadd.f32 %v2630_v15, %v2600_v35  ;;  %v6981_v36 = vadd.f32 %v5646_v13, %v6825_v27  ;;  %4008 = vmatprep.subr.mxu1 %v6011_v0  ;;  %v2971_v27 = vld [vmem:[#allocation9 + $0xa8] sm:$0xff] }
 0x26d   : > { %v2445_v16 = vpop.f32.mrf.mxu0  ;;  %4009 = vmatpush2.msra.mxu1 %v2972_v34 }
 0x26e   : > { %v2632_v60 = vadd.f32 %v2631_v58, %v2601_v28  ;;  %v6984_v25 = vadd.f32 %v2445_v16, %v6821_v20  ;;  %v2563_v59 = vadd.f32 %v2562_v11, %v6963_v52  ;;  %v3008_v20 = vld [vmem:[#allocation9 + $0x1d0] sm:$0xff]  ;;  %v2604_v47 = vmul.f32 %v6981_v36, %v6981_v36  ;;  %4010 = vmatprep.subr.mxu1 %v6011_v0 }
 0x26f   : > { %v5649_v32 = vpop.f32.mrf.mxu0  ;;  %4011 = vmatpush2.msra.mxu1 %v2971_v27  ;;  %4226 = vmatpush2.msra.mxu0 %v3008_v20 }
 0x270   : > { %v2564_v17 = vadd.f32 %v2563_v59, %v6984_v25  ;;  %v2603_v42 = vmul.f32 %v6984_v25, %v6984_v25  ;;  %v2633_v9 = vadd.f32 %v2632_v60, %v2602_v1  ;;  %v6993_v37 = vadd.f32 %v5649_v32, %v6833_v8  ;;  %v3007_v8 = vld [vmem:[#allocation9 + $0x1c8] sm:$0xff]  ;;  %4012 = vmatprep.subr.mxu1 %v6011_v0  ;;  %v3005_v1 = vld [vmem:[#allocation9 + $0x1b8] sm:$0xff] }
 0x271   : > { %v2455_v57 = vpop.f32.mrf.mxu0  ;;  %4013 = vmatpush2.msra.mxu1 %v2970_v26  ;;  %4227 = vmatprep.subr.mxu0 %v6011_v0 }
 0x272   : > { %v2634_v62 = vadd.f32 %v2633_v9, %v2603_v42  ;;  %v6999_v53 = vadd.f32 %v2455_v57, %v6829_v22  ;;  %v2565_v51 = vadd.f32 %v2564_v17, %v6981_v36  ;;  %v2606_v22 = vmul.f32 %v6993_v37, %v6993_v37  ;;  %4228 = vmatpush2.msra.mxu0 %v3007_v8  ;;  %v2968_v9 = vld [vmem:[#allocation9 + $0x90] sm:$0xff] }
 0x273   : > { %v5652_v23 = vpop.f32.mrf.mxu0  ;;  %4229 = vmatprep.subr.mxu0 %v6011_v0  ;;  %4014 = vmatprep.subr.mxu1 %v6011_v0 }
 0x274   : > { %v2566_v61 = vadd.f32 %v2565_v51, %v6999_v53  ;;  %v2605_v35 = vmul.f32 %v6999_v53, %v6999_v53  ;;  %v2635_v15 = vadd.f32 %v2634_v62, %v2604_v47  ;;  %v7011_v11 = vadd.f32 %v5652_v23, %v6841_v14  ;;  %4230 = vmatpush2.msra.mxu0 %v3006_v10  ;;  %v3002_v51 = vld [vmem:[#allocation9 + $0x1a0] sm:$0xff] }
 0x275   : > { %v2465_v56 = vpop.f32.mrf.mxu0  ;;  %4015 = vmatpush2.msra.mxu1 %v2969_v29  ;;  %4231 = vmatprep.subr.mxu0 %v6011_v0 }
 0x276   : > { %v2636_v13 = vadd.f32 %v2635_v15, %v2605_v35  ;;  %v7014_v28 = vadd.f32 %v2465_v56, %v6837_v3  ;;  %v2567_v58 = vadd.f32 %v2566_v61, %v6993_v37  ;;  %v2608_v34 = vmul.f32 %v7011_v11, %v7011_v11  ;;  %4232 = vmatpush2.msra.mxu0 %v3005_v1  ;;  %v2967_v35 = vld [vmem:[#allocation9 + $0x88] sm:$0xff] }
 0x277   : > { %v5655_v7 = vpop.f32.mrf.mxu0  ;;  %4233 = vmatprep.subr.mxu0 %v6011_v0  ;;  %4016 = vmatprep.subr.mxu1 %v6011_v0 }
 0x278   : > { %v2568_v16 = vadd.f32 %v2567_v58, %v7014_v28  ;;  %v2607_v60 = vmul.f32 %v7014_v28, %v7014_v28  ;;  %v2637_v14 = vadd.f32 %v2636_v13, %v2606_v22  ;;  %v7023_v3 = vadd.f32 %v5655_v7, %v6848_v43  ;;  %v3003_v43 = vld [vmem:[#allocation9 + $0x1a8] sm:$0xff]  ;;  %4234 = vmatpush2.msra.mxu0 %v3004_v18  ;;  %v3001_v22 = vld [vmem:[#allocation9 + $0x198] sm:$0xff]  ;;  %v3000_v58 = vld [vmem:[#allocation9 + $0x190] sm:$0xff] }
 0x279   : > { %v2475_v59 = vpop.f32.mrf.mxu0  ;;  %4017 = vmatpush2.msra.mxu1 %v2968_v9  ;;  %4235 = vmatprep.subr.mxu0 %v6011_v0 }
 0x27a   : > { %v2638_v32 = vadd.f32 %v2637_v14, %v2607_v60  ;;  %v7029_v17 = vadd.f32 %v2475_v59, %v6845_v39  ;;  %v2569_v42 = vadd.f32 %v2568_v16, %v7011_v11  ;;  %v2610_v39 = vmul.f32 %v7023_v3, %v7023_v3  ;;  %4236 = vmatpush2.msra.mxu0 %v3003_v43  ;;  %v2966_v60 = vld [vmem:[#allocation9 + $0x80] sm:$0xff] }
 0x27b   : > { %v5658_v27 = vpop.f32.mrf.mxu0  ;;  %4237 = vmatprep.subr.mxu0 %v6011_v0  ;;  %4018 = vmatprep.subr.mxu1 %v6011_v0 }
 0x27c   : > { %v2570_v20 = vadd.f32 %v2569_v42, %v7029_v17  ;;  %v2609_v57 = vmul.f32 %v7029_v17, %v7029_v17  ;;  %v2639_v47 = vadd.f32 %v2638_v32, %v2608_v34  ;;  %v7041_v23 = vadd.f32 %v5658_v27, %v6854_v55  ;;  %4238 = vmatpush2.msra.mxu0 %v3002_v51  ;;  %v2998_v42 = vld [vmem:[#allocation9 + $0x180] sm:$0xff] }
 0x27d   : > { %v2485_v62 = vpop.f32.mrf.mxu0  ;;  %4019 = vmatpush2.msra.mxu1 %v2967_v35  ;;  %4239 = vmatprep.subr.mxu0 %v6011_v0 }
 0x27e   : > { %v2640_v26 = vadd.f32 %v2639_v47, %v2609_v57  ;;  %v7044_v8 = vadd.f32 %v2485_v62, %v6851_v45  ;;  %v2571_v61 = vadd.f32 %v2570_v20, %v7023_v3  ;;  %v2612_v29 = vmul.f32 %v7041_v23, %v7041_v23  ;;  %4240 = vmatpush2.msra.mxu0 %v3001_v22 }
 0x27f   : > { %v5661_v15 = vpop.f32.mrf.mxu0  ;;  %4241 = vmatprep.subr.mxu0 %v6011_v0  ;;  %4020 = vmatprep.subr.mxu1 %v6011_v0 }
 0x280   : > { %v2572_v56 = vadd.f32 %v2571_v61, %v7044_v8  ;;  %v2611_v10 = vmul.f32 %v7044_v8, %v7044_v8  ;;  %v2641_v55 = vadd.f32 %v2640_v26, %v2610_v39  ;;  %v7053_v45 = vadd.f32 %v5661_v15, %v6860_v21  ;;  %v2999_v21 = vld [vmem:[#allocation9 + $0x188] sm:$0xff]  ;;  %4242 = vmatpush2.msra.mxu0 %v3000_v58 }
 0x281   : > { %v2495_v13 = vpop.f32.mrf.mxu0  ;;  %4021 = vmatpush2.msra.mxu1 %v2966_v60  ;;  %4243 = vmatprep.subr.mxu0 %v6011_v0 }
 0x282   : > { %v2642_v7 = vadd.f32 %v2641_v55, %v2611_v10  ;;  %v7059_v1 = vadd.f32 %v2495_v13, %v6857_v33  ;;  %v2573_v16 = vadd.f32 %v2572_v56, %v7041_v23  ;;  %v2614_v33 = vmul.f32 %v7053_v45, %v7053_v45  ;;  %4244 = vmatpush2.msra.mxu0 %v2999_v21 }
 0x283   : > { %v5664_v14 = vpop.f32.mrf.mxu0  ;;  %4245 = vmatprep.subr.mxu0 %v6011_v0  ;;  %4408 = vmatprep.subr.mxu1 %v6011_v0 }
 0x284   : > { %v2574_v59 = vadd.f32 %v2573_v16, %v7059_v1  ;;  %v2613_v18 = vmul.f32 %v7059_v1, %v7059_v1  ;;  %v2643_v34 = vadd.f32 %v2642_v7, %v2612_v29  ;;  %v7071_v27 = vadd.f32 %v5664_v14, %v6866_v63  ;;  %4246 = vmatpush2.msra.mxu0 %v2998_v42 }
 0x285   : > { %v2505_v32 = vpop.f32.mrf.mxu0  ;;  %4633 = vmatprep.subr.mxu0 %v6011_v0 }
 0x286   : > { %v2644_v9 = vadd.f32 %v2643_v34, %v2613_v18  ;;  %v7074_v43 = vadd.f32 %v2505_v32, %v6863_v40  ;;  %v2575_v20 = vadd.f32 %v2574_v59, %v7053_v45  ;;  %v2616_v51 = vmul.f32 %v7071_v27, %v7071_v27 }
 0x287   : > { %v5667_v57 = vpop.f32.mrf.mxu0 }
 0x288   : > { %v2576_v47 = vadd.f32 %v2575_v20, %v7074_v43  ;;  %v2615_v39 = vmul.f32 %v7074_v43, %v7074_v43  ;;  %v2645_v62 = vadd.f32 %v2644_v9, %v2614_v33  ;;  %v7083_v63 = vadd.f32 %v5667_v57, %v6872_v4 }
 0x289   : > { %v2515_v40 = vpop.f32.mrf.mxu0 }
 0x28a   : > { %v2646_v26 = vadd.f32 %v2645_v62, %v2615_v39  ;;  %v7089_v61 = vadd.f32 %v2515_v40, %v6869_v46  ;;  %v2577_v35 = vadd.f32 %v2576_v47, %v7071_v27  ;;  %v2618_v10 = vmul.f32 %v7083_v63, %v7083_v63 }
 0x28b   : > { %v5670_v15 = vpop.f32.mrf.mxu0 }
 0x28c   : > { %v2578_v22 = vadd.f32 %v2577_v35, %v7089_v61  ;;  %v2617_v56 = vmul.f32 %v7089_v61, %v7089_v61  ;;  %v2647_v4 = vadd.f32 %v2646_v26, %v2616_v51  ;;  %v7098_v58 = vadd.f32 %v5670_v15, %v6881_v38 }
 0x28d   : > { %v2525_v55 = vpop.f32.mrf.mxu0 }
 0x28e   : > { %v2648_v13 = vadd.f32 %v2647_v4, %v2617_v56  ;;  %v7101_v46 = vadd.f32 %v2525_v55, %v6876_v41  ;;  %v2579_v29 = vadd.f32 %v2578_v22, %v7083_v63  ;;  %v2620_v38 = vmul.f32 %v7098_v58, %v7098_v58 }
 0x28f   : > { %v5673_v7 = vpop.f32.mrf.mxu0 }
 0x290   : > { %v2580_v16 = vadd.f32 %v2579_v29, %v7101_v46  ;;  %v2619_v60 = vmul.f32 %v7101_v46, %v7101_v46  ;;  %v2649_v14 = vadd.f32 %v2648_v13, %v2618_v10  ;;  %v7108_v21 = vadd.f32 %v5673_v7, %v6891_v19 }
 0x291   : > { %v2535_v59 = vpop.f32.mrf.mxu0 }
 0x292   : > { %v2650_v18 = vadd.f32 %v2649_v14, %v2619_v60  ;;  %v7113_v41 = vadd.f32 %v2535_v59, %v6886_v24  ;;  %v2581_v34 = vadd.f32 %v2580_v16, %v7098_v58  ;;  %v2622_v19 = vmul.f32 %v7108_v21, %v7108_v21 }
 0x293   : > { %v5676_v33 = vpop.f32.mrf.mxu0 }
 0x294   : > { %v2582_v32 = vadd.f32 %v2581_v34, %v7113_v41  ;;  %v2621_v42 = vmul.f32 %v7113_v41, %v7113_v41  ;;  %v2651_v9 = vadd.f32 %v2650_v18, %v2620_v38  ;;  %v7122_v47 = vadd.f32 %v5676_v33, %v6901_v48 }
 0x295   : > { %v2545_v20 = vpop.f32.mrf.mxu0 }
 0x296   : > { %v2652_v57 = vadd.f32 %v2651_v9, %v2621_v42  ;;  %v2546_v24 = vadd.f32 %v2545_v20, %v6896_v6  ;;  %v2583_v39 = vadd.f32 %v2582_v32, %v7108_v21  ;;  %v2624_v26 = vmul.f32 %v7122_v47, %v7122_v47 }
 0x297   : > { %v2674_v42 = vlaneseq }
 0x298   : > { %v2584_v62 = vadd.f32 %v2583_v39, %v2546_v24  ;;  %v2623_v40 = vmul.f32 %v2546_v24, %v2546_v24  ;;  %v2653_v51 = vadd.f32 %v2652_v57, %v2622_v19  ;;  %v2554_v19 = vld [vmem:[%s8446_s2] sm:$0x3] }
 0x299   : > { %v7129_v9 = vshrl.u32 %v2674_v42, 7 }
 0x29a   : > { %v2585_v35 = vadd.f32 %v2584_v62, %v7122_v47  ;;  %v2654_v15 = vadd.f32 %v2653_v51, %v2623_v40 }
 0x29b   : > { %8486 = vst [vmem:[#allocation14_spill] sm:$0xff] %v7129_v9  ;;  %v8456_v20 = vsub.s32 0, %v7129_v9  ;;  %v8455_v51 = vsub.s32 1, %v7129_v9  ;;  %v3069_v9 = vld [vmem:[#allocation9 + $0x3b8] sm:$0xff] }
 0x29c   : > { %v2586_v22 = vrot.slane %v2585_v35, 4  ;;  %v2655_v56 = vadd.f32 %v2654_v15, %v2624_v26 }
 0x29e   : > { %v2587_v4 = vadd.f32 %v2586_v22, %v2585_v35  ;;  %v2656_v10 = vrot.slane %v2655_v56, 4 }
 0x2a0   : > { %v2588_v55 = vrot.slane %v2587_v4, 2  ;;  %v2657_v48 = vadd.f32 %v2656_v10, %v2655_v56 }
 0x2a2   : > { %v2589_v13 = vadd.f32 %v2588_v55, %v2587_v4  ;;  %v2658_v29 = vrot.slane %v2657_v48, 2 }
 0x2a4   : > { %v2590_v6 = vrot.slane %v2589_v13, 1  ;;  %v2659_v7 = vadd.f32 %v2658_v29, %v2657_v48 }
 0x2a6   : > { %v2591_v16 = vadd.f32 %v2590_v6, %v2589_v13  ;;  %v2660_v60 = vrot.slane %v2659_v7, 1 }
 0x2a8   : > { %v2592_v14 = vmul.f32 0.00390625, %v2591_v16  ;;  %v2661_v59 = vadd.f32 %v2660_v60, %v2659_v7 }
 0x2aa   : > { %v2662_v38 = vmul.f32 0.00390625, %v2661_v59  ;;  %v2663_v18 = vmul.f32 %v2592_v14, %v2592_v14 }
 0x2ac   : > { %v2664_v34 = vsub.f32 %v2662_v38, %v2663_v18 }
 0x2ae   : > { %v2665_v33 = vmax.f32 %v2664_v34, 0.0 }
 0x2b0   : > { %v2666_v32 = vadd.f32 1e-05, %v2665_v33 }
 0x2b2   : > { %5829 = vrsqrt.f32 %v2666_v32 }
 0x2bf   : > { %v5830_v57 = vpop.eup %5829 }
 0x2c0   : > { %v2668_v39 = vmul.f32 %v5830_v57, %v2554_v19 }
 0x2c2   : > { %v2669_v62 = vmul.f32 %v2668_v39, %v2592_v14  ;;  %v2677_v40 = vrot.slane %v2668_v39, %v8456_v20  ;;  %v3070_v20 = vld [vmem:[#allocation9 + $0x3c0] sm:$0xff] }
 0x2c4   : > { %v2671_v26 = vrot.slane %v2669_v62, 7  ;;  %v2708_v35 = vmul.f32 %v2677_v40, %v2546_v24  ;;  %v2678_v15 = vmul.f32 %v2677_v40, %v6909_v5  ;;  %v2679_v22 = vmul.f32 %v2677_v40, %v6905_v54 }
 0x2c5   : > { %v2680_v56 = vmul.f32 %v2677_v40, %v6924_v30  ;;  %v2681_v4 = vmul.f32 %v2677_v40, %v6921_v44  ;;  %v2682_v10 = vmul.f32 %v2677_v40, %v6939_v2  ;;  %v2683_v55 = vmul.f32 %v2677_v40, %v6933_v12 }
 0x2c6   : > { %v2673_v48 = vsub.f32 %v2554_v19, %v2671_v26  ;;  %v2684_v13 = vmul.f32 %v2677_v40, %v6954_v31  ;;  %v2685_v29 = vmul.f32 %v2677_v40, %v6951_v50  ;;  %v2686_v6 = vmul.f32 %v2677_v40, %v6969_v49 }
 0x2c7   : > { %v2687_v24 = vmul.f32 %v2677_v40, %v6963_v52  ;;  %v2688_v5 = vmul.f32 %v2677_v40, %v6984_v25  ;;  %v2689_v54 = vmul.f32 %v2677_v40, %v6981_v36  ;;  %v2690_v30 = vmul.f32 %v2677_v40, %v6999_v53 }
 0x2c8   : > { %v2713_v44 = vrot.slane %v2673_v48, %v8455_v51  ;;  %v2691_v12 = vmul.f32 %v2677_v40, %v6993_v37  ;;  %v2692_v2 = vmul.f32 %v2677_v40, %v7014_v28  ;;  %v2693_v31 = vmul.f32 %v2677_v40, %v7011_v11 }
 0x2c9   : > { %v2694_v50 = vmul.f32 %v2677_v40, %v7029_v17  ;;  %v2695_v49 = vmul.f32 %v2677_v40, %v7023_v3  ;;  %v2696_v52 = vmul.f32 %v2677_v40, %v7044_v8  ;;  %v2697_v25 = vmul.f32 %v2677_v40, %v7041_v23 }
 0x2ca   : > { %v2744_v36 = vadd.f32 %v2713_v44, %v2708_v35  ;;  %v2698_v53 = vmul.f32 %v2677_v40, %v7059_v1  ;;  %v2699_v7 = vmul.f32 %v2677_v40, %v7053_v45  ;;  %v2700_v16 = vmul.f32 %v2677_v40, %v7074_v43 }
 0x2cb   : > { %v2701_v37 = vmul.f32 %v2677_v40, %v7071_v27  ;;  %v2702_v28 = vmul.f32 %v2677_v40, %v7089_v61  ;;  %v2703_v11 = vmul.f32 %v2677_v40, %v7083_v63  ;;  %v2704_v17 = vmul.f32 %v2677_v40, %v7101_v46 }
 0x2cc   : > { %vm2776_vm0 = vcmp.ge.f32.partialorder %v2744_v36, 0.0  ;;  %v2808_v3 = vmul.f32 0.2, %v2744_v36  ;;  %v2705_v8 = vmul.f32 %v2677_v40, %v7098_v58  ;;  %v2706_v23 = vmul.f32 %v2677_v40, %v7113_v41 }
 0x2cd   : > { %v2707_v1 = vmul.f32 %v2677_v40, %v7108_v21  ;;  %v2709_v45 = vmul.f32 %v2677_v40, %v7122_v47  ;;  %v7171_v60 = vadd.f32 %v2713_v44, %v2678_v15  ;;  %v7173_v43 = vadd.f32 %v2713_v44, %v2679_v22 }
 0x2ce   : > { %v2840_v27 = vsel %vm2776_vm0, %v2744_v36, %v2808_v3  ;;  %v7175_v61 = vadd.f32 %v2713_v44, %v2680_v56  ;;  %v7177_v63 = vadd.f32 %v2713_v44, %v2681_v4  ;;  %v7179_v46 = vadd.f32 %v2713_v44, %v2682_v10 }
 0x2cf   : > { %2872 = vst [vmem:[#allocation2 + $0x208] sm:$0xff] %v2840_v27  ;;  %v7181_v14 = vadd.f32 %v2713_v44, %v2683_v55  ;;  %v7183_v58 = vadd.f32 %v2713_v44, %v2684_v13  ;;  %v7185_v41 = vadd.f32 %v2713_v44, %v2685_v29  ;;  %v7187_v21 = vadd.f32 %v2713_v44, %v2686_v6 }
 0x2d0   : > { %v7189_v47 = vadd.f32 %v2713_v44, %v2687_v24  ;;  %v7191_v59 = vadd.f32 %v2713_v44, %v2688_v5  ;;  %v7193_v38 = vadd.f32 %v2713_v44, %v2689_v54  ;;  %v7195_v18 = vadd.f32 %v2713_v44, %v2690_v30 }
 0x2d1   : > { %v7197_v34 = vadd.f32 %v2713_v44, %v2691_v12  ;;  %v7199_v33 = vadd.f32 %v2713_v44, %v2692_v2  ;;  %v7201_v32 = vadd.f32 %v2713_v44, %v2693_v31  ;;  %v7203_v42 = vadd.f32 %v2713_v44, %v2694_v50 }
 0x2d2   : > { %v7205_v19 = vadd.f32 %v2713_v44, %v2695_v49  ;;  %v7207_v57 = vadd.f32 %v2713_v44, %v2696_v52  ;;  %v7209_v39 = vadd.f32 %v2713_v44, %v2697_v25  ;;  %v7211_v62 = vadd.f32 %v2713_v44, %v2698_v53 }
 0x2d3   : > { %v7213_v40 = vadd.f32 %v2713_v44, %v2699_v7  ;;  %v7215_v26 = vadd.f32 %v2713_v44, %v2700_v16  ;;  %v7217_v35 = vadd.f32 %v2713_v44, %v2701_v37  ;;  %v7219_v15 = vadd.f32 %v2713_v44, %v2702_v28 }
 0x2d4   : > { %v7221_v22 = vadd.f32 %v2713_v44, %v2703_v11  ;;  %v7223_v56 = vadd.f32 %v2713_v44, %v2704_v17  ;;  %v7225_v4 = vadd.f32 %v2713_v44, %v2705_v8  ;;  %v7227_v10 = vadd.f32 %v2713_v44, %v2706_v23 }
 0x2d5   : > { %v7229_v55 = vadd.f32 %v2713_v44, %v2707_v1  ;;  %v7231_v48 = vadd.f32 %v2713_v44, %v2709_v45  ;;  %vm2746_vm1 = vcmp.ge.f32.partialorder %v7171_v60, 0.0  ;;  %vm2747_vm2 = vcmp.ge.f32.partialorder %v7173_v43, 0.0 }
 0x2d6   : > { %v2894_v13 = vld [vmem:[#allocation2 + $0x209] sm:$0x1]  ;;  %vm2748_vm3 = vcmp.ge.f32.partialorder %v7175_v61, 0.0  ;;  %vm2749_vm4 = vcmp.ge.f32.partialorder %v7177_v63, 0.0  ;;  %vm2750_vm5 = vcmp.ge.f32.partialorder %v7179_v46, 0.0  ;;  %vm2751_vm6 = vcmp.ge.f32.partialorder %v7181_v14, 0.0 }
 0x2d7   : > { %2912 = vst [vmem:[#allocation2 + $0x207] sm:$0x1] %v2894_v13  ;;  %vm2752_vm7 = vcmp.ge.f32.partialorder %v7183_v58, 0.0  ;;  %vm2753_vm8 = vcmp.ge.f32.partialorder %v7185_v41, 0.0  ;;  %vm2756_vm11 = vcmp.ge.f32.partialorder %v7191_v59, 0.0  ;;  %vm2761_vm0 = vcmp.ge.f32.partialorder %v7201_v32, 0.0 }
 0x2d8   : > { %v2778_v29 = vmul.f32 0.2, %v7171_v60  ;;  %v2779_v6 = vmul.f32 0.2, %v7173_v43  ;;  %vm2762_vm9 = vcmp.ge.f32.partialorder %v7203_v42, 0.0  ;;  %vm2767_vm15 = vcmp.ge.f32.partialorder %v7213_v40, 0.0 }
 0x2d9   : > { %v2780_v24 = vmul.f32 0.2, %v7175_v61  ;;  %v2781_v5 = vmul.f32 0.2, %v7177_v63  ;;  %v2782_v54 = vmul.f32 0.2, %v7179_v46 }
 0x2da   : > { %v2783_v30 = vmul.f32 0.2, %v7181_v14  ;;  %v2784_v44 = vmul.f32 0.2, %v7183_v58  ;;  %v2785_v12 = vmul.f32 0.2, %v7185_v41  ;;  %v7266_v2 = vsel %vm2746_vm1, %v7171_v60, %v2778_v29 }
 0x2db   : > { %vm2768_vm10 = vcmp.ge.f32.partialorder %v7215_v26, 0.0  ;;  %v2786_v31 = vmul.f32 0.2, %v7187_v21  ;;  %v2787_v50 = vmul.f32 0.2, %v7189_v47  ;;  %v7278_v52 = vsel %vm2747_vm2, %v7173_v43, %v2779_v6  ;;  %2842 = vst [vmem:[#allocation2 + $0x28] sm:$0xff] %v7266_v2 }
 0x2dc   : > { %v2788_v49 = vmul.f32 0.2, %v7191_v59  ;;  %vm2772_vm1 = vcmp.ge.f32.partialorder %v7223_v56, 0.0  ;;  %vm2773_vm14 = vcmp.ge.f32.partialorder %v7225_v4, 0.0  ;;  %vm2774_vm13 = vcmp.ge.f32.partialorder %v7227_v10, 0.0  ;;  %2843 = vst [vmem:[#allocation2 + $0x30] sm:$0xff] %v7278_v52 }
 0x2dd   : > { %vm2775_vm12 = vcmp.ge.f32.partialorder %v7229_v55, 0.0  ;;  %v2789_v25 = vmul.f32 0.2, %v7193_v38  ;;  %v2790_v36 = vmul.f32 0.2, %v7195_v18  ;;  %v7291_v7 = vsel %vm2748_vm3, %v7175_v61, %v2780_v24 }
 0x2de   : > { %v2791_v53 = vmul.f32 0.2, %v7197_v34  ;;  %vm2777_vm2 = vcmp.ge.f32.partialorder %v7231_v48, 0.0  ;;  %v2792_v16 = vmul.f32 0.2, %v7199_v33  ;;  %v7301_v11 = vsel %vm2749_vm4, %v7177_v63, %v2781_v5  ;;  %2874 = vst [vmem:[#allocation2 + $0x8] sm:$0xff] %v7291_v7  ;;  %4022 = vmatprep.mubr.f32.mxu1 %v7291_v7 }
 0x2df   : > { %v2793_v37 = vmul.f32 0.2, %v7201_v32  ;;  %v2794_v28 = vmul.f32 0.2, %v7203_v42  ;;  %2844 = vst [vmem:[#allocation2 + $0x48] sm:$0xff] %v7291_v7  ;;  %v7312_v23 = vsel %vm2750_vm5, %v7179_v46, %v2782_v54  ;;  %2875 = vst [vmem:[#allocation2 + $0x10] sm:$0xff] %v7301_v11  ;;  %v7322_v43 = vsel %vm2751_vm6, %v7181_v14, %v2783_v30 }
 0x2e0   : > { %v2795_v17 = vmul.f32 0.2, %v7205_v19  ;;  %v2796_v3 = vmul.f32 0.2, %v7207_v57  ;;  %v2797_v8 = vmul.f32 0.2, %v7209_v39  ;;  %v7331_v46 = vsel %vm2752_vm7, %v7183_v58, %v2784_v44 }
 0x2e1   : > { %2845 = vst [vmem:[#allocation2 + $0x50] sm:$0xff] %v7301_v11  ;;  %v2798_v1 = vmul.f32 0.2, %v7211_v62  ;;  %v2799_v45 = vmul.f32 0.2, %v7213_v40  ;;  %2846 = vst [vmem:[#allocation2 + $0x68] sm:$0xff] %v7312_v23  ;;  %v7340_v6 = vsel %vm2753_vm8, %v7185_v41, %v2785_v12  ;;  %v7359_v30 = vsel %vm2756_vm11, %v7191_v59, %v2788_v49 }
 0x2e2   : > { %v2800_v60 = vmul.f32 0.2, %v7215_v26  ;;  %v2801_v27 = vmul.f32 0.2, %v7217_v35  ;;  %v2802_v61 = vmul.f32 0.2, %v7219_v15 }
 0x2e3   : > { %v2803_v63 = vmul.f32 0.2, %v7221_v22  ;;  %2847 = vst [vmem:[#allocation2 + $0x70] sm:$0xff] %v7322_v43  ;;  %v2804_v13 = vmul.f32 0.2, %v7223_v56  ;;  %2848 = vst [vmem:[#allocation2 + $0x88] sm:$0xff] %v7331_v46 }
 0x2e4   : > { %v2805_v14 = vmul.f32 0.2, %v7225_v4  ;;  %v2806_v29 = vmul.f32 0.2, %v7227_v10  ;;  %v2807_v24 = vmul.f32 0.2, %v7229_v55 }
 0x2e5   : > { %v2809_v58 = vmul.f32 0.2, %v7231_v48  ;;  %vm8487_vm3 = vcmp.ge.f32.partialorder %v7187_v21, 0.0  ;;  %vm8488_vm4 = vcmp.ge.f32.partialorder %v7189_v47, 0.0  ;;  %2849 = vst [vmem:[#allocation2 + $0x90] sm:$0xff] %v7340_v6  ;;  %vm8489_vm5 = vcmp.ge.f32.partialorder %v7193_v38, 0.0 }
 0x2e6   : > { %v7348_v5 = vsel %vm8487_vm3, %v7187_v21, %v2786_v31  ;;  %v7353_v54 = vsel %vm8488_vm4, %v7189_v47, %v2787_v50  ;;  %v2879_v41 = vld [vmem:[#allocation2 + $0x29] sm:$0x1]  ;;  %v7364_v44 = vsel %vm8489_vm5, %v7193_v38, %v2789_v25  ;;  %vm8490_vm6 = vcmp.ge.f32.partialorder %v7195_v18, 0.0  ;;  %v2915_v59 = vld [vmem:[#allocation2 + $0x36] sm:$0x1]  ;;  %2852 = vst [vmem:[#allocation2 + $0xc8] sm:$0xff] %v7359_v30 }
 0x2e7   : > { %v7369_v21 = vsel %vm8490_vm6, %v7195_v18, %v2790_v36  ;;  %vm8491_vm7 = vcmp.ge.f32.partialorder %v7197_v34, 0.0  ;;  %2850 = vst [vmem:[#allocation2 + $0xa8] sm:$0xff] %v7348_v5  ;;  %2851 = vst [vmem:[#allocation2 + $0xb0] sm:$0xff] %v7353_v54  ;;  %vm8492_vm8 = vcmp.ge.f32.partialorder %v7199_v33, 0.0  ;;  %v7386_v18 = vsel %vm2761_vm0, %v7201_v32, %v2793_v37  ;;  %v2880_v32 = vld [vmem:[#allocation2 + $0x49] sm:$0x1] }
 0x2e8   : > { %v7374_v47 = vsel %vm8491_vm7, %v7197_v34, %v2791_v53  ;;  %2897 = vst [vmem:[#allocation2 + $0x27] sm:$0x1] %v2879_v41  ;;  %v7381_v38 = vsel %vm8492_vm8, %v7199_v33, %v2792_v16  ;;  %v7391_v34 = vsel %vm2762_vm9, %v7203_v42, %v2794_v28  ;;  %vm8493_vm11 = vcmp.ge.f32.partialorder %v7205_v19, 0.0  ;;  %2853 = vst [vmem:[#allocation2 + $0xd0] sm:$0xff] %v7364_v44  ;;  %v2878_v33 = vld [vmem:[#allocation2 + $0x9] sm:$0x1] }
 0x2e9   : > { %v7396_v12 = vsel %vm8493_vm11, %v7205_v19, %v2795_v17  ;;  %2854 = vst [vmem:[#allocation2 + $0xe8] sm:$0xff] %v7369_v21  ;;  %2855 = vst [vmem:[#allocation2 + $0xf0] sm:$0xff] %v7374_v47  ;;  %vm8494_vm9 = vcmp.ge.f32.partialorder %v7207_v57, 0.0  ;;  %vm8495_vm0 = vcmp.ge.f32.partialorder %v7209_v39, 0.0  ;;  %vm8496_vm3 = vcmp.ge.f32.partialorder %v7211_v62, 0.0  ;;  %v3222_v37 = vld [vmem:[#allocation2 + $0x9] sm:$0xff] }
 0x2ea   : > { %2933 = vst [vmem:[#allocation2 + $0x38] sm:$0x1] %v2915_v59  ;;  %v7405_v42 = vsel %vm8494_vm9, %v7207_v57, %v2796_v3  ;;  %v7410_v19 = vsel %vm8495_vm0, %v7209_v39, %v2797_v8  ;;  %v7415_v31 = vsel %vm8496_vm3, %v7211_v62, %v2798_v1  ;;  %v7420_v50 = vsel %vm2767_vm15, %v7213_v40, %v2799_v45  ;;  %v2914_v57 = vld [vmem:[#allocation2 + $0x16] sm:$0x1]  ;;  %v3029_v28 = vld [vmem:[#allocation9 + $0x278] sm:$0xff]  ;;  %v7467_v41 = vld [vmem:[#allocation2 + $0x29] sm:$0xff] }
 0x2eb   : > { %2856 = vst [vmem:[#allocation2 + $0x108] sm:$0xff] %v7381_v38  ;;  %2857 = vst [vmem:[#allocation2 + $0x110] sm:$0xff] %v7386_v18  ;;  %v7429_v39 = vsel %vm2768_vm10, %v7215_v26, %v2800_v60  ;;  %vm8497_vm15 = vcmp.ge.f32.partialorder %v7217_v35, 0.0  ;;  %vm8498_vm4 = vcmp.ge.f32.partialorder %v7219_v15, 0.0  ;;  %vm8499_vm5 = vcmp.ge.f32.partialorder %v7221_v22, 0.0  ;;  %v3287_v3 = vld [vmem:[#allocation2 + $0x2f] sm:$0xff] }
 0x2ec   : > { %2858 = vst [vmem:[#allocation2 + $0x128] sm:$0xff] %v7391_v34  ;;  %2859 = vst [vmem:[#allocation2 + $0x130] sm:$0xff] %v7396_v12  ;;  %v2833_v62 = vsel %vm8497_vm15, %v7217_v35, %v2801_v27  ;;  %v2834_v40 = vsel %vm8498_vm4, %v7219_v15, %v2802_v61  ;;  %v2835_v49 = vsel %vm8499_vm5, %v7221_v22, %v2803_v63  ;;  %v2881_v26 = vld [vmem:[#allocation2 + $0x69] sm:$0x1]  ;;  %v2916_v36 = vld [vmem:[#allocation2 + $0x56] sm:$0x1] }
 0x2ed   : > { %2896 = vst [vmem:[#allocation2 + $0x7] sm:$0x1] %v2878_v33  ;;  %2898 = vst [vmem:[#allocation2 + $0x47] sm:$0x1] %v2880_v32  ;;  %v2836_v35 = vsel %vm2772_vm1, %v7223_v56, %v2804_v13  ;;  %v2837_v15 = vsel %vm2773_vm14, %v7225_v4, %v2805_v14  ;;  %v2838_v22 = vsel %vm2774_vm13, %v7227_v10, %v2806_v29  ;;  %v2882_v4 = vld [vmem:[#allocation2 + $0x89] sm:$0x1] }
 0x2ee   : > { %2860 = vst [vmem:[#allocation2 + $0x148] sm:$0xff] %v7405_v42  ;;  %2861 = vst [vmem:[#allocation2 + $0x150] sm:$0xff] %v7410_v19  ;;  %v2839_v25 = vsel %vm2775_vm12, %v7229_v55, %v2807_v24  ;;  %v2841_v56 = vsel %vm2777_vm2, %v7231_v48, %v2809_v58  ;;  %v2917_v10 = vld [vmem:[#allocation2 + $0x76] sm:$0x1]  ;;  %v2883_v16 = vld [vmem:[#allocation2 + $0xa9] sm:$0x1] }
 0x2ef   : > { %2862 = vst [vmem:[#allocation2 + $0x168] sm:$0xff] %v7415_v31  ;;  %2863 = vst [vmem:[#allocation2 + $0x170] sm:$0xff] %v7420_v50  ;;  %v2918_v55 = vld [vmem:[#allocation2 + $0x96] sm:$0x1]  ;;  %v3286_v53 = vld [vmem:[#allocation2 + $0x27] sm:$0xff] }
 0x2f0   : > { %2932 = vst [vmem:[#allocation2 + $0x18] sm:$0x1] %v2914_v57  ;;  %2864 = vst [vmem:[#allocation2 + $0x188] sm:$0xff] %v7429_v39  ;;  %4247 = vmatprep.mubr.f32.mxu0 %v3286_v53  ;;  %v2884_v48 = vld [vmem:[#allocation2 + $0xc9] sm:$0x1]  ;;  %v3061_v8 = vld [vmem:[#allocation9 + $0x378] sm:$0xff] }
 0x2f1   : > { %2865 = vst [vmem:[#allocation2 + $0x190] sm:$0xff] %v2833_v62  ;;  %2866 = vst [vmem:[#allocation2 + $0x1a8] sm:$0xff] %v2834_v40  ;;  %4248 = vmatmul.mubr.f32.vlgmr.msra.gmra.mxu0 %v3222_v37  ;;  %v3028_v1 = vld [vmem:[#allocation9 + $0x270] sm:$0xff]  ;;  %v2885_v60 = vld [vmem:[#allocation2 + $0xe9] sm:$0x1] }
 0x2f2   : > { %2867 = vst [vmem:[#allocation2 + $0x1b0] sm:$0xff] %v2835_v49  ;;  %2899 = vst [vmem:[#allocation2 + $0x67] sm:$0x1] %v2881_v26  ;;  %4252 = vmatprep.mubr.f32.mxu0 %v3287_v3  ;;  %v2919_v45 = vld [vmem:[#allocation2 + $0xb6] sm:$0x1]  ;;  %4634 = vmatpush1.msra.mxu0 %v3061_v8  ;;  %v3027_v29 = vld [vmem:[#allocation9 + $0x268] sm:$0xff] }
 0x2f3   : > { %2876 = vst [vmem:[#allocation2 + $0x228] sm:$0xff] %v2838_v22  ;;  %2877 = vst [vmem:[#allocation2 + $0x230] sm:$0xff] %v2839_v25  ;;  %v2920_v61 = vld [vmem:[#allocation2 + $0xd6] sm:$0x1]  ;;  %v2886_v63 = vld [vmem:[#allocation2 + $0x109] sm:$0x1]  ;;  %4635 = vmatprep.subr.mxu0 %v6011_v0 }
 0x2f4   : > { %2868 = vst [vmem:[#allocation2 + $0x1c8] sm:$0xff] %v2836_v35  ;;  %2869 = vst [vmem:[#allocation2 + $0x1d0] sm:$0xff] %v2837_v15  ;;  %v3094_v17 = vld [vmem:[#allocation2 + $0x7] sm:$0xff]  ;;  %v3095_v13 = vld [vmem:[#allocation2 + $0xf] sm:$0xff] }
 0x2f5   : > { %2870 = vst [vmem:[#allocation2 + $0x1e8] sm:$0xff] %v2838_v22  ;;  %2871 = vst [vmem:[#allocation2 + $0x1f0] sm:$0xff] %v2839_v25  ;;  %4023 = vmatmul.mubr.f32.vlgmr.msra.gmra.mxu1 %v3094_v17  ;;  %v7462_v14 = vld [vmem:[#allocation2 + $0x47] sm:$0xff]  ;;  %v2921_v24 = vld [vmem:[#allocation2 + $0xf6] sm:$0x1] }
 0x2f6   : > { %2934 = vst [vmem:[#allocation2 + $0x58] sm:$0x1] %v2916_v36  ;;  %2873 = vst [vmem:[#allocation2 + $0x210] sm:$0xff] %v2841_v56  ;;  %4027 = vmatprep.mubr.f32.mxu1 %v7301_v11  ;;  %4409 = vmatpush1.msra.mxu1 %v3029_v28  ;;  %v2887_v58 = vld [vmem:[#allocation2 + $0x129] sm:$0x1]  ;;  %v3026_v59 = vld [vmem:[#allocation9 + $0x260] sm:$0xff] }
 0x2f7   : > { %2900 = vst [vmem:[#allocation2 + $0x87] sm:$0x1] %v2882_v4  ;;  %2935 = vst [vmem:[#allocation2 + $0x78] sm:$0x1] %v2917_v10  ;;  %4410 = vmatprep.subr.mxu1 %v6011_v0  ;;  %v3223_v27 = vld [vmem:[#allocation2 + $0x11] sm:$0xff]  ;;  %v7485_v56 = vld [vmem:[#allocation2 + $0x49] sm:$0xff] }
 0x2f8   : > { %2936 = vst [vmem:[#allocation2 + $0x98] sm:$0x1] %v2918_v55  ;;  %2901 = vst [vmem:[#allocation2 + $0xa7] sm:$0x1] %v2883_v16  ;;  %4253 = vmatmul.mubr.f32.gmra.mxu0 %v3223_v27  ;;  %4411 = vmatpush1.msra.mxu1 %v3028_v1  ;;  %v2922_v33 = vld [vmem:[#allocation2 + $0x116] sm:$0x1] }
 0x2f9   : > { %2902 = vst [vmem:[#allocation2 + $0xc7] sm:$0x1] %v2884_v48  ;;  %2937 = vst [vmem:[#allocation2 + $0xb8] sm:$0x1] %v2919_v45  ;;  %4028 = vmatmul.mubr.f32.gmra.mxu1 %v3095_v13  ;;  %4257 = vmatprep.mubr.f32.mxu0 %v7462_v14  ;;  %v7471_v32 = vld [vmem:[#allocation2 + $0x4f] sm:$0xff]  ;;  %v3025_v62 = vld [vmem:[#allocation9 + $0x258] sm:$0xff] }
 0x2fa   : > { %2903 = vst [vmem:[#allocation2 + $0xe7] sm:$0x1] %v2885_v60  ;;  %2938 = vst [vmem:[#allocation2 + $0xd8] sm:$0x1] %v2920_v61  ;;  %4032 = vmatprep.mubr.f32.mxu1 %v7266_v2  ;;  %4412 = vmatprep.subr.mxu1 %v6011_v0  ;;  %v3060_v57 = vld [vmem:[#allocation9 + $0x370] sm:$0xff]  ;;  %v7480_v15 = vld [vmem:[#allocation2 + $0x67] sm:$0xff] }
 0x2fb   : > { %2904 = vst [vmem:[#allocation2 + $0x107] sm:$0x1] %v2886_v63  ;;  %2939 = vst [vmem:[#allocation2 + $0xf8] sm:$0x1] %v2921_v24  ;;  %4413 = vmatpush1.msra.mxu1 %v3027_v29  ;;  %v2888_v2 = vld [vmem:[#allocation2 + $0x149] sm:$0x1]  ;;  %4636 = vmatpush1.msra.mxu0 %v3060_v57 }
 0x2fc   : > { %2905 = vst [vmem:[#allocation2 + $0x127] sm:$0x1] %v2887_v58  ;;  %4258 = vmatmul.mubr.f32.gmra.mxu0 %v7467_v41  ;;  %4414 = vmatprep.subr.mxu1 %v6011_v0  ;;  %2940 = vst [vmem:[#allocation2 + $0x118] sm:$0x1] %v2922_v33  ;;  %v2923_v40 = vld [vmem:[#allocation2 + $0x136] sm:$0x1] }
 0x2fd   : > { %4033 = vmatmul.mubr.f32.gmra.mxu1 %v3286_v53  ;;  %4262 = vmatprep.mubr.f32.mxu0 %v7471_v32  ;;  %2906 = vst [vmem:[#allocation2 + $0x147] sm:$0x1] %v2888_v2  ;;  %2941 = vst [vmem:[#allocation2 + $0x138] sm:$0x1] %v2923_v40  ;;  %v2889_v49 = vld [vmem:[#allocation2 + $0x169] sm:$0x1] }
 0x2fe   : > { %4037 = vmatprep.mubr.f32.mxu1 %v7278_v52  ;;  %4415 = vmatpush1.msra.mxu1 %v3026_v59  ;;  %v7476_v26 = vld [vmem:[#allocation2 + $0x31] sm:$0xff]  ;;  %2907 = vst [vmem:[#allocation2 + $0x167] sm:$0x1] %v2889_v49  ;;  %v2890_v25 = vld [vmem:[#allocation2 + $0x189] sm:$0x1]  ;;  %v3058_v45 = vld [vmem:[#allocation9 + $0x360] sm:$0xff] }
 0x2ff   : > { %4416 = vmatprep.subr.mxu1 %v6011_v0  ;;  %v2924_v35 = vld [vmem:[#allocation2 + $0x156] sm:$0x1]  ;;  %2908 = vst [vmem:[#allocation2 + $0x187] sm:$0x1] %v2890_v25  ;;  %v2891_v36 = vld [vmem:[#allocation2 + $0x1a9] sm:$0x1]  ;;  %4637 = vmatprep.subr.mxu0 %v6011_v0 }
 0x300   : > { %4263 = vmatmul.mubr.f32.gmra.mxu0 %v7476_v26  ;;  %4417 = vmatpush1.msra.mxu1 %v3025_v62  ;;  %v3024_v22 = vld [vmem:[#allocation9 + $0x250] sm:$0xff]  ;;  %2942 = vst [vmem:[#allocation2 + $0x158] sm:$0x1] %v2924_v35  ;;  %2909 = vst [vmem:[#allocation2 + $0x1a7] sm:$0x1] %v2891_v36  ;;  %v3023_v4 = vld [vmem:[#allocation9 + $0x248] sm:$0xff] }
 0x301   : > { %4038 = vmatmul.mubr.f32.gmra.mxu1 %v3287_v3  ;;  %4267 = vmatprep.mubr.f32.mxu0 %v7480_v15  ;;  %v2925_v52 = vld [vmem:[#allocation2 + $0x176] sm:$0x1]  ;;  %v3059_v10 = vld [vmem:[#allocation9 + $0x368] sm:$0xff]  ;;  %v3021_v3 = vld [vmem:[#allocation9 + $0x238] sm:$0xff] }
 0x302   : > { %4042 = vmatprep.mubr.f32.mxu1 %v7291_v7  ;;  %4418 = vmatprep.subr.mxu1 %v6011_v0  ;;  %2943 = vst [vmem:[#allocation2 + $0x178] sm:$0x1] %v2925_v52  ;;  %v7489_v55 = vld [vmem:[#allocation2 + $0x6f] sm:$0xff]  ;;  %v2892_v16 = vld [vmem:[#allocation2 + $0x1c9] sm:$0x1]  ;;  %v3022_v7 = vld [vmem:[#allocation9 + $0x240] sm:$0xff] }
 0x303   : > { %4419 = vmatpush1.msra.mxu1 %v3024_v22  ;;  %v2926_v53 = vld [vmem:[#allocation2 + $0x196] sm:$0x1]  ;;  %2910 = vst [vmem:[#allocation2 + $0x1c7] sm:$0x1] %v2892_v16  ;;  %4638 = vmatpush1.msra.mxu0 %v3059_v10  ;;  %v2893_v48 = vld [vmem:[#allocation2 + $0x1e9] sm:$0x1] }
 0x304   : > { %4268 = vmatmul.mubr.f32.gmra.mxu0 %v7485_v56  ;;  %4420 = vmatprep.subr.mxu1 %v6011_v0  ;;  %2944 = vst [vmem:[#allocation2 + $0x198] sm:$0x1] %v2926_v53  ;;  %v7495_v37 = vld [vmem:[#allocation2 + $0x51] sm:$0xff]  ;;  %v7499_v17 = vld [vmem:[#allocation2 + $0x87] sm:$0xff]  ;;  %2911 = vst [vmem:[#allocation2 + $0x1e7] sm:$0x1] %v2893_v48 }
 0x305   : > { %4043 = vmatmul.mubr.f32.gmra.mxu1 %v7462_v14  ;;  %4272 = vmatprep.mubr.f32.mxu0 %v7489_v55  ;;  %v2927_v28 = vld [vmem:[#allocation2 + $0x1b6] sm:$0x1]  ;;  %v7519_v61 = vld [vmem:[#allocation2 + $0xa7] sm:$0xff]  ;;  %v3017_v29 = vld [vmem:[#allocation9 + $0x218] sm:$0xff] }
 0x306   : > { %4047 = vmatprep.mubr.f32.mxu1 %v7301_v11  ;;  %4421 = vmatpush1.msra.mxu1 %v3023_v4  ;;  %2945 = vst [vmem:[#allocation2 + $0x1b8] sm:$0x1] %v2927_v28  ;;  %v7505_v11 = vld [vmem:[#allocation2 + $0x69] sm:$0xff]  ;;  %v2928_v60 = vld [vmem:[#allocation2 + $0x1d6] sm:$0x1]  ;;  %v3018_v63 = vld [vmem:[#allocation9 + $0x220] sm:$0xff] }
 0x307   : > { %4422 = vmatprep.subr.mxu1 %v6011_v0  ;;  %v3020_v8 = vld [vmem:[#allocation9 + $0x230] sm:$0xff]  ;;  %4639 = vmatprep.subr.mxu0 %v6011_v0  ;;  %2946 = vst [vmem:[#allocation2 + $0x1d8] sm:$0x1] %v2928_v60  ;;  %v3057_v58 = vld [vmem:[#allocation9 + $0x358] sm:$0xff]  ;;  %v7539_v33 = vld [vmem:[#allocation2 + $0xc7] sm:$0xff] }
 0x308   : > { %4273 = vmatmul.mubr.f32.gmra.mxu0 %v7495_v37  ;;  %4423 = vmatpush1.msra.mxu1 %v3022_v7  ;;  %v7509_v1 = vld [vmem:[#allocation2 + $0x8f] sm:$0xff]  ;;  %v3014_v2 = vld [vmem:[#allocation9 + $0x200] sm:$0xff]  ;;  %v2895_v35 = vld [vmem:[#allocation2 + $0x229] sm:$0x1] }
 0x309   : > { %4048 = vmatmul.mubr.f32.gmra.mxu1 %v7471_v32  ;;  %4277 = vmatprep.mubr.f32.mxu0 %v7499_v17  ;;  %v7515_v27 = vld [vmem:[#allocation2 + $0x71] sm:$0xff]  ;;  %v3015_v57 = vld [vmem:[#allocation9 + $0x208] sm:$0xff]  ;;  %2913 = vst [vmem:[#allocation2 + $0x227] sm:$0x1] %v2895_v35  ;;  %v3054_v7 = vld [vmem:[#allocation9 + $0x340] sm:$0xff] }
 0x30a   : > { %4052 = vmatprep.mubr.f32.mxu1 %v7312_v23  ;;  %4424 = vmatprep.subr.mxu1 %v6011_v0  ;;  %v3019_v23 = vld [vmem:[#allocation9 + $0x228] sm:$0xff]  ;;  %v2929_v13 = vld [vmem:[#allocation2 + $0x1f6] sm:$0x1]  ;;  %v3041_v28 = vld [vmem:[#allocation9 + $0x2d8] sm:$0xff] }
 0x30b   : > { %4425 = vmatpush1.msra.mxu1 %v3021_v3  ;;  %4640 = vmatpush1.msra.mxu0 %v3058_v45  ;;  %2947 = vst [vmem:[#allocation2 + $0x1f8] sm:$0x1] %v2929_v13  ;;  %v7529_v24 = vld [vmem:[#allocation2 + $0xaf] sm:$0xff]  ;;  %v7559_v25 = vld [vmem:[#allocation2 + $0xe7] sm:$0xff] }
 0x30c   : > { %4278 = vmatmul.mubr.f32.gmra.mxu0 %v7505_v11  ;;  %4426 = vmatprep.subr.mxu1 %v6011_v0  ;;  %v7535_v59 = vld [vmem:[#allocation2 + $0x91] sm:$0xff]  ;;  %v3043_v36 = vld [vmem:[#allocation9 + $0x2e8] sm:$0xff] }
 0x30d   : > { %4053 = vmatmul.mubr.f32.gmra.mxu1 %v7480_v15  ;;  %4282 = vmatprep.mubr.f32.mxu0 %v7509_v1  ;;  %v7549_v62 = vld [vmem:[#allocation2 + $0xcf] sm:$0xff]  ;;  %v7579_v16 = vld [vmem:[#allocation2 + $0x107] sm:$0xff] }
 0x30e   : > { %4057 = vmatprep.mubr.f32.mxu1 %v7322_v43  ;;  %4427 = vmatpush1.msra.mxu1 %v3020_v8  ;;  %v7525_v43 = vld [vmem:[#allocation2 + $0x89] sm:$0xff]  ;;  %v2930_v49 = vld [vmem:[#allocation2 + $0x216] sm:$0x1]  ;;  %v3053_v8 = vld [vmem:[#allocation9 + $0x338] sm:$0xff] }
 0x30f   : > { %4428 = vmatprep.subr.mxu1 %v6011_v0  ;;  %4641 = vmatprep.subr.mxu0 %v6011_v0  ;;  %v3056_v40 = vld [vmem:[#allocation9 + $0x350] sm:$0xff]  ;;  %2948 = vst [vmem:[#allocation2 + $0x218] sm:$0x1] %v2930_v49  ;;  %v3055_v10 = vld [vmem:[#allocation9 + $0x348] sm:$0xff] }
 0x310   : > { %4283 = vmatmul.mubr.f32.gmra.mxu0 %v7515_v27  ;;  %4429 = vmatpush1.msra.mxu1 %v3019_v23  ;;  %v7555_v22 = vld [vmem:[#allocation2 + $0xb1] sm:$0xff]  ;;  %v7599_v60 = vld [vmem:[#allocation2 + $0x127] sm:$0xff] }
 0x311   : > { %4058 = vmatmul.mubr.f32.gmra.mxu1 %v7489_v55  ;;  %4287 = vmatprep.mubr.f32.mxu0 %v7519_v61  ;;  %v3044_v52 = vld [vmem:[#allocation9 + $0x2f0] sm:$0xff]  ;;  %v7639_v35 = vld [vmem:[#allocation2 + $0x167] sm:$0xff] }
 0x312   : > { %4062 = vmatprep.mubr.f32.mxu1 %v7331_v46  ;;  %4430 = vmatprep.subr.mxu1 %v6011_v0  ;;  %v3016_v46 = vld [vmem:[#allocation9 + $0x210] sm:$0xff]  ;;  %v7732_v51 = vld [vmem:[#allocation2 + $0x1e7] sm:$0xff] }
 0x313   : > { %4431 = vmatpush1.msra.mxu1 %v3018_v63  ;;  %4642 = vmatpush1.msra.mxu0 %v3057_v58  ;;  %v7569_v4 = vld [vmem:[#allocation2 + $0xef] sm:$0xff]  ;;  %v3050_v58 = vld [vmem:[#allocation9 + $0x320] sm:$0xff] }
 0x314   : > { %4288 = vmatmul.mubr.f32.gmra.mxu0 %v7525_v43  ;;  %4432 = vmatprep.subr.mxu1 %v6011_v0  ;;  %v7575_v53 = vld [vmem:[#allocation2 + $0xd1] sm:$0xff]  ;;  %v3051_v63 = vld [vmem:[#allocation9 + $0x328] sm:$0xff] }
 0x315   : > { %4063 = vmatmul.mubr.f32.gmra.mxu1 %v7499_v17  ;;  %4292 = vmatprep.mubr.f32.mxu0 %v7529_v24  ;;  %v2931_v48 = vld [vmem:[#allocation2 + $0x236] sm:$0x1] }
 0x316   : > { %4067 = vmatprep.mubr.f32.mxu1 %v7340_v6  ;;  %4433 = vmatpush1.msra.mxu1 %v3017_v29  ;;  %v7545_v6 = vld [vmem:[#allocation2 + $0xa9] sm:$0xff]  ;;  %2949 = vst [vmem:[#allocation2 + $0x238] sm:$0x1] %v2931_v48  ;;  %v3034_v48 = vld [vmem:[#allocation9 + $0x2a0] sm:$0xff] }
 0x317   : > { %4434 = vmatprep.subr.mxu1 %v6011_v0  ;;  %4643 = vmatprep.subr.mxu0 %v6011_v0  ;;  %v7589_v3 = vld [vmem:[#allocation2 + $0x10f] sm:$0xff] }
 0x318   : > { %4293 = vmatmul.mubr.f32.gmra.mxu0 %v7535_v59  ;;  %4435 = vmatpush1.msra.mxu1 %v3016_v46  ;;  %v3052_v45 = vld [vmem:[#allocation9 + $0x330] sm:$0xff]  ;;  %v3039_v29 = vld [vmem:[#allocation9 + $0x2c8] sm:$0xff] }
 0x319   : > { %4068 = vmatmul.mubr.f32.gmra.mxu1 %v7509_v1  ;;  %4297 = vmatprep.mubr.f32.mxu0 %v7539_v33  ;;  %v3040_v23 = vld [vmem:[#allocation9 + $0x2d0] sm:$0xff]  ;;  %v7619_v46 = vld [vmem:[#allocation2 + $0x147] sm:$0xff] }
 0x31a   : > { %4072 = vmatprep.mubr.f32.mxu1 %v7348_v5  ;;  %4436 = vmatprep.subr.mxu1 %v6011_v0  ;;  %v3045_v5 = vld [vmem:[#allocation9 + $0x2f8] sm:$0xff]  ;;  %v7609_v13 = vld [vmem:[#allocation2 + $0x12f] sm:$0xff] }
 0x31b   : > { %4437 = vmatpush1.msra.mxu1 %v3015_v57  ;;  %4644 = vmatpush1.msra.mxu0 %v3056_v40  ;;  %v3038_v57 = vld [vmem:[#allocation9 + $0x2c0] sm:$0xff]  ;;  %v7629_v40 = vld [vmem:[#allocation2 + $0x14f] sm:$0xff] }
 0x31c   : > { %4298 = vmatmul.mubr.f32.gmra.mxu0 %v7545_v6  ;;  %4438 = vmatprep.subr.mxu1 %v6011_v0  ;;  %v3048_v49 = vld [vmem:[#allocation9 + $0x310] sm:$0xff] }
 0x31d   : > { %4073 = vmatmul.mubr.f32.gmra.mxu1 %v7519_v61  ;;  %4302 = vmatprep.mubr.f32.mxu0 %v7549_v62 }
 0x31e   : > { %4077 = vmatprep.mubr.f32.mxu1 %v7353_v54  ;;  %4439 = vmatpush1.msra.mxu1 %v3014_v2  ;;  %v7565_v54 = vld [vmem:[#allocation2 + $0xc9] sm:$0xff]  ;;  %v3049_v2 = vld [vmem:[#allocation9 + $0x318] sm:$0xff] }
 0x31f   : > { %4440 = vmatprep.subr.mxu1 %v6011_v0  ;;  %4645 = vmatprep.subr.mxu0 %v6011_v0 }
 0x320   : > { %4303 = vmatmul.mubr.f32.gmra.mxu0 %v7555_v22  ;;  %4441 = vmatpush2.msra.mxu1 %v3045_v5  ;;  %v3037_v5 = vld [vmem:[#allocation9 + $0x2b8] sm:$0xff] }
 0x321   : > { %4078 = vmatmul.mubr.f32.gmra.mxu1 %v7529_v24  ;;  %4307 = vmatprep.mubr.f32.mxu0 %v7559_v25 }
 0x322   : > { %4082 = vmatprep.mubr.f32.mxu1 %v7359_v30  ;;  %4442 = vmatprep.subr.mxu1 %v6011_v0  ;;  %v3042_v30 = vld [vmem:[#allocation9 + $0x2e0] sm:$0xff] }
 0x323   : > { %4443 = vmatpush2.msra.mxu1 %v3044_v52  ;;  %4646 = vmatpush1.msra.mxu0 %v3055_v10  ;;  %v3036_v52 = vld [vmem:[#allocation9 + $0x2b0] sm:$0xff] }
 0x324   : > { %4308 = vmatmul.mubr.f32.gmra.mxu0 %v7565_v54  ;;  %4444 = vmatprep.subr.mxu1 %v6011_v0  ;;  %v7649_v10 = vld [vmem:[#allocation2 + $0x16f] sm:$0xff] }
 0x325   : > { %4083 = vmatmul.mubr.f32.gmra.mxu1 %v7539_v33  ;;  %4312 = vmatprep.mubr.f32.mxu0 %v7569_v4 }
 0x326   : > { %4087 = vmatprep.mubr.f32.mxu1 %v7364_v44  ;;  %4445 = vmatpush2.msra.mxu1 %v3043_v36  ;;  %v7585_v44 = vld [vmem:[#allocation2 + $0xe9] sm:$0xff] }
 0x327   : > { %4446 = vmatprep.subr.mxu1 %v6011_v0  ;;  %4647 = vmatprep.subr.mxu0 %v6011_v0  ;;  %v3047_v36 = vld [vmem:[#allocation9 + $0x308] sm:$0xff] }
 0x328   : > { %4313 = vmatmul.mubr.f32.gmra.mxu0 %v7575_v53  ;;  %4447 = vmatpush2.msra.mxu1 %v3042_v30  ;;  %v3035_v30 = vld [vmem:[#allocation9 + $0x2a8] sm:$0xff] }
 0x329   : > { %4088 = vmatmul.mubr.f32.gmra.mxu1 %v7549_v62  ;;  %4317 = vmatprep.mubr.f32.mxu0 %v7579_v16 }
 0x32a   : > { %4092 = vmatprep.mubr.f32.mxu1 %v7369_v21  ;;  %4448 = vmatprep.subr.mxu1 %v6011_v0  ;;  %v7595_v21 = vld [vmem:[#allocation2 + $0xf1] sm:$0xff] }
 0x32b   : > { %4648 = vmatpush1.msra.mxu0 %v3054_v7  ;;  %4449 = vmatpush2.msra.mxu1 %v3041_v28  ;;  %v3046_v7 = vld [vmem:[#allocation9 + $0x300] sm:$0xff] }
 0x32c   : > { %4318 = vmatmul.mubr.f32.gmra.mxu0 %v7585_v44  ;;  %4649 = vmatprep.subr.mxu0 %v6011_v0  ;;  %v7659_v28 = vld [vmem:[#allocation2 + $0x187] sm:$0xff] }
 0x32d   : > { %4093 = vmatmul.mubr.f32.gmra.mxu1 %v7559_v25  ;;  %4322 = vmatprep.mubr.f32.mxu0 %v7589_v3 }
 0x32e   : > { %4097 = vmatprep.mubr.f32.mxu1 %v7374_v47  ;;  %4650 = vmatpush1.msra.mxu0 %v3053_v8  ;;  %v7605_v47 = vld [vmem:[#allocation2 + $0x109] sm:$0xff]  ;;  %v3077_v8 = vld [vmem:[#allocation9 + $0x3f8] sm:$0xff] }
 0x32f   : > { %4450 = vmatprep.subr.mxu1 %v6011_v0  ;;  %4651 = vmatprep.subr.mxu0 %v6011_v0 }
 0x330   : > { %4323 = vmatmul.mubr.f32.gmra.mxu0 %v7595_v21  ;;  %4451 = vmatpush2.msra.mxu1 %v3040_v23  ;;  %v3033_v23 = vld [vmem:[#allocation9 + $0x298] sm:$0xff] }
 0x331   : > { %4098 = vmatmul.mubr.f32.gmra.mxu1 %v7569_v4  ;;  %4327 = vmatprep.mubr.f32.mxu0 %v7599_v60 }
 0x332   : > { %4102 = vmatprep.mubr.f32.mxu1 %v7381_v38  ;;  %4652 = vmatpush1.msra.mxu0 %v3052_v45  ;;  %v7615_v38 = vld [vmem:[#allocation2 + $0x111] sm:$0xff] }
 0x333   : > { %4653 = vmatprep.subr.mxu0 %v6011_v0  ;;  %4452 = vmatprep.subr.mxu1 %v6011_v0  ;;  %v7669_v45 = vld [vmem:[#allocation2 + $0x18f] sm:$0xff] }
 0x334   : > { %4328 = vmatmul.mubr.f32.gmra.mxu0 %v7605_v47  ;;  %4453 = vmatpush2.msra.mxu1 %v3039_v29  ;;  %v7679_v29 = vld [vmem:[#allocation2 + $0x1a7] sm:$0xff] }
 0x335   : > { %4103 = vmatmul.mubr.f32.gmra.mxu1 %v7579_v16  ;;  %4332 = vmatprep.mubr.f32.mxu0 %v7609_v13 }
 0x336   : > { %4107 = vmatprep.mubr.f32.mxu1 %v7386_v18  ;;  %4654 = vmatpush1.msra.mxu0 %v3051_v63  ;;  %v7625_v18 = vld [vmem:[#allocation2 + $0x129] sm:$0xff] }
 0x337   : > { %4655 = vmatprep.subr.mxu0 %v6011_v0  ;;  %4454 = vmatprep.subr.mxu1 %v6011_v0  ;;  %v3076_v63 = vld [vmem:[#allocation9 + $0x3f0] sm:$0xff] }
 0x338   : > { %4333 = vmatmul.mubr.f32.gmra.mxu0 %v7615_v38  ;;  %4455 = vmatpush2.msra.mxu1 %v3038_v57  ;;  %v3075_v57 = vld [vmem:[#allocation9 + $0x3e8] sm:$0xff] }
 0x339   : > { %4108 = vmatmul.mubr.f32.gmra.mxu1 %v7589_v3  ;;  %4337 = vmatprep.mubr.f32.mxu0 %v7619_v46 }
 0x33a   : > { %4112 = vmatprep.mubr.f32.mxu1 %v7391_v34  ;;  %4656 = vmatpush1.msra.mxu0 %v3050_v58  ;;  %v7635_v34 = vld [vmem:[#allocation2 + $0x131] sm:$0xff] }
 0x33b   : > { %4657 = vmatprep.subr.mxu0 %v6011_v0  ;;  %4456 = vmatprep.subr.mxu1 %v6011_v0  ;;  %v3032_v58 = vld [vmem:[#allocation9 + $0x290] sm:$0xff] }
 0x33c   : > { %4338 = vmatmul.mubr.f32.gmra.mxu0 %v7625_v18  ;;  %4457 = vmatpush2.msra.mxu1 %v3037_v5  ;;  %v3031_v5 = vld [vmem:[#allocation9 + $0x288] sm:$0xff] }
 0x33d   : > { %4113 = vmatmul.mubr.f32.gmra.mxu1 %v7599_v60  ;;  %4342 = vmatprep.mubr.f32.mxu0 %v7629_v40 }
 0x33e   : > { %4117 = vmatprep.mubr.f32.mxu1 %v7396_v12  ;;  %4658 = vmatpush1.msra.mxu0 %v3049_v2  ;;  %v7645_v12 = vld [vmem:[#allocation2 + $0x149] sm:$0xff] }
 0x33f   : > { %4659 = vmatprep.subr.mxu0 %v6011_v0  ;;  %4458 = vmatprep.subr.mxu1 %v6011_v0  ;;  %v7689_v2 = vld [vmem:[#allocation2 + $0x1af] sm:$0xff] }
 0x340   : > { %4343 = vmatmul.mubr.f32.gmra.mxu0 %v7635_v34  ;;  %4459 = vmatpush2.msra.mxu1 %v3036_v52  ;;  %v3074_v52 = vld [vmem:[#allocation9 + $0x3e0] sm:$0xff] }
 0x341   : > { %4118 = vmatmul.mubr.f32.gmra.mxu1 %v7609_v13  ;;  %4347 = vmatprep.mubr.f32.mxu0 %v7639_v35 }
 0x342   : > { %4122 = vmatprep.mubr.f32.mxu1 %v7405_v42  ;;  %4660 = vmatpush1.msra.mxu0 %v3048_v49  ;;  %v7655_v42 = vld [vmem:[#allocation2 + $0x151] sm:$0xff] }
 0x343   : > { %4661 = vmatprep.subr.mxu0 %v6011_v0  ;;  %4460 = vmatprep.subr.mxu1 %v6011_v0  ;;  %v7693_v49 = vld [vmem:[#allocation2 + $0x190] sm:$0xff] }
 0x344   : > { %4348 = vmatmul.mubr.f32.gmra.mxu0 %v7645_v12  ;;  %4461 = vmatpush2.msra.mxu1 %v3035_v30  ;;  %v3030_v30 = vld [vmem:[#allocation9 + $0x280] sm:$0xff] }
 0x345   : > { %4123 = vmatmul.mubr.f32.gmra.mxu1 %v7619_v46  ;;  %4352 = vmatprep.mubr.f32.mxu0 %v7649_v10 }
 0x346   : > { %4127 = vmatprep.mubr.f32.mxu1 %v7410_v19  ;;  %4662 = vmatpush1.msra.mxu0 %v3047_v36  ;;  %v7665_v19 = vld [vmem:[#allocation2 + $0x169] sm:$0xff] }
 0x347   : > { %4663 = vmatprep.subr.mxu0 %v6011_v0  ;;  %4462 = vmatprep.subr.mxu1 %v6011_v0  ;;  %v7701_v36 = vld [vmem:[#allocation2 + $0x1c7] sm:$0xff] }
 0x348   : > { %4353 = vmatmul.mubr.f32.gmra.mxu0 %v7655_v42  ;;  %4463 = vmatpush2.msra.mxu1 %v3034_v48  ;;  %8500 = vst [vmem:[#allocation15_spill] sm:$0xff] %v7701_v36  ;;  %v7708_v48 = vld [vmem:[#allocation9 + $0x478] sm:$0xff] }
 0x349   : > { %4128 = vmatmul.mubr.f32.gmra.mxu1 %v7629_v40  ;;  %4357 = vmatprep.mubr.f32.mxu0 %v7659_v28 }
 0x34a   : > { %4132 = vmatprep.mubr.f32.mxu1 %v7415_v31  ;;  %4664 = vmatpush1.msra.mxu0 %v3046_v7  ;;  %v7675_v31 = vld [vmem:[#allocation2 + $0x171] sm:$0xff]  ;;  %v7705_v7 = vld [vmem:[#allocation2 + $0x1a8] sm:$0xff] }
 0x34b   : > { %4665 = vmatprep.subr.mxu0 %v6011_v0  ;;  %4464 = vmatprep.subr.mxu1 %v6011_v0 }
 0x34c   : > { %4358 = vmatmul.mubr.f32.gmra.mxu0 %v7665_v19  ;;  %4465 = vmatpush2.msra.mxu1 %v3033_v23  ;;  %v3073_v23 = vld [vmem:[#allocation9 + $0x3d8] sm:$0xff] }
 0x34d   : > { %4133 = vmatmul.mubr.f32.gmra.mxu1 %v7639_v35  ;;  %4362 = vmatprep.mubr.f32.mxu0 %v7669_v45 }
 0x34e   : > { %4137 = vmatprep.mubr.f32.mxu1 %v7420_v50  ;;  %4666 = vmatpush2.msra.mxu0 %v3077_v8  ;;  %v7685_v50 = vld [vmem:[#allocation2 + $0x189] sm:$0xff] }
 0x34f   : > { %4667 = vmatprep.subr.mxu0 %v6011_v0  ;;  %4466 = vmatprep.subr.mxu1 %v6011_v0  ;;  %v7711_v8 = vld [vmem:[#allocation2 + $0x1a9] sm:$0xff] }
 0x350   : > { %4363 = vmatmul.mubr.f32.gmra.mxu0 %v7675_v31  ;;  %4467 = vmatpush2.msra.mxu1 %v3032_v58  ;;  %v7719_v58 = vld [vmem:[#allocation2 + $0x1b0] sm:$0xff] }
 0x351   : > { %4138 = vmatmul.mubr.f32.gmra.mxu1 %v7649_v10  ;;  %4367 = vmatprep.mubr.f32.mxu0 %v7679_v29 }
 0x352   : > { %4142 = vmatprep.mubr.f32.mxu1 %v7429_v39  ;;  %4668 = vmatpush2.msra.mxu0 %v3076_v63  ;;  %v7697_v39 = vld [vmem:[#allocation2 + $0x191] sm:$0xff] }
 0x353   : > { %4669 = vmatprep.subr.mxu0 %v6011_v0  ;;  %4468 = vmatprep.subr.mxu1 %v6011_v0  ;;  %v7715_v63 = vld [vmem:[#allocation2 + $0x1cf] sm:$0xff] }
 0x354   : > { %4368 = vmatmul.mubr.f32.gmra.mxu0 %v7685_v50  ;;  %4469 = vmatpush2.msra.mxu1 %v3031_v5  ;;  %v7724_v5 = vld [vmem:[#allocation2 + $0x1b1] sm:$0xff] }
 0x355   : > { %4143 = vmatmul.mubr.f32.gmra.mxu1 %v7659_v28  ;;  %4372 = vmatprep.mubr.f32.mxu0 %v7689_v2  ;;  %8501 = vst [vmem:[#allocation16_spill] sm:$0xff] %v7724_v5 }
 0x356   : > { %4147 = vmatprep.mubr.f32.mxu1 %v7693_v49  ;;  %4670 = vmatpush2.msra.mxu0 %v3075_v57  ;;  %v3072_v57 = vld [vmem:[#allocation9 + $0x3d0] sm:$0xff] }
 0x357   : > { %4671 = vmatprep.subr.mxu0 %v6011_v0  ;;  %4470 = vmatprep.subr.mxu1 %v6011_v0 }
 0x358   : > { %4373 = vmatmul.mubr.f32.gmra.mxu0 %v7697_v39  ;;  %4471 = vmatpush2.msra.mxu1 %v3030_v30  ;;  %v7727_v30 = vld [vmem:[#allocation2 + $0x1c8] sm:$0xff] }
 0x359   : > { %4148 = vmatmul.mubr.f32.gmra.mxu1 %v7669_v45  ;;  %4377 = vmatprep.mubr.f32.mxu0 %v7701_v36  ;;  %8502 = vst [vmem:[#allocation17_spill] sm:$0xff] %v7727_v30 }
 0x35a   : > { %4152 = vmatprep.mubr.f32.mxu1 %v7705_v7  ;;  %4672 = vmatpush2.msra.mxu0 %v3074_v52  ;;  %v3071_v52 = vld [vmem:[#allocation9 + $0x3c8] sm:$0xff] }
 0x35b   : > { %4673 = vmatprep.subr.mxu0 %v6011_v0  ;;  %5677 = vmatprep.subr.mxu1 %v7708_v48 }
 0x35c   : > { %4378 = vmatmul.mubr.f32.gmra.mxu0 %v7711_v8 }
 0x35d   : > { %4153 = vmatmul.mubr.f32.gmra.mxu1 %v7679_v29  ;;  %4382 = vmatprep.mubr.f32.mxu0 %v7715_v63 }
 0x35e   : > { %4157 = vmatprep.mubr.f32.mxu1 %v7719_v58  ;;  %4674 = vmatpush2.msra.mxu0 %v3073_v23  ;;  %v7737_v23 = vld [vmem:[#allocation2 + $0x1d0] sm:$0xff] }
 0x35f   : > { %4675 = vmatprep.subr.mxu0 %v6011_v0  ;;  %8503 = vst [vmem:[#allocation18_spill] sm:$0xff] %v7737_v23 }
 0x360   : > { %4676 = vmatpush2.msra.mxu0 %v3072_v57  ;;  %v7739_v57 = vld [vmem:[#allocation2 + $0x1c9] sm:$0xff] }
 0x361   : > { %4158 = vmatmul.mubr.f32.gmra.mxu1 %v7689_v2  ;;  %4383 = vmatmul.mubr.f32.gmra.mxu0 %v7724_v5  ;;  %8504 = vst [vmem:[#allocation19_spill] sm:$0xff] %v7739_v57  ;;  %v7743_v5 = vld [vmem:[#allocation2 + $0x1ef] sm:$0xff] }
 0x362   : > { %4162 = vmatprep.mubr.f32.mxu1 %v7727_v30  ;;  %4677 = vmatprep.subr.mxu0 %v6011_v0  ;;  %v3066_v30 = vld [vmem:[#allocation9 + $0x3a0] sm:$0xff] }
 0x363   : > { %4387 = vmatprep.mubr.f32.mxu0 %v7732_v51  ;;  %4678 = vmatpush2.msra.mxu0 %v3071_v52  ;;  %v3068_v52 = vld [vmem:[#allocation9 + $0x3b0] sm:$0xff] }
 0x364   : > { %4679 = vmatprep.subr.mxu0 %v6011_v0 }
 0x365   : > { %4163 = vmatmul.mubr.f32.gmra.mxu1 %v7701_v36  ;;  %4680 = vmatpush2.msra.mxu0 %v3070_v20  ;;  %v7749_v20 = vld [vmem:[#allocation2 + $0x1e8] sm:$0xff] }
 0x366   : > { %4167 = vmatprep.mubr.f32.mxu1 %v7737_v23  ;;  %4388 = vmatmul.mubr.f32.gmra.mxu0 %v7739_v57  ;;  %8505 = vst [vmem:[#allocation20_spill] sm:$0xff] %v7749_v20  ;;  %v3067_v36 = vld [vmem:[#allocation9 + $0x3a8] sm:$0xff]  ;;  %v7752_v23 = vld [vmem:[#allocation2 + $0x1d1] sm:$0xff] }
 0x367   : > { %4681 = vmatprep.subr.mxu0 %v6011_v0  ;;  %4392 = vmatprep.mubr.f32.mxu0 %v7743_v5  ;;  %8506 = vst [vmem:[#allocation21_spill] sm:$0xff] %v7752_v23  ;;  %v7756_v57 = vld [vmem:[#allocation2 + $0x207] sm:$0xff] }
 0x368   : > { %4682 = vmatpush2.msra.mxu0 %v3069_v9  ;;  %8507 = vst [vmem:[#allocation22_spill] sm:$0xff] %v7756_v57  ;;  %v7761_v9 = vld [vmem:[#allocation2 + $0x1f0] sm:$0xff] }
 0x369   : > { %4683 = vmatprep.subr.mxu0 %v6011_v0  ;;  %4168 = vmatmul.mubr.f32.gmra.mxu1 %v7715_v63  ;;  %8508 = vst [vmem:[#allocation23_spill] sm:$0xff] %v7761_v9 }
 0x36a   : > { %4684 = vmatpush2.msra.mxu0 %v3068_v52  ;;  %4172 = vmatprep.mubr.f32.mxu1 %v7749_v20  ;;  %v3065_v52 = vld [vmem:[#allocation9 + $0x398] sm:$0xff]  ;;  %v7764_v20 = vld [vmem:[#allocation2 + $0x1e9] sm:$0xff] }
 0x36b   : > { %4393 = vmatmul.mubr.f32.gmra.mxu0 %v7752_v23  ;;  %4685 = vmatprep.subr.mxu0 %v6011_v0  ;;  %8509 = vst [vmem:[#allocation24_spill] sm:$0xff] %v7764_v20  ;;  %v7768_v23 = vld [vmem:[#allocation2 + $0x20f] sm:$0xff] }
 0x36c   : > { %4397 = vmatprep.mubr.f32.mxu0 %v7756_v57  ;;  %4686 = vmatpush2.msra.mxu0 %v3067_v36  ;;  %8510 = vst [vmem:[#allocation25_spill] sm:$0xff] %v7768_v23  ;;  %v3064_v57 = vld [vmem:[#allocation9 + $0x390] sm:$0xff]  ;;  %v3063_v36 = vld [vmem:[#allocation9 + $0x388] sm:$0xff] }
 0x36d   : > { %4687 = vmatprep.subr.mxu0 %v6011_v0  ;;  %4173 = vmatmul.mubr.f32.gmra.mxu1 %v7732_v51 }
 0x36e   : > { %4688 = vmatpush2.msra.mxu0 %v3066_v30  ;;  %4177 = vmatprep.mubr.f32.mxu1 %v7761_v9  ;;  %v7773_v30 = vld [vmem:[#allocation2 + $0x1f1] sm:$0xff]  ;;  %v3062_v9 = vld [vmem:[#allocation9 + $0x380] sm:$0xff] }
 0x36f   : > { %4398 = vmatmul.mubr.f32.gmra.mxu0 %v7764_v20  ;;  %4689 = vmatprep.subr.mxu0 %v6011_v0  ;;  %8511 = vst [vmem:[#allocation26_spill] sm:$0xff] %v7773_v30  ;;  %v3542_v20 = vld [vmem:[#allocation2 + $0x48] sm:$0xff] }
 0x370   : > { %4402 = vmatprep.mubr.f32.mxu0 %v7768_v23  ;;  %4690 = vmatpush2.msra.mxu0 %v3065_v52  ;;  %v3350_v23 = vld [vmem:[#allocation2 + $0x28] sm:$0xff]  ;;  %v3092_v52 = vld [vmem:[#allocation9 + $0x470] sm:$0xff] }
 0x371   : > { %4691 = vmatprep.subr.mxu0 %v6011_v0  ;;  %4178 = vmatmul.mubr.f32.gmra.mxu1 %v7743_v5 }
 0x372   : > { %4692 = vmatpush2.msra.mxu0 %v3064_v57  ;;  %4472 = vmatprep.mubr.f32.mxu1 %v7467_v41  ;;  %v3543_v41 = vld [vmem:[#allocation2 + $0x50] sm:$0xff] }
 0x373   : > { %4403 = vmatmul.mubr.f32.gmra.mxu0 %v7773_v30  ;;  %4693 = vmatprep.subr.mxu0 %v6011_v0  ;;  %v3351_v57 = vld [vmem:[#allocation2 + $0x30] sm:$0xff]  ;;  %v3091_v30 = vld [vmem:[#allocation9 + $0x468] sm:$0xff] }
 0x374   : > { %4694 = vmatpush2.msra.mxu0 %v3063_v36  ;;  %4697 = vmatprep.mubr.f32.mxu0 %v3542_v20  ;;  %v3090_v36 = vld [vmem:[#allocation9 + $0x460] sm:$0xff] }
 0x375   : > { %4695 = vmatprep.subr.mxu0 %v6011_v0  ;;  %4473 = vmatmul.mubr.f32.vlgmr.msra.gmra.mxu1 %v3350_v23  ;;  %v3544_v0 = vld [vmem:[#allocation2 + $0x68] sm:$0xff] }
 0x376   : > { %4696 = vmatpush2.msra.mxu0 %v3062_v9  ;;  %4477 = vmatprep.mubr.f32.mxu1 %v7476_v26  ;;  %v3089_v26 = vld [vmem:[#allocation9 + $0x458] sm:$0xff]  ;;  %v3546_v23 = vld [vmem:[#allocation2 + $0x88] sm:$0xff] }
 0x377   : > { %4698 = vmatmul.mubr.f32.vlgmr.msra.gmra.mxu0 %v7462_v14  ;;  %5678 = vmatpush3.msra.mxu1 %v7708_v48  ;;  %v3088_v14 = vld [vmem:[#allocation9 + $0x450] sm:$0xff]  ;;  %v3548_v9 = vld [vmem:[#allocation2 + $0xa8] sm:$0xff] }
 0x378   : > { %4702 = vmatprep.mubr.f32.mxu0 %v3543_v41  ;;  %5679 = vmatprep.subr.mxu1 %v3092_v52  ;;  %v3545_v48 = vld [vmem:[#allocation2 + $0x70] sm:$0xff] }
 0x379   : > { %4478 = vmatmul.mubr.f32.gmra.mxu1 %v3351_v57 }
 0x37a   : > { %4482 = vmatprep.mubr.f32.mxu1 %v7485_v56  ;;  %5680 = vmatpush3.msra.mxu1 %v3092_v52  ;;  %v3087_v56 = vld [vmem:[#allocation9 + $0x448] sm:$0xff] }
 0x37b   : > { %4703 = vmatmul.mubr.f32.gmra.mxu0 %v7471_v32  ;;  %5681 = vmatprep.subr.mxu1 %v3091_v30  ;;  %v3086_v32 = vld [vmem:[#allocation9 + $0x440] sm:$0xff]  ;;  %v3550_v52 = vld [vmem:[#allocation2 + $0xc8] sm:$0xff] }
 0x37c   : > { %4707 = vmatprep.mubr.f32.mxu0 %v3544_v0  ;;  %5682 = vmatpush3.msra.mxu1 %v3091_v30  ;;  %v3549_v30 = vld [vmem:[#allocation2 + $0xb0] sm:$0xff] }
 0x37d   : > { %4483 = vmatmul.mubr.f32.gmra.mxu1 %v3542_v20  ;;  %5683 = vmatprep.subr.mxu1 %v3090_v36  ;;  %v3547_v20 = vld [vmem:[#allocation2 + $0x90] sm:$0xff] }
 0x37e   : > { %4487 = vmatprep.mubr.f32.mxu1 %v7495_v37  ;;  %5684 = vmatpush3.msra.mxu1 %v3090_v36  ;;  %v3085_v37 = vld [vmem:[#allocation9 + $0x438] sm:$0xff] }
 0x37f   : > { %4708 = vmatmul.mubr.f32.gmra.mxu0 %v7480_v15  ;;  %5685 = vmatprep.subr.mxu1 %v3089_v26  ;;  %v3084_v15 = vld [vmem:[#allocation9 + $0x430] sm:$0xff] }
 0x380   : > { %4712 = vmatprep.mubr.f32.mxu0 %v3545_v48  ;;  %5686 = vmatpush3.msra.mxu1 %v3089_v26 }
 0x381   : > { %4488 = vmatmul.mubr.f32.gmra.mxu1 %v3543_v41  ;;  %5687 = vmatprep.subr.mxu1 %v3088_v14 }
 0x382   : > { %4492 = vmatprep.mubr.f32.mxu1 %v7505_v11  ;;  %5688 = vmatpush3.msra.mxu1 %v3088_v14  ;;  %v3083_v11 = vld [vmem:[#allocation9 + $0x428] sm:$0xff] }
 0x383   : > { %4713 = vmatmul.mubr.f32.gmra.mxu0 %v7489_v55  ;;  %5689 = vmatprep.subr.mxu1 %v3087_v56  ;;  %v3082_v55 = vld [vmem:[#allocation9 + $0x420] sm:$0xff] }
 0x384   : > { %4717 = vmatprep.mubr.f32.mxu0 %v3546_v23  ;;  %5690 = vmatpush3.msra.mxu1 %v3087_v56  ;;  %v3562_v56 = vld [vmem:[#allocation2 + $0x188] sm:$0xff] }
 0x385   : > { %4493 = vmatmul.mubr.f32.gmra.mxu1 %v3544_v0  ;;  %5691 = vmatprep.subr.mxu1 %v3086_v32  ;;  %v3561_v0 = vld [vmem:[#allocation2 + $0x170] sm:$0xff] }
 0x386   : > { %4497 = vmatprep.mubr.f32.mxu1 %v7515_v27  ;;  %5692 = vmatpush3.msra.mxu1 %v3086_v32  ;;  %v3081_v27 = vld [vmem:[#allocation9 + $0x418] sm:$0xff] }
 0x387   : > { %4718 = vmatmul.mubr.f32.gmra.mxu0 %v7499_v17  ;;  %5693 = vmatprep.subr.mxu1 %v3085_v37  ;;  %v3080_v17 = vld [vmem:[#allocation9 + $0x410] sm:$0xff] }
 0x388   : > { %4722 = vmatprep.mubr.f32.mxu0 %v3547_v20  ;;  %5694 = vmatpush3.msra.mxu1 %v3085_v37 }
 0x389   : > { %4498 = vmatmul.mubr.f32.gmra.mxu1 %v3545_v48  ;;  %5695 = vmatprep.subr.mxu1 %v3084_v15 }
 0x38a   : > { %4502 = vmatprep.mubr.f32.mxu1 %v7525_v43  ;;  %5696 = vmatpush3.msra.mxu1 %v3084_v15  ;;  %v3079_v43 = vld [vmem:[#allocation9 + $0x408] sm:$0xff] }
 0x38b   : > { %4723 = vmatmul.mubr.f32.gmra.mxu0 %v7509_v1  ;;  %5697 = vmatprep.subr.mxu1 %v3083_v11  ;;  %v3078_v1 = vld [vmem:[#allocation9 + $0x400] sm:$0xff] }
 0x38c   : > { %4727 = vmatprep.mubr.f32.mxu0 %v3548_v9  ;;  %5698 = vmatpush3.msra.mxu1 %v3083_v11 }
 0x38d   : > { %4503 = vmatmul.mubr.f32.gmra.mxu1 %v3546_v23  ;;  %5699 = vmatprep.subr.mxu1 %v3082_v55 }
 0x38e   : > { %4507 = vmatprep.mubr.f32.mxu1 %v7535_v59  ;;  %5700 = vmatpush3.msra.mxu1 %v3082_v55  ;;  %v3552_v59 = vld [vmem:[#allocation2 + $0xe8] sm:$0xff] }
 0x38f   : > { %4728 = vmatmul.mubr.f32.gmra.mxu0 %v7519_v61  ;;  %5701 = vmatprep.subr.mxu1 %v3081_v27  ;;  %v3551_v61 = vld [vmem:[#allocation2 + $0xd0] sm:$0xff] }
 0x390   : > { %4732 = vmatprep.mubr.f32.mxu0 %v3549_v30  ;;  %5702 = vmatpush3.msra.mxu1 %v3081_v27 }
 0x391   : > { %4508 = vmatmul.mubr.f32.gmra.mxu1 %v3547_v20  ;;  %5703 = vmatprep.subr.mxu1 %v3080_v17 }
 0x392   : > { %4512 = vmatprep.mubr.f32.mxu1 %v7545_v6  ;;  %5704 = vmatpush3.msra.mxu1 %v3080_v17  ;;  %v3555_v6 = vld [vmem:[#allocation2 + $0x110] sm:$0xff] }
 0x393   : > { %4733 = vmatmul.mubr.f32.gmra.mxu0 %v7529_v24  ;;  %5705 = vmatprep.subr.mxu1 %v3079_v43  ;;  %v3553_v24 = vld [vmem:[#allocation2 + $0xf0] sm:$0xff] }
 0x394   : > { %4737 = vmatprep.mubr.f32.mxu0 %v3550_v52  ;;  %5706 = vmatpush3.msra.mxu1 %v3079_v43 }
 0x395   : > { %4513 = vmatmul.mubr.f32.gmra.mxu1 %v3548_v9  ;;  %5707 = vmatprep.subr.mxu1 %v3078_v1 }
 0x396   : > { %4517 = vmatprep.mubr.f32.mxu1 %v7555_v22  ;;  %5708 = vmatpush3.msra.mxu1 %v3078_v1  ;;  %v3557_v22 = vld [vmem:[#allocation2 + $0x130] sm:$0xff]  ;;  %v8512_v1 = vld [vmem:[#allocation17_spill] sm:$0xff] }
 0x397   : > { %4738 = vmatmul.mubr.f32.gmra.mxu0 %v7539_v33  ;;  %v3554_v33 = vld [vmem:[#allocation2 + $0x108] sm:$0xff] }
 0x398   : > { %4742 = vmatprep.mubr.f32.mxu0 %v3551_v61 }
 0x399   : > { %4518 = vmatmul.mubr.f32.gmra.mxu1 %v3549_v30 }
 0x39a   : > { %4522 = vmatprep.mubr.f32.mxu1 %v7565_v54 }
 0x39b   : > { %4743 = vmatmul.mubr.f32.gmra.mxu0 %v7549_v62  ;;  %v3556_v62 = vld [vmem:[#allocation2 + $0x128] sm:$0xff] }
 0x39c   : > { %4747 = vmatprep.mubr.f32.mxu0 %v3552_v59 }
 0x39d   : > { %4523 = vmatmul.mubr.f32.gmra.mxu1 %v3550_v52 }
 0x39e   : > { %4527 = vmatprep.mubr.f32.mxu1 %v7575_v53 }
 0x39f   : > { %4748 = vmatmul.mubr.f32.gmra.mxu0 %v7559_v25  ;;  %v3558_v25 = vld [vmem:[#allocation2 + $0x148] sm:$0xff] }
 0x3a0   : > { %4752 = vmatprep.mubr.f32.mxu0 %v3553_v24 }
 0x3a1   : > { %4528 = vmatmul.mubr.f32.gmra.mxu1 %v3551_v61  ;;  %v8513_v61 = vld [vmem:[#allocation16_spill] sm:$0xff] }
 0x3a2   : > { %4532 = vmatprep.mubr.f32.mxu1 %v7585_v44 }
 0x3a3   : > { %4753 = vmatmul.mubr.f32.gmra.mxu0 %v7569_v4 }
 0x3a4   : > { %4757 = vmatprep.mubr.f32.mxu0 %v3554_v33 }
 0x3a5   : > { %4533 = vmatmul.mubr.f32.gmra.mxu1 %v3552_v59 }
 0x3a6   : > { %4537 = vmatprep.mubr.f32.mxu1 %v7595_v21 }
 0x3a7   : > { %4758 = vmatmul.mubr.f32.gmra.mxu0 %v7579_v16 }
 0x3a8   : > { %4762 = vmatprep.mubr.f32.mxu0 %v3555_v6 }
 0x3a9   : > { %4538 = vmatmul.mubr.f32.gmra.mxu1 %v3553_v24 }
 0x3aa   : > { %4542 = vmatprep.mubr.f32.mxu1 %v7605_v47 }
 0x3ab   : > { %4763 = vmatmul.mubr.f32.gmra.mxu0 %v7589_v3  ;;  %v3559_v3 = vld [vmem:[#allocation2 + $0x150] sm:$0xff] }
 0x3ac   : > { %4767 = vmatprep.mubr.f32.mxu0 %v3556_v62 }
 0x3ad   : > { %4543 = vmatmul.mubr.f32.gmra.mxu1 %v3554_v33  ;;  %v8515_v33 = vld [vmem:[#allocation18_spill] sm:$0xff] }
 0x3ae   : > { %4547 = vmatprep.mubr.f32.mxu1 %v7615_v38 }
 0x3af   : > { %4768 = vmatmul.mubr.f32.gmra.mxu0 %v7599_v60 }
 0x3b0   : > { %4772 = vmatprep.mubr.f32.mxu0 %v3557_v22 }
 0x3b1   : > { %4548 = vmatmul.mubr.f32.gmra.mxu1 %v3555_v6  ;;  %v4249_v54 = vpop.f32.mrf.mxu0 }
 0x3b2   : > { %4552 = vmatprep.mubr.f32.mxu1 %v7625_v18  ;;  %v3560_v18 = vld [vmem:[#allocation2 + $0x168] sm:$0xff] }
 0x3b3   : > { %4773 = vmatmul.mubr.f32.gmra.mxu0 %v7609_v13  ;;  %v4251_v16 = vpop.f32.mrf.mxu0 }
 0x3b4   : > { %4777 = vmatprep.mubr.f32.mxu0 %v3558_v25 }
 0x3b5   : > { %v4024_v4 = vpop.f32.mrf.mxu1  ;;  %4553 = vmatmul.mubr.f32.gmra.mxu1 %v3556_v62  ;;  %v8516_v62 = vld [vmem:[#allocation19_spill] sm:$0xff] }
 0x3b6   : > { %v7812_v53 = vadd.f32 %v4249_v54, %v4024_v4  ;;  %4557 = vmatprep.mubr.f32.mxu1 %v7635_v34 }
 0x3b7   : > { %4778 = vmatmul.mubr.f32.gmra.mxu0 %v7619_v46  ;;  %v4026_v44 = vpop.f32.mrf.mxu1 }
 0x3b8   : > { %4782 = vmatprep.mubr.f32.mxu0 %v3559_v3  ;;  %v4254_v21 = vpop.f32.mrf.mxu0  ;;  %v8518_v44 = vld [vmem:[#allocation21_spill] sm:$0xff] }
 0x3b9   : > { %v4029_v60 = vpop.f32.mrf.mxu1  ;;  %4558 = vmatmul.mubr.f32.gmra.mxu1 %v3557_v22 }
 0x3ba   : > { %v7816_v47 = vadd.f32 %v4254_v21, %v4029_v60  ;;  %4562 = vmatprep.mubr.f32.mxu1 %v7645_v12  ;;  %v4256_v13 = vpop.f32.mrf.mxu0  ;;  %v8519_v21 = vld [vmem:[#allocation23_spill] sm:$0xff] }
 0x3bb   : > { %4783 = vmatmul.mubr.f32.gmra.mxu0 %v7629_v40  ;;  %v4031_v38 = vpop.f32.mrf.mxu1 }
 0x3bc   : > { %4787 = vmatprep.mubr.f32.mxu0 %v3560_v18  ;;  %v4259_v34 = vpop.f32.mrf.mxu0  ;;  %v8520_v38 = vld [vmem:[#allocation24_spill] sm:$0xff] }
 0x3bd   : > { %v4034_v41 = vpop.f32.mrf.mxu1  ;;  %4563 = vmatmul.mubr.f32.gmra.mxu1 %v3558_v25  ;;  %v8517_v25 = vld [vmem:[#allocation20_spill] sm:$0xff] }
 0x3be   : > { %v7820_v46 = vadd.f32 %v4259_v34, %v4034_v41  ;;  %4567 = vmatprep.mubr.f32.mxu1 %v7655_v42  ;;  %v4261_v57 = vpop.f32.mrf.mxu0  ;;  %v3570_v41 = vld [vmem:[#allocation2 + $0x208] sm:$0xff] }
 0x3bf   : > { %4788 = vmatmul.mubr.f32.gmra.mxu0 %v7639_v35  ;;  %v4036_v36 = vpop.f32.mrf.mxu1 }
 0x3c0   : > { %4792 = vmatprep.mubr.f32.mxu0 %v3561_v0  ;;  %v4264_v12 = vpop.f32.mrf.mxu0 }
 0x3c1   : > { %v4039_v26 = vpop.f32.mrf.mxu1  ;;  %4568 = vmatmul.mubr.f32.gmra.mxu1 %v3559_v3 }
 0x3c2   : > { %v7824_v40 = vadd.f32 %v4264_v12, %v4039_v26  ;;  %4572 = vmatprep.mubr.f32.mxu1 %v7665_v19  ;;  %v4266_v14 = vpop.f32.mrf.mxu0  ;;  %v8522_v26 = vld [vmem:[#allocation22_spill] sm:$0xff] }
 0x3c3   : > { %4793 = vmatmul.mubr.f32.gmra.mxu0 %v7649_v10  ;;  %v4041_v48 = vpop.f32.mrf.mxu1 }
 0x3c4   : > { %4797 = vmatprep.mubr.f32.mxu0 %v3562_v56  ;;  %v4269_v42 = vpop.f32.mrf.mxu0  ;;  %v3571_v48 = vld [vmem:[#allocation2 + $0x210] sm:$0xff] }
 0x3c5   : > { %v4044_v32 = vpop.f32.mrf.mxu1  ;;  %4573 = vmatmul.mubr.f32.gmra.mxu1 %v3560_v18 }
 0x3c6   : > { %v7828_v35 = vadd.f32 %v4269_v42, %v4044_v32  ;;  %4577 = vmatprep.mubr.f32.mxu1 %v7675_v31  ;;  %v4271_v23 = vpop.f32.mrf.mxu0 }
 0x3c7   : > { %4798 = vmatmul.mubr.f32.gmra.mxu0 %v7659_v28  ;;  %v4046_v37 = vpop.f32.mrf.mxu1 }
 0x3c8   : > { %4802 = vmatprep.mubr.f32.mxu0 %v7693_v49  ;;  %v4274_v19 = vpop.f32.mrf.mxu0  ;;  %v8523_v37 = vld [vmem:[#allocation25_spill] sm:$0xff] }
 0x3c9   : > { %v4049_v15 = vpop.f32.mrf.mxu1  ;;  %4578 = vmatmul.mubr.f32.gmra.mxu1 %v3561_v0  ;;  %v8521_v0 = vld [vmem:[#allocation26_spill] sm:$0xff] }
 0x3ca   : > { %v7833_v10 = vadd.f32 %v4274_v19, %v4049_v15  ;;  %4582 = vmatprep.mubr.f32.mxu1 %v7685_v50  ;;  %v4276_v20 = vpop.f32.mrf.mxu0  ;;  %v3572_v15 = vld [vmem:[#allocation2 + $0x228] sm:$0xff] }
 0x3cb   : > { %4803 = vmatmul.mubr.f32.gmra.mxu0 %v7669_v45  ;;  %v4051_v11 = vpop.f32.mrf.mxu1 }
 0x3cc   : > { %4807 = vmatprep.mubr.f32.mxu0 %v7705_v7  ;;  %v4279_v31 = vpop.f32.mrf.mxu0 }
 0x3cd   : > { %v4054_v55 = vpop.f32.mrf.mxu1  ;;  %4583 = vmatmul.mubr.f32.gmra.mxu1 %v3562_v56 }
 0x3ce   : > { %v7838_v28 = vadd.f32 %v4279_v31, %v4054_v55  ;;  %4587 = vmatprep.mubr.f32.mxu1 %v7697_v39  ;;  %v4281_v9 = vpop.f32.mrf.mxu0  ;;  %v7884_v31 = vld [vmem:[#allocation2 + $0x211] sm:$0xff] }
 0x3cf   : > { %4808 = vmatmul.mubr.f32.gmra.mxu0 %v7679_v29  ;;  %v4056_v27 = vpop.f32.mrf.mxu1  ;;  %v3508_v9 = vld [vmem:[#allocation2 + $0x227] sm:$0xff] }
 0x3d0   : > { %4812 = vmatprep.mubr.f32.mxu0 %v7719_v58  ;;  %v4284_v50 = vpop.f32.mrf.mxu0 }
 0x3d1   : > { %v4059_v17 = vpop.f32.mrf.mxu1  ;;  %4588 = vmatmul.mubr.f32.gmra.mxu1 %v7693_v49  ;;  %v8514_v49 = vld [vmem:[#allocation15_spill] sm:$0xff] }
 0x3d2   : > { %v7844_v45 = vadd.f32 %v4284_v50, %v4059_v17  ;;  %4592 = vmatprep.mubr.f32.mxu1 %v7711_v8  ;;  %v4286_v30 = vpop.f32.mrf.mxu0  ;;  %v3573_v17 = vld [vmem:[#allocation2 + $0x230] sm:$0xff] }
 0x3d3   : > { %4813 = vmatmul.mubr.f32.gmra.mxu0 %v7689_v2  ;;  %v4061_v43 = vpop.f32.mrf.mxu1 }
 0x3d4   : > { %4817 = vmatprep.mubr.f32.mxu0 %v8512_v1  ;;  %v4289_v39 = vpop.f32.mrf.mxu0 }
 0x3d5   : > { %v4064_v52 = vpop.f32.mrf.mxu1  ;;  %4593 = vmatmul.mubr.f32.gmra.mxu1 %v7705_v7 }
 0x3d6   : > { %v7850_v29 = vadd.f32 %v4289_v39, %v4064_v52  ;;  %4597 = vmatprep.mubr.f32.mxu1 %v8513_v61  ;;  %v4291_v59 = vpop.f32.mrf.mxu0  ;;  %v3509_v52 = vld [vmem:[#allocation2 + $0x22f] sm:$0xff] }
 0x3d7   : > { %4818 = vmatmul.mubr.f32.gmra.mxu0 %v8514_v49  ;;  %v4066_v24 = vpop.f32.mrf.mxu1  ;;  %v3607_v49 = vld [vmem:[#allocation2 + $0x51] sm:$0xff] }
 0x3d8   : > { %4822 = vmatprep.mubr.f32.mxu0 %v8515_v33  ;;  %v4294_v8 = vpop.f32.mrf.mxu0 }
 0x3d9   : > { %v4069_v6 = vpop.f32.mrf.mxu1  ;;  %4598 = vmatmul.mubr.f32.gmra.mxu1 %v7719_v58 }
 0x3da   : > { %v7856_v2 = vadd.f32 %v4294_v8, %v4069_v6  ;;  %4602 = vmatprep.mubr.f32.mxu1 %v8516_v62  ;;  %v4296_v22 = vpop.f32.mrf.mxu0  ;;  %v3608_v8 = vld [vmem:[#allocation2 + $0x69] sm:$0xff] }
 0x3db   : > { %4823 = vmatmul.mubr.f32.gmra.mxu0 %v7715_v63  ;;  %v4071_v7 = vpop.f32.mrf.mxu1 }
 0x3dc   : > { %4827 = vmatprep.mubr.f32.mxu0 %v8517_v25  ;;  %v4299_v54 = vpop.f32.mrf.mxu0  ;;  %v3609_v7 = vld [vmem:[#allocation2 + $0x71] sm:$0xff] }
 0x3dd   : > { %v4074_v4 = vpop.f32.mrf.mxu1  ;;  %4603 = vmatmul.mubr.f32.gmra.mxu1 %v8512_v1  ;;  %v3606_v1 = vld [vmem:[#allocation2 + $0x49] sm:$0xff] }
 0x3de   : > { %v7862_v16 = vadd.f32 %v4299_v54, %v4074_v4  ;;  %4607 = vmatprep.mubr.f32.mxu1 %v8518_v44  ;;  %v4301_v3 = vpop.f32.mrf.mxu0  ;;  %v3610_v4 = vld [vmem:[#allocation2 + $0x89] sm:$0xff] }
 0x3df   : > { %4828 = vmatmul.mubr.f32.gmra.mxu0 %v7732_v51  ;;  %v4076_v58 = vpop.f32.mrf.mxu1 }
 0x3e0   : > { %4832 = vmatprep.mubr.f32.mxu0 %v8519_v21  ;;  %v4304_v60 = vpop.f32.mrf.mxu0 }
 0x3e1   : > { %v4079_v13 = vpop.f32.mrf.mxu1  ;;  %4608 = vmatmul.mubr.f32.gmra.mxu1 %v8515_v33 }
 0x3e2   : > { %v7868_v63 = vadd.f32 %v4304_v60, %v4079_v13  ;;  %4612 = vmatprep.mubr.f32.mxu1 %v8520_v38  ;;  %v4306_v18 = vpop.f32.mrf.mxu0  ;;  %v3612_v38 = vld [vmem:[#allocation2 + $0xa9] sm:$0xff] }
 0x3e3   : > { %4833 = vmatmul.mubr.f32.gmra.mxu0 %v7743_v5  ;;  %v4081_v34 = vpop.f32.mrf.mxu1  ;;  %v7878_v5 = vld [vmem:[#allocation2 + $0x209] sm:$0xff] }
 0x3e4   : > { %4837 = vmatprep.mubr.f32.mxu0 %v3570_v41  ;;  %v4309_v57 = vpop.f32.mrf.mxu0 }
 0x3e5   : > { %v4084_v36 = vpop.f32.mrf.mxu1  ;;  %4613 = vmatmul.mubr.f32.gmra.mxu1 %v8517_v25 }
 0x3e6   : > { %v7873_v51 = vadd.f32 %v4309_v57, %v4084_v36  ;;  %4617 = vmatprep.mubr.f32.mxu1 %v8521_v0  ;;  %v4311_v12 = vpop.f32.mrf.mxu0  ;;  %v3613_v57 = vld [vmem:[#allocation2 + $0xb1] sm:$0xff] }
 0x3e7   : > { %4838 = vmatmul.mubr.f32.gmra.mxu0 %v8522_v26  ;;  %v4086_v14 = vpop.f32.mrf.mxu1  ;;  %v3614_v12 = vld [vmem:[#allocation2 + $0xc9] sm:$0xff] }
 0x3e8   : > { %4842 = vmatprep.mubr.f32.mxu0 %v3571_v48  ;;  %v4314_v56 = vpop.f32.mrf.mxu0 }
 0x3e9   : > { %v4089_v42 = vpop.f32.mrf.mxu1  ;;  %4618 = vmatmul.mubr.f32.gmra.mxu1 %v8519_v21  ;;  %v3611_v21 = vld [vmem:[#allocation2 + $0x91] sm:$0xff] }
 0x3ea   : > { %v7880_v32 = vadd.f32 %v4314_v56, %v4089_v42  ;;  %4622 = vmatprep.mubr.f32.mxu1 %v7878_v5  ;;  %v4316_v23 = vpop.f32.mrf.mxu0  ;;  %v3615_v56 = vld [vmem:[#allocation2 + $0xd1] sm:$0xff] }
 0x3eb   : > { %4843 = vmatmul.mubr.f32.gmra.mxu0 %v8523_v37  ;;  %v4091_v19 = vpop.f32.mrf.mxu1  ;;  %v3616_v37 = vld [vmem:[#allocation2 + $0xe9] sm:$0xff] }
 0x3ec   : > { %4847 = vmatprep.mubr.f32.mxu0 %v3572_v15  ;;  %v4319_v20 = vpop.f32.mrf.mxu0 }
 0x3ed   : > { %v4094_v11 = vpop.f32.mrf.mxu1  ;;  %4623 = vmatmul.mubr.f32.gmra.mxu1 %v3570_v41 }
 0x3ee   : > { %v7886_v55 = vadd.f32 %v4319_v20, %v4094_v11  ;;  %4627 = vmatprep.mubr.f32.mxu1 %v7884_v31  ;;  %v4321_v27 = vpop.f32.mrf.mxu0  ;;  %v3617_v11 = vld [vmem:[#allocation2 + $0xf1] sm:$0xff] }
 0x3ef   : > { %4848 = vmatmul.mubr.f32.gmra.mxu0 %v3508_v9  ;;  %v4096_v50 = vpop.f32.mrf.mxu1 }
 0x3f0   : > { %4852 = vmatprep.mubr.f32.mxu0 %v3573_v17  ;;  %v4324_v30 = vpop.f32.mrf.mxu0  ;;  %v3618_v50 = vld [vmem:[#allocation2 + $0x109] sm:$0xff] }
 0x3f1   : > { %v4099_v43 = vpop.f32.mrf.mxu1  ;;  %4628 = vmatmul.mubr.f32.gmra.mxu1 %v3571_v48 }
 0x3f2   : > { %v7889_v39 = vadd.f32 %v4324_v30, %v4099_v43  ;;  %5709 = vmatprep.mubr.f32.mxu1 %v3606_v1  ;;  %v4326_v61 = vpop.f32.mrf.mxu0  ;;  %v3619_v1 = vld [vmem:[#allocation2 + $0x111] sm:$0xff] }
 0x3f3   : > { %4853 = vmatmul.mubr.f32.gmra.mxu0 %v3509_v52  ;;  %v4101_v59 = vpop.f32.mrf.mxu1 }
 0x3f4   : > { %v4329_v24 = vpop.f32.mrf.mxu0  ;;  %v3620_v59 = vld [vmem:[#allocation2 + $0x129] sm:$0xff] }
 0x3f5   : > { %v4104_v33 = vpop.f32.mrf.mxu1  ;;  %5710 = vmatmul.mubr.f32.vlgmr.msra.gmra.mxu1 %v3607_v49 }
 0x3f6   : > { %v7891_v6 = vadd.f32 %v4329_v24, %v4104_v33  ;;  %5712 = vmatprep.mubr.f32.mxu1 %v3608_v8  ;;  %v4331_v62 = vpop.f32.mrf.mxu0  ;;  %v3621_v8 = vld [vmem:[#allocation2 + $0x131] sm:$0xff] }
 0x3f7   : > { %v4106_v22 = vpop.f32.mrf.mxu1 }
 0x3f8   : > { %v4334_v25 = vpop.f32.mrf.mxu0 }
 0x3f9   : > { %v4109_v54 = vpop.f32.mrf.mxu1  ;;  %5713 = vmatmul.mubr.f32.gmra.mxu1 %v3609_v7  ;;  %v3622_v7 = vld [vmem:[#allocation2 + $0x149] sm:$0xff] }
 0x3fa   : > { %v7893_v44 = vadd.f32 %v4334_v25, %v4109_v54  ;;  %5715 = vmatprep.mubr.f32.mxu1 %v3610_v4  ;;  %v4336_v3 = vpop.f32.mrf.mxu0 }
 0x3fb   : > { %v4111_v58 = vpop.f32.mrf.mxu1  ;;  %v3623_v3 = vld [vmem:[#allocation2 + $0x151] sm:$0xff] }
 0x3fc   : > { %v4339_v60 = vpop.f32.mrf.mxu0 }
 0x3fd   : > { %v4114_v13 = vpop.f32.mrf.mxu1  ;;  %5716 = vmatmul.mubr.f32.gmra.mxu1 %v3611_v21 }
 0x3fe   : > { %v7895_v18 = vadd.f32 %v4339_v60, %v4114_v13  ;;  %5718 = vmatprep.mubr.f32.mxu1 %v3612_v38  ;;  %v4341_v34 = vpop.f32.mrf.mxu0  ;;  %v3624_v60 = vld [vmem:[#allocation2 + $0x169] sm:$0xff] }
 0x3ff   : > { %v4116_v41 = vpop.f32.mrf.mxu1 }
 0x400   : > { %v4344_v36 = vpop.f32.mrf.mxu0  ;;  %v3625_v41 = vld [vmem:[#allocation2 + $0x171] sm:$0xff] }
 0x401   : > { %v4119_v0 = vpop.f32.mrf.mxu1  ;;  %5719 = vmatmul.mubr.f32.gmra.mxu1 %v3613_v57 }
 0x402   : > { %v7897_v26 = vadd.f32 %v4344_v36, %v4119_v0  ;;  %5721 = vmatprep.mubr.f32.mxu1 %v3614_v12  ;;  %v4346_v14 = vpop.f32.mrf.mxu0  ;;  %v3626_v0 = vld [vmem:[#allocation2 + $0x189] sm:$0xff] }
 0x403   : > { %v4121_v48 = vpop.f32.mrf.mxu1 }
 0x404   : > { %v4349_v42 = vpop.f32.mrf.mxu0 }
 0x405   : > { %v4124_v23 = vpop.f32.mrf.mxu1  ;;  %5722 = vmatmul.mubr.f32.gmra.mxu1 %v3615_v56  ;;  %v3627_v56 = vld [vmem:[#allocation2 + $0x191] sm:$0xff] }
 0x406   : > { %v7899_v19 = vadd.f32 %v4349_v42, %v4124_v23  ;;  %5724 = vmatprep.mubr.f32.mxu1 %v3616_v37  ;;  %v4351_v15 = vpop.f32.mrf.mxu0  ;;  %v3628_v37 = vld [vmem:[#allocation2 + $0x1a9] sm:$0xff] }
 0x407   : > { %v4126_v20 = vpop.f32.mrf.mxu1 }
 0x408   : > { %v4354_v9 = vpop.f32.mrf.mxu0 }
 0x409   : > { %v4129_v27 = vpop.f32.mrf.mxu1  ;;  %5725 = vmatmul.mubr.f32.gmra.mxu1 %v3617_v11 }
 0x40a   : > { %v7901_v17 = vadd.f32 %v4354_v9, %v4129_v27  ;;  %5727 = vmatprep.mubr.f32.mxu1 %v3618_v50  ;;  %v4356_v30 = vpop.f32.mrf.mxu0  ;;  %v3629_v9 = vld [vmem:[#allocation2 + $0x1b1] sm:$0xff] }
 0x40b   : > { %v4131_v43 = vpop.f32.mrf.mxu1  ;;  %v3630_v30 = vld [vmem:[#allocation2 + $0x1c9] sm:$0xff] }
 0x40c   : > { %v4359_v52 = vpop.f32.mrf.mxu0 }
 0x40d   : > { %v4134_v61 = vpop.f32.mrf.mxu1  ;;  %5728 = vmatmul.mubr.f32.gmra.mxu1 %v3619_v1 }
 0x40e   : > { %v7903_v49 = vadd.f32 %v4359_v52, %v4134_v61  ;;  %5730 = vmatprep.mubr.f32.mxu1 %v3620_v59  ;;  %v4361_v24 = vpop.f32.mrf.mxu0  ;;  %v3631_v61 = vld [vmem:[#allocation2 + $0x1d1] sm:$0xff] }
 0x40f   : > { %v4136_v33 = vpop.f32.mrf.mxu1  ;;  %v3632_v24 = vld [vmem:[#allocation2 + $0x1e9] sm:$0xff] }
 0x410   : > { %v4364_v62 = vpop.f32.mrf.mxu0 }
 0x411   : > { %v4139_v22 = vpop.f32.mrf.mxu1  ;;  %5731 = vmatmul.mubr.f32.gmra.mxu1 %v3621_v8 }
 0x412   : > { %v7905_v25 = vadd.f32 %v4364_v62, %v4139_v22  ;;  %5733 = vmatprep.mubr.f32.mxu1 %v3622_v7  ;;  %v4366_v54 = vpop.f32.mrf.mxu0  ;;  %v3633_v7 = vld [vmem:[#allocation2 + $0x1f1] sm:$0xff] }
 0x413   : > { %v4141_v4 = vpop.f32.mrf.mxu1 }
 0x414   : > { %v4369_v58 = vpop.f32.mrf.mxu0 }
 0x415   : > { %v4144_v21 = vpop.f32.mrf.mxu1  ;;  %5734 = vmatmul.mubr.f32.gmra.mxu1 %v3623_v3 }
 0x416   : > { %v7907_v13 = vadd.f32 %v4369_v58, %v4144_v21  ;;  %5736 = vmatprep.mubr.f32.mxu1 %v3624_v60  ;;  %v4371_v38 = vpop.f32.mrf.mxu0 }
 0x417   : > { %v4146_v34 = vpop.f32.mrf.mxu1  ;;  %v3636_v38 = vld [vmem:[#allocation2 + $0x229] sm:$0xff] }
 0x418   : > { %v4374_v57 = vpop.f32.mrf.mxu0 }
 0x419   : > { %v4149_v36 = vpop.f32.mrf.mxu1  ;;  %5737 = vmatmul.mubr.f32.gmra.mxu1 %v3625_v41 }
 0x41a   : > { %v7909_v12 = vadd.f32 %v4374_v57, %v4149_v36  ;;  %5739 = vmatprep.mubr.f32.mxu1 %v3626_v0  ;;  %v4376_v14 = vpop.f32.mrf.mxu0  ;;  %v3637_v36 = vld [vmem:[#allocation2 + $0x231] sm:$0xff] }
 0x41b   : > { %v4151_v48 = vpop.f32.mrf.mxu1 }
 0x41c   : > { %v4379_v42 = vpop.f32.mrf.mxu0 }
 0x41d   : > { %v4154_v23 = vpop.f32.mrf.mxu1  ;;  %5740 = vmatmul.mubr.f32.gmra.mxu1 %v3627_v56 }
 0x41e   : > { %v7911_v15 = vadd.f32 %v4379_v42, %v4154_v23  ;;  %5742 = vmatprep.mubr.f32.mxu1 %v3628_v37  ;;  %v4381_v20 = vpop.f32.mrf.mxu0 }
 0x41f   : > { %v4156_v11 = vpop.f32.mrf.mxu1 }
 0x421   : > { %v4159_v27 = vpop.f32.mrf.mxu1  ;;  %5743 = vmatmul.mubr.f32.gmra.mxu1 %v3629_v9  ;;  %v4384_v50 = vpop.f32.mrf.mxu0 }
 0x422   : > { %v7913_v43 = vadd.f32 %v4384_v50, %v4159_v27  ;;  %5745 = vmatprep.mubr.f32.mxu1 %v3630_v30 }
 0x423   : > { %v4161_v1 = vpop.f32.mrf.mxu1  ;;  %v4386_v52 = vpop.f32.mrf.mxu0 }
 0x425   : > { %v4164_v59 = vpop.f32.mrf.mxu1  ;;  %5746 = vmatmul.mubr.f32.gmra.mxu1 %v3631_v61 }
 0x426   : > { %v4389_v33 = vpop.f32.mrf.mxu0  ;;  %5748 = vmatprep.mubr.f32.mxu1 %v3632_v24 }
 0x427   : > { %v7915_v8 = vadd.f32 %v4389_v33, %v4164_v59  ;;  %v4166_v62 = vpop.f32.mrf.mxu1 }
 0x428   : > { %v4391_v22 = vpop.f32.mrf.mxu0 }
 0x429   : > { %v4169_v54 = vpop.f32.mrf.mxu1  ;;  %5749 = vmatmul.mubr.f32.gmra.mxu1 %v3633_v7 }
 0x42a   : > { %5751 = vmatprep.mubr.f32.mxu1 %v7878_v5 }
 0x42b   : > { %v4394_v4 = vpop.f32.mrf.mxu0  ;;  %v4171_v3 = vpop.f32.mrf.mxu1 }
 0x42c   : > { %v7918_v58 = vadd.f32 %v4394_v4, %v4169_v54 }
 0x42d   : > { %v4396_v21 = vpop.f32.mrf.mxu0  ;;  %v4174_v60 = vpop.f32.mrf.mxu1  ;;  %5752 = vmatmul.mubr.f32.gmra.mxu1 %v7884_v31 }
 0x42e   : > { %5754 = vmatprep.mubr.f32.mxu1 %v3636_v38 }
 0x42f   : > { %v4399_v34 = vpop.f32.mrf.mxu0  ;;  %v4176_v41 = vpop.f32.mrf.mxu1 }
 0x430   : > { %v7921_v57 = vadd.f32 %v4399_v34, %v4174_v60 }
 0x431   : > { %v4401_v0 = vpop.f32.mrf.mxu0  ;;  %v4179_v14 = vpop.f32.mrf.mxu1  ;;  %5755 = vmatmul.mubr.f32.gmra.mxu1 %v3637_v36 }
 0x433   : > { %v4404_v48 = vpop.f32.mrf.mxu0  ;;  %v4181_v5 = vpop.f32.mrf.mxu1 }
 0x434   : > { %v7923_v56 = vadd.f32 %v4404_v48, %v4179_v14 }
 0x435   : > { %v4406_v42 = vpop.f32.mrf.mxu0  ;;  %v4474_v23 = vpop.f32.mrf.mxu1 }
 0x436   : > { %v4475_v37 = vadd.f32 %v4474_v23, %v7812_v53 }
 0x437   : > { %v4699_v20 = vpop.f32.mrf.mxu0  ;;  %v4476_v31 = vpop.f32.mrf.mxu1 }
 0x438   : > { %v7926_v11 = vadd.f32 %v4699_v20, %v4475_v37 }
 0x439   : > { %v4701_v9 = vpop.f32.mrf.mxu0  ;;  %v4479_v27 = vpop.f32.mrf.mxu1 }
 0x43a   : > { %v4480_v50 = vadd.f32 %v4479_v27, %v7816_v47 }
 0x43b   : > { %v4704_v30 = vpop.f32.mrf.mxu0  ;;  %v4481_v1 = vpop.f32.mrf.mxu1 }
 0x43c   : > { %v7929_v52 = vadd.f32 %v4704_v30, %v4480_v50 }
 0x43d   : > { %v4706_v61 = vpop.f32.mrf.mxu0  ;;  %v4484_v59 = vpop.f32.mrf.mxu1 }
 0x43e   : > { %v4485_v24 = vadd.f32 %v4484_v59, %v7820_v46 }
 0x43f   : > { %v4709_v33 = vpop.f32.mrf.mxu0  ;;  %v4486_v62 = vpop.f32.mrf.mxu1 }
 0x440   : > { %v7932_v22 = vadd.f32 %v4709_v33, %v4485_v24 }
 0x441   : > { %v4711_v53 = vpop.f32.mrf.mxu0  ;;  %v4489_v7 = vpop.f32.mrf.mxu1 }
 0x442   : > { %v4490_v54 = vadd.f32 %v4489_v7, %v7824_v40 }
 0x443   : > { %v4714_v4 = vpop.f32.mrf.mxu0  ;;  %v4491_v3 = vpop.f32.mrf.mxu1 }
 0x444   : > { %v7935_v21 = vadd.f32 %v4714_v4, %v4490_v54 }
 0x445   : > { %v4716_v47 = vpop.f32.mrf.mxu0  ;;  %v4494_v60 = vpop.f32.mrf.mxu1 }
 0x446   : > { %v4495_v38 = vadd.f32 %v4494_v60, %v7828_v35 }
 0x447   : > { %v4719_v34 = vpop.f32.mrf.mxu0  ;;  %v4496_v41 = vpop.f32.mrf.mxu1 }
 0x448   : > { %v7938_v36 = vadd.f32 %v4719_v34, %v4495_v38 }
 0x449   : > { %v4721_v46 = vpop.f32.mrf.mxu0  ;;  %v4499_v0 = vpop.f32.mrf.mxu1 }
 0x44a   : > { %v4500_v14 = vadd.f32 %v4499_v0, %v7833_v10 }
 0x44b   : > { %v4724_v48 = vpop.f32.mrf.mxu0  ;;  %v4501_v5 = vpop.f32.mrf.mxu1 }
 0x44c   : > { %v7941_v42 = vadd.f32 %v4724_v48, %v4500_v14 }
 0x44d   : > { %v4726_v40 = vpop.f32.mrf.mxu0  ;;  %v4504_v23 = vpop.f32.mrf.mxu1 }
 0x44e   : > { %v4505_v37 = vadd.f32 %v4504_v23, %v7838_v28 }
 0x44f   : > { %v4729_v20 = vpop.f32.mrf.mxu0  ;;  %v4506_v31 = vpop.f32.mrf.mxu1 }
 0x450   : > { %v7944_v9 = vadd.f32 %v4729_v20, %v4505_v37 }
 0x451   : > { %v4731_v35 = vpop.f32.mrf.mxu0  ;;  %v4509_v27 = vpop.f32.mrf.mxu1 }
 0x452   : > { %v4510_v50 = vadd.f32 %v4509_v27, %v7844_v45 }
 0x453   : > { %v4734_v30 = vpop.f32.mrf.mxu0  ;;  %v4511_v1 = vpop.f32.mrf.mxu1 }
 0x454   : > { %v7947_v61 = vadd.f32 %v4734_v30, %v4510_v50 }
 0x455   : > { %v4736_v10 = vpop.f32.mrf.mxu0  ;;  %v4514_v59 = vpop.f32.mrf.mxu1 }
 0x456   : > { %v4515_v24 = vadd.f32 %v4514_v59, %v7850_v29 }
 0x457   : > { %v4739_v33 = vpop.f32.mrf.mxu0  ;;  %v4516_v62 = vpop.f32.mrf.mxu1 }
 0x458   : > { %v7950_v53 = vadd.f32 %v4739_v33, %v4515_v24 }
 0x459   : > { %v4741_v28 = vpop.f32.mrf.mxu0  ;;  %v4519_v7 = vpop.f32.mrf.mxu1 }
 0x45a   : > { %v4520_v54 = vadd.f32 %v4519_v7, %v7856_v2 }
 0x45b   : > { %v4744_v4 = vpop.f32.mrf.mxu0  ;;  %v4521_v3 = vpop.f32.mrf.mxu1 }
 0x45c   : > { %v7953_v47 = vadd.f32 %v4744_v4, %v4520_v54 }
 0x45d   : > { %v4746_v45 = vpop.f32.mrf.mxu0  ;;  %v4524_v60 = vpop.f32.mrf.mxu1 }
 0x45e   : > { %v4525_v38 = vadd.f32 %v4524_v60, %v7862_v16 }
 0x45f   : > { %v4749_v34 = vpop.f32.mrf.mxu0  ;;  %v4526_v41 = vpop.f32.mrf.mxu1 }
 0x460   : > { %v7956_v46 = vadd.f32 %v4749_v34, %v4525_v38 }
 0x461   : > { %v4751_v29 = vpop.f32.mrf.mxu0  ;;  %v4529_v0 = vpop.f32.mrf.mxu1 }
 0x462   : > { %v4530_v14 = vadd.f32 %v4529_v0, %v7868_v63 }
 0x463   : > { %v4754_v48 = vpop.f32.mrf.mxu0  ;;  %v4531_v5 = vpop.f32.mrf.mxu1 }
 0x464   : > { %v7959_v40 = vadd.f32 %v4754_v48, %v4530_v14 }
 0x465   : > { %v4756_v2 = vpop.f32.mrf.mxu0  ;;  %v4534_v23 = vpop.f32.mrf.mxu1 }
 0x466   : > { %v4535_v37 = vadd.f32 %v4534_v23, %v7873_v51 }
 0x467   : > { %v4759_v20 = vpop.f32.mrf.mxu0  ;;  %v4536_v31 = vpop.f32.mrf.mxu1 }
 0x468   : > { %v7962_v35 = vadd.f32 %v4759_v20, %v4535_v37 }
 0x469   : > { %v4761_v16 = vpop.f32.mrf.mxu0  ;;  %v4539_v27 = vpop.f32.mrf.mxu1 }
 0x46a   : > { %v4540_v50 = vadd.f32 %v4539_v27, %v7880_v32 }
 0x46b   : > { %v4764_v30 = vpop.f32.mrf.mxu0  ;;  %v4541_v1 = vpop.f32.mrf.mxu1 }
 0x46c   : > { %v7965_v10 = vadd.f32 %v4764_v30, %v4540_v50 }
 0x46d   : > { %v4766_v63 = vpop.f32.mrf.mxu0  ;;  %v4544_v59 = vpop.f32.mrf.mxu1 }
 0x46e   : > { %v4545_v24 = vadd.f32 %v4544_v59, %v7886_v55 }
 0x46f   : > { %v4769_v33 = vpop.f32.mrf.mxu0  ;;  %v4546_v62 = vpop.f32.mrf.mxu1 }
 0x470   : > { %v7968_v28 = vadd.f32 %v4769_v33, %v4545_v24 }
 0x471   : > { %v4771_v51 = vpop.f32.mrf.mxu0  ;;  %v4549_v7 = vpop.f32.mrf.mxu1 }
 0x472   : > { %v4550_v54 = vadd.f32 %v4549_v7, %v7889_v39 }
 0x473   : > { %v4774_v4 = vpop.f32.mrf.mxu0  ;;  %v4551_v3 = vpop.f32.mrf.mxu1 }
 0x474   : > { %v7971_v45 = vadd.f32 %v4774_v4, %v4550_v54 }
 0x475   : > { %v4776_v32 = vpop.f32.mrf.mxu0  ;;  %v4554_v60 = vpop.f32.mrf.mxu1 }
 0x476   : > { %v4555_v38 = vadd.f32 %v4554_v60, %v7891_v6 }
 0x477   : > { %v4779_v34 = vpop.f32.mrf.mxu0  ;;  %v4556_v41 = vpop.f32.mrf.mxu1 }
 0x478   : > { %v7974_v29 = vadd.f32 %v4779_v34, %v4555_v38 }
 0x479   : > { %v4781_v55 = vpop.f32.mrf.mxu0  ;;  %v4559_v0 = vpop.f32.mrf.mxu1 }
 0x47a   : > { %v4560_v14 = vadd.f32 %v4559_v0, %v7893_v44 }
 0x47b   : > { %v4784_v48 = vpop.f32.mrf.mxu0  ;;  %v4561_v5 = vpop.f32.mrf.mxu1 }
 0x47c   : > { %v7977_v2 = vadd.f32 %v4784_v48, %v4560_v14 }
 0x47d   : > { %v4786_v39 = vpop.f32.mrf.mxu0  ;;  %v4564_v23 = vpop.f32.mrf.mxu1 }
 0x47e   : > { %v4565_v37 = vadd.f32 %v4564_v23, %v7895_v18 }
 0x47f   : > { %v4789_v20 = vpop.f32.mrf.mxu0  ;;  %v4566_v31 = vpop.f32.mrf.mxu1 }
 0x480   : > { %v7980_v16 = vadd.f32 %v4789_v20, %v4565_v37 }
 0x481   : > { %v4791_v6 = vpop.f32.mrf.mxu0  ;;  %v4569_v27 = vpop.f32.mrf.mxu1 }
 0x482   : > { %v4570_v50 = vadd.f32 %v4569_v27, %v7897_v26 }
 0x483   : > { %v4794_v30 = vpop.f32.mrf.mxu0  ;;  %v4571_v1 = vpop.f32.mrf.mxu1 }
 0x484   : > { %v7983_v63 = vadd.f32 %v4794_v30, %v4570_v50 }
 0x485   : > { %v4796_v44 = vpop.f32.mrf.mxu0  ;;  %v4574_v59 = vpop.f32.mrf.mxu1 }
 0x486   : > { %v4575_v24 = vadd.f32 %v4574_v59, %v7899_v19 }
 0x487   : > { %v4799_v33 = vpop.f32.mrf.mxu0  ;;  %v4576_v62 = vpop.f32.mrf.mxu1 }
 0x488   : > { %v7986_v51 = vadd.f32 %v4799_v33, %v4575_v24 }
 0x489   : > { %v4801_v18 = vpop.f32.mrf.mxu0  ;;  %v4579_v7 = vpop.f32.mrf.mxu1 }
 0x48a   : > { %v4580_v54 = vadd.f32 %v4579_v7, %v7901_v17 }
 0x48b   : > { %v4804_v4 = vpop.f32.mrf.mxu0  ;;  %v4581_v3 = vpop.f32.mrf.mxu1 }
 0x48c   : > { %v7989_v32 = vadd.f32 %v4804_v4, %v4580_v54 }
 0x48d   : > { %v4806_v26 = vpop.f32.mrf.mxu0  ;;  %v4584_v60 = vpop.f32.mrf.mxu1 }
 0x48e   : > { %v4585_v38 = vadd.f32 %v4584_v60, %v7903_v49 }
 0x48f   : > { %v4809_v34 = vpop.f32.mrf.mxu0  ;;  %v4586_v41 = vpop.f32.mrf.mxu1 }
 0x490   : > { %v7992_v55 = vadd.f32 %v4809_v34, %v4585_v38 }
 0x491   : > { %v4811_v19 = vpop.f32.mrf.mxu0  ;;  %v4589_v0 = vpop.f32.mrf.mxu1 }
 0x492   : > { %v4590_v14 = vadd.f32 %v4589_v0, %v7905_v25 }
 0x493   : > { %v4814_v48 = vpop.f32.mrf.mxu0  ;;  %v4591_v5 = vpop.f32.mrf.mxu1 }
 0x494   : > { %v7995_v39 = vadd.f32 %v4814_v48, %v4590_v14 }
 0x495   : > { %v4816_v17 = vpop.f32.mrf.mxu0  ;;  %v4594_v23 = vpop.f32.mrf.mxu1 }
 0x496   : > { %v4595_v37 = vadd.f32 %v4594_v23, %v7907_v13 }
 0x497   : > { %v4819_v20 = vpop.f32.mrf.mxu0  ;;  %v4596_v31 = vpop.f32.mrf.mxu1 }
 0x498   : > { %v7998_v6 = vadd.f32 %v4819_v20, %v4595_v37 }
 0x499   : > { %v4821_v49 = vpop.f32.mrf.mxu0  ;;  %v4599_v27 = vpop.f32.mrf.mxu1 }
 0x49a   : > { %v4600_v50 = vadd.f32 %v4599_v27, %v7909_v12 }
 0x49b   : > { %v4824_v30 = vpop.f32.mrf.mxu0  ;;  %v4601_v1 = vpop.f32.mrf.mxu1 }
 0x49c   : > { %v8001_v44 = vadd.f32 %v4824_v30, %v4600_v50 }
 0x49d   : > { %v4826_v25 = vpop.f32.mrf.mxu0  ;;  %v4604_v59 = vpop.f32.mrf.mxu1 }
 0x49e   : > { %v4605_v24 = vadd.f32 %v4604_v59, %v7911_v15 }
 0x49f   : > { %v4829_v33 = vpop.f32.mrf.mxu0  ;;  %v4606_v62 = vpop.f32.mrf.mxu1 }
 0x4a0   : > { %v8004_v18 = vadd.f32 %v4829_v33, %v4605_v24 }
 0x4a1   : > { %v4831_v13 = vpop.f32.mrf.mxu0  ;;  %v4609_v7 = vpop.f32.mrf.mxu1 }
 0x4a2   : > { %v4610_v54 = vadd.f32 %v4609_v7, %v7913_v43 }
 0x4a3   : > { %v4834_v4 = vpop.f32.mrf.mxu0  ;;  %v4611_v3 = vpop.f32.mrf.mxu1 }
 0x4a4   : > { %v8007_v26 = vadd.f32 %v4834_v4, %v4610_v54 }
 0x4a5   : > { %v4836_v12 = vpop.f32.mrf.mxu0  ;;  %v4614_v60 = vpop.f32.mrf.mxu1 }
 0x4a6   : > { %v4615_v38 = vadd.f32 %v4614_v60, %v7915_v8 }
 0x4a7   : > { %v4839_v34 = vpop.f32.mrf.mxu0  ;;  %v4616_v41 = vpop.f32.mrf.mxu1 }
 0x4a8   : > { %v8010_v19 = vadd.f32 %v4839_v34, %v4615_v38 }
 0x4a9   : > { %v4841_v15 = vpop.f32.mrf.mxu0  ;;  %v4619_v0 = vpop.f32.mrf.mxu1 }
 0x4aa   : > { %v4620_v14 = vadd.f32 %v4619_v0, %v7918_v58 }
 0x4ab   : > { %v4844_v48 = vpop.f32.mrf.mxu0  ;;  %v4621_v5 = vpop.f32.mrf.mxu1 }
 0x4ac   : > { %v8013_v17 = vadd.f32 %v4844_v48, %v4620_v14 }
 0x4ad   : > { %v4846_v43 = vpop.f32.mrf.mxu0  ;;  %v4624_v23 = vpop.f32.mrf.mxu1 }
 0x4ae   : > { %v4625_v37 = vadd.f32 %v4624_v23, %v7921_v57 }
 0x4af   : > { %v4849_v20 = vpop.f32.mrf.mxu0  ;;  %v4626_v31 = vpop.f32.mrf.mxu1 }
 0x4b0   : > { %v8016_v49 = vadd.f32 %v4849_v20, %v4625_v37 }
 0x4b1   : > { %v4851_v8 = vpop.f32.mrf.mxu0  ;;  %v4629_v27 = vpop.f32.mrf.mxu1 }
 0x4b2   : > { %v4630_v50 = vadd.f32 %v4629_v27, %v7923_v56 }
 0x4b3   : > { %v4854_v30 = vpop.f32.mrf.mxu0  ;;  %v4631_v1 = vpop.f32.mrf.mxu1 }
 0x4b4   : > { %v8019_v25 = vadd.f32 %v4854_v30, %v4630_v50 }
 0x4b5   : > { %v4856_v58 = vpop.f32.mrf.mxu0  ;;  %v5711_v59 = vpop.f32.mrf.mxu1 }
 0x4b6   : > { %v8022_v33 = vadd.f32 %v5711_v59, %v7929_v52 }
 0x4b7   : > { %v4924_v24 = vpop.f32.mrf.mxu1 }
 0x4b8   : > { %v8025_v57 = vadd.f32 %v4924_v24, %v7926_v11  ;;  %v5123_v56 = vmul.f32 %v8022_v33, %v8022_v33 }
 0x4b9   : > { %v5714_v62 = vpop.f32.mrf.mxu1 }
 0x4ba   : > { %v5122_v13 = vmul.f32 %v8025_v57, %v8025_v57  ;;  %v5084_v54 = vadd.f32 %v8022_v33, %v8025_v57  ;;  %v8034_v4 = vadd.f32 %v5714_v62, %v7935_v21 }
 0x4bb   : > { %v4934_v7 = vpop.f32.mrf.mxu1 }
 0x4bc   : > { %v8037_v52 = vadd.f32 %v4934_v7, %v7932_v22  ;;  %v5154_v11 = vadd.f32 %v5123_v56, %v5122_v13  ;;  %v5125_v41 = vmul.f32 %v8034_v4, %v8034_v4 }
 0x4bd   : > { %v5717_v3 = vpop.f32.mrf.mxu1 }
 0x4be   : > { %v5085_v12 = vadd.f32 %v5084_v54, %v8037_v52  ;;  %v5124_v60 = vmul.f32 %v8037_v52, %v8037_v52  ;;  %v8043_v38 = vadd.f32 %v5717_v3, %v7941_v42 }
 0x4bf   : > { %v4944_v34 = vpop.f32.mrf.mxu1 }
 0x4c0   : > { %v5155_v15 = vadd.f32 %v5154_v11, %v5124_v60  ;;  %v8048_v21 = vadd.f32 %v4944_v34, %v7938_v36  ;;  %v5086_v22 = vadd.f32 %v5085_v12, %v8034_v4  ;;  %v5127_v42 = vmul.f32 %v8043_v38, %v8043_v38 }
 0x4c1   : > { %v5720_v0 = vpop.f32.mrf.mxu1 }
 0x4c2   : > { %v5087_v14 = vadd.f32 %v5086_v22, %v8048_v21  ;;  %v5126_v48 = vmul.f32 %v8048_v21, %v8048_v21  ;;  %v5156_v5 = vadd.f32 %v5155_v15, %v5125_v41  ;;  %v8057_v37 = vadd.f32 %v5720_v0, %v7947_v61 }
 0x4c3   : > { %v4954_v43 = vpop.f32.mrf.mxu1 }
 0x4c4   : > { %v5157_v23 = vadd.f32 %v5156_v5, %v5126_v48  ;;  %v8060_v36 = vadd.f32 %v4954_v43, %v7944_v9  ;;  %v5088_v20 = vadd.f32 %v5087_v14, %v8043_v38  ;;  %v5129_v61 = vmul.f32 %v8057_v37, %v8057_v37 }
 0x4c5   : > { %v5723_v31 = vpop.f32.mrf.mxu1 }
 0x4c6   : > { %v5089_v8 = vadd.f32 %v5088_v20, %v8060_v36  ;;  %v5128_v27 = vmul.f32 %v8060_v36, %v8060_v36  ;;  %v5158_v50 = vadd.f32 %v5157_v23, %v5127_v42  ;;  %v8067_v30 = vadd.f32 %v5723_v31, %v7953_v47 }
 0x4c7   : > { %v4964_v1 = vpop.f32.mrf.mxu1 }
 0x4c8   : > { %v5159_v58 = vadd.f32 %v5158_v50, %v5128_v27  ;;  %v8072_v9 = vadd.f32 %v4964_v1, %v7950_v53  ;;  %v5090_v59 = vadd.f32 %v5089_v8, %v8057_v37  ;;  %v5131_v47 = vmul.f32 %v8067_v30, %v8067_v30 }
 0x4c9   : > { %v5726_v24 = vpop.f32.mrf.mxu1 }
 0x4ca   : > { %v5091_v62 = vadd.f32 %v5090_v59, %v8072_v9  ;;  %v5130_v13 = vmul.f32 %v8072_v9, %v8072_v9  ;;  %v5160_v7 = vadd.f32 %v5159_v58, %v5129_v61  ;;  %v8081_v3 = vadd.f32 %v5726_v24, %v7959_v40 }
 0x4cb   : > { %v4974_v56 = vpop.f32.mrf.mxu1 }
 0x4cc   : > { %v5161_v54 = vadd.f32 %v5160_v7, %v5130_v13  ;;  %v8084_v53 = vadd.f32 %v4974_v56, %v7956_v46  ;;  %v5092_v11 = vadd.f32 %v5091_v62, %v8067_v30  ;;  %v5133_v40 = vmul.f32 %v8081_v3, %v8081_v3 }
 0x4cd   : > { %v5729_v12 = vpop.f32.mrf.mxu1 }
 0x4ce   : > { %v5093_v60 = vadd.f32 %v5092_v11, %v8084_v53  ;;  %v5132_v34 = vmul.f32 %v8084_v53, %v8084_v53  ;;  %v5162_v41 = vadd.f32 %v5161_v54, %v5131_v47  ;;  %v8091_v15 = vadd.f32 %v5729_v12, %v7965_v10 }
 0x4cf   : > { %v4984_v22 = vpop.f32.mrf.mxu1 }
 0x4d0   : > { %v5163_v0 = vadd.f32 %v5162_v41, %v5132_v34  ;;  %v8096_v46 = vadd.f32 %v4984_v22, %v7962_v35  ;;  %v5094_v14 = vadd.f32 %v5093_v60, %v8081_v3  ;;  %v5135_v10 = vmul.f32 %v8091_v15, %v8091_v15 }
 0x4d1   : > { %v5732_v48 = vpop.f32.mrf.mxu1 }
 0x4d2   : > { %v5095_v5 = vadd.f32 %v5094_v14, %v8096_v46  ;;  %v5134_v42 = vmul.f32 %v8096_v46, %v8096_v46  ;;  %v5164_v43 = vadd.f32 %v5163_v0, %v5133_v40  ;;  %v8105_v31 = vadd.f32 %v5732_v48, %v7971_v45 }
 0x4d3   : > { %v4994_v23 = vpop.f32.mrf.mxu1 }
 0x4d4   : > { %v5165_v20 = vadd.f32 %v5164_v43, %v5134_v42  ;;  %v8108_v35 = vadd.f32 %v4994_v23, %v7968_v28  ;;  %v5096_v8 = vadd.f32 %v5095_v5, %v8091_v15  ;;  %v5137_v45 = vmul.f32 %v8105_v31, %v8105_v31 }
 0x4d5   : > { %v5735_v27 = vpop.f32.mrf.mxu1 }
 0x4d6   : > { %v5097_v50 = vadd.f32 %v5096_v8, %v8108_v35  ;;  %v5136_v1 = vmul.f32 %v8108_v35, %v8108_v35  ;;  %v5166_v61 = vadd.f32 %v5165_v20, %v5135_v10  ;;  %v8115_v58 = vadd.f32 %v5735_v27, %v7977_v2 }
 0x4d7   : > { %v5004_v59 = vpop.f32.mrf.mxu1 }
 0x4d8   : > { %v5167_v24 = vadd.f32 %v5166_v61, %v5136_v1  ;;  %v8120_v28 = vadd.f32 %v5004_v59, %v7974_v29  ;;  %v5098_v62 = vadd.f32 %v5097_v50, %v8105_v31  ;;  %v5139_v2 = vmul.f32 %v8115_v58, %v8115_v58 }
 0x4d9   : > { %v5738_v13 = vpop.f32.mrf.mxu1 }
 0x4da   : > { %v5099_v7 = vadd.f32 %v5098_v62, %v8120_v28  ;;  %v5138_v47 = vmul.f32 %v8120_v28, %v8120_v28  ;;  %v5168_v56 = vadd.f32 %v5167_v24, %v5137_v45  ;;  %v8129_v12 = vadd.f32 %v5738_v13, %v7983_v63 }
 0x4db   : > { %v5014_v54 = vpop.f32.mrf.mxu1 }
 0x4dc   : > { %v5169_v11 = vadd.f32 %v5168_v56, %v5138_v47  ;;  %v8132_v29 = vadd.f32 %v5014_v54, %v7980_v16  ;;  %v5100_v60 = vadd.f32 %v5099_v7, %v8115_v58  ;;  %v5141_v63 = vmul.f32 %v8129_v12, %v8129_v12 }
 0x4dd   : > { %v5741_v34 = vpop.f32.mrf.mxu1 }
 0x4de   : > { %v5101_v41 = vadd.f32 %v5100_v60, %v8132_v29  ;;  %v5140_v22 = vmul.f32 %v8132_v29, %v8132_v29  ;;  %v5170_v40 = vadd.f32 %v5169_v11, %v5139_v2  ;;  %v8139_v0 = vadd.f32 %v5741_v34, %v7989_v32 }
 0x4df   : > { %v5024_v14 = vpop.f32.mrf.mxu1 }
 0x4e0   : > { %v5171_v48 = vadd.f32 %v5170_v40, %v5140_v22  ;;  %v8144_v16 = vadd.f32 %v5024_v14, %v7986_v51  ;;  %v5102_v5 = vadd.f32 %v5101_v41, %v8129_v12  ;;  %v5143_v32 = vmul.f32 %v8139_v0, %v8139_v0 }
 0x4e1   : > { %v5744_v42 = vpop.f32.mrf.mxu1 }
 0x4e2   : > { %v5103_v43 = vadd.f32 %v5102_v5, %v8144_v16  ;;  %v5142_v10 = vmul.f32 %v8144_v16, %v8144_v16  ;;  %v5172_v23 = vadd.f32 %v5171_v48, %v5141_v63  ;;  %v8153_v27 = vadd.f32 %v5744_v42, %v7995_v39 }
 0x4e3   : > { %v5034_v20 = vpop.f32.mrf.mxu1 }
 0x4e4   : > { %v5173_v8 = vadd.f32 %v5172_v23, %v5142_v10  ;;  %v8156_v51 = vadd.f32 %v5034_v20, %v7992_v55  ;;  %v5104_v50 = vadd.f32 %v5103_v43, %v8139_v0  ;;  %v5145_v39 = vmul.f32 %v8153_v27, %v8153_v27 }
 0x4e5   : > { %v5747_v1 = vpop.f32.mrf.mxu1 }
 0x4e6   : > { %v5105_v61 = vadd.f32 %v5104_v50, %v8156_v51  ;;  %v5144_v59 = vmul.f32 %v8156_v51, %v8156_v51  ;;  %v5174_v45 = vadd.f32 %v5173_v8, %v5143_v32  ;;  %v8163_v24 = vadd.f32 %v5747_v1, %v8001_v44 }
 0x4e7   : > { %v5044_v62 = vpop.f32.mrf.mxu1 }
 0x4e8   : > { %v5175_v13 = vadd.f32 %v5174_v45, %v5144_v59  ;;  %v8168_v55 = vadd.f32 %v5044_v62, %v7998_v6  ;;  %v5106_v7 = vadd.f32 %v5105_v61, %v8153_v27  ;;  %v5147_v44 = vmul.f32 %v8163_v24, %v8163_v24 }
 0x4e9   : > { %v5750_v47 = vpop.f32.mrf.mxu1 }
 0x4ea   : > { %v5107_v56 = vadd.f32 %v5106_v7, %v8168_v55  ;;  %v5146_v2 = vmul.f32 %v8168_v55, %v8168_v55  ;;  %v5176_v54 = vadd.f32 %v5175_v13, %v5145_v39  ;;  %v8177_v34 = vadd.f32 %v5750_v47, %v8007_v26 }
 0x4eb   : > { %v5054_v11 = vpop.f32.mrf.mxu1 }
 0x4ec   : > { %v5177_v60 = vadd.f32 %v5176_v54, %v5146_v2  ;;  %v8180_v6 = vadd.f32 %v5054_v11, %v8004_v18  ;;  %v5108_v41 = vadd.f32 %v5107_v56, %v8163_v24  ;;  %v5149_v26 = vmul.f32 %v8177_v34, %v8177_v34 }
 0x4ed   : > { %v5753_v22 = vpop.f32.mrf.mxu1 }
 0x4ee   : > { %v5109_v40 = vadd.f32 %v5108_v41, %v8180_v6  ;;  %v5148_v14 = vmul.f32 %v8180_v6, %v8180_v6  ;;  %v5178_v63 = vadd.f32 %v5177_v60, %v5147_v44  ;;  %v8187_v48 = vadd.f32 %v5753_v22, %v8013_v17 }
 0x4ef   : > { %v5064_v5 = vpop.f32.mrf.mxu1 }
 0x4f0   : > { %v5179_v42 = vadd.f32 %v5178_v63, %v5148_v14  ;;  %v8192_v18 = vadd.f32 %v5064_v5, %v8010_v19  ;;  %v5110_v43 = vadd.f32 %v5109_v40, %v8177_v34  ;;  %v5151_v17 = vmul.f32 %v8187_v48, %v8187_v48 }
 0x4f1   : > { %v5756_v10 = vpop.f32.mrf.mxu1 }
 0x4f2   : > { %v5111_v23 = vadd.f32 %v5110_v43, %v8192_v18  ;;  %v5150_v32 = vmul.f32 %v8192_v18, %v8192_v18  ;;  %v5180_v20 = vadd.f32 %v5179_v42, %v5149_v26  ;;  %v8201_v1 = vadd.f32 %v5756_v10, %v8019_v25 }
 0x4f3   : > { %v5074_v8 = vpop.f32.mrf.mxu1 }
 0x4f4   : > { %v5181_v50 = vadd.f32 %v5180_v20, %v5150_v32  ;;  %v5075_v19 = vadd.f32 %v5074_v8, %v8016_v49  ;;  %v5112_v61 = vadd.f32 %v5111_v23, %v8187_v48  ;;  %v5153_v39 = vmul.f32 %v8201_v1, %v8201_v1  ;;  %v5083_v23 = vld [vmem:[%s8448_s4] sm:$0x3] }
 0x4f5   : > { %v8524_v8 = vld [vmem:[#allocation14_spill] sm:$0xff] }
 0x4f6   : > { %v5113_v59 = vadd.f32 %v5112_v61, %v5075_v19  ;;  %v5152_v45 = vmul.f32 %v5075_v19, %v5075_v19  ;;  %v5182_v62 = vadd.f32 %v5181_v50, %v5151_v17  ;;  %v8525_v50 = vsub.s32 0, %v8524_v8 }
 0x4f8   : > { %v5114_v13 = vadd.f32 %v5113_v59, %v8201_v1  ;;  %v5183_v7 = vadd.f32 %v5182_v62, %v5152_v45 }
 0x4fa   : > { %v5115_v47 = vrot.slane %v5114_v13, 4  ;;  %v5184_v56 = vadd.f32 %v5183_v7, %v5153_v39 }
 0x4fc   : > { %v5116_v2 = vadd.f32 %v5115_v47, %v5114_v13  ;;  %v5185_v54 = vrot.slane %v5184_v56, 4 }
 0x4fe   : > { %v5117_v44 = vrot.slane %v5116_v2, 2  ;;  %v5186_v25 = vadd.f32 %v5185_v54, %v5184_v56 }
 0x500   : > { %v5118_v11 = vadd.f32 %v5117_v44, %v5116_v2  ;;  %v5187_v60 = vrot.slane %v5186_v25, 2 }
 0x502   : > { %v5119_v49 = vrot.slane %v5118_v11, 1  ;;  %v5188_v41 = vadd.f32 %v5187_v60, %v5186_v25 }
 0x504   : > { %v5120_v22 = vadd.f32 %v5119_v49, %v5118_v11  ;;  %v5189_v40 = vrot.slane %v5188_v41, 1  ;;  %v5305_v11 = vld [vmem:[%s6187_s13 + $0xf0] sm:$0xff] }
 0x506   : > { %v5121_v14 = vmul.f32 0.00390625, %v5120_v22  ;;  %v5190_v63 = vadd.f32 %v5189_v40, %v5188_v41 }
 0x508   : > { %v5191_v5 = vmul.f32 0.00390625, %v5190_v63  ;;  %v5192_v26 = vmul.f32 %v5121_v14, %v5121_v14  ;;  %v5275_v63 = vld [vmem:[%s6187_s13] sm:$0xff] }
 0x50a   : > { %v5193_v42 = vsub.f32 %v5191_v5, %v5192_v26  ;;  %v5278_v5 = vld [vmem:[%s6187_s13 + $0x18] sm:$0xff]  ;;  %v5277_v26 = vld [vmem:[%s6187_s13 + $0x10] sm:$0xff] }
 0x50c   : > { %v5194_v43 = vmax.f32 %v5193_v42, 0.0 }
 0x50e   : > { %v5195_v10 = vadd.f32 1e-05, %v5194_v43 }
 0x510   : > { %5831 = vrsqrt.f32 %v5195_v10 }
 0x51d   : > { %v5832_v32 = vpop.eup %5831 }
 0x51e   : > { %v5197_v20 = vmul.f32 %v5832_v32, %v5083_v23  ;;  %v5280_v32 = vld [vmem:[%s6187_s13 + $0x28] sm:$0xff] }
 0x520   : > { %v5198_v17 = vmul.f32 %v5197_v20, %v5121_v14  ;;  %v5206_v61 = vrot.slane %v5197_v20, %v8525_v50  ;;  %v5276_v14 = vld [vmem:[%s6187_s13 + $0x8] sm:$0xff]  ;;  %v5279_v20 = vld [vmem:[%s6187_s13 + $0x20] sm:$0xff] }
 0x522   : > { %v5200_v59 = vrot.slane %v5198_v17, 7  ;;  %v5237_v45 = vmul.f32 %v5206_v61, %v5075_v19  ;;  %v5207_v62 = vmul.f32 %v5206_v61, %v8025_v57  ;;  %v5208_v39 = vmul.f32 %v5206_v61, %v8022_v33  ;;  %v5282_v17 = vld [vmem:[%s6187_s13 + $0x38] sm:$0xff] }
 0x523   : > { %v5209_v13 = vmul.f32 %v5206_v61, %v8037_v52  ;;  %v5210_v7 = vmul.f32 %v5206_v61, %v8034_v4  ;;  %v5211_v47 = vmul.f32 %v5206_v61, %v8048_v21  ;;  %v5212_v56 = vmul.f32 %v5206_v61, %v8043_v38 }
 0x524   : > { %v5202_v2 = vsub.f32 %v5083_v23, %v5200_v59  ;;  %v5213_v54 = vmul.f32 %v5206_v61, %v8060_v36  ;;  %v5214_v44 = vmul.f32 %v5206_v61, %v8057_v37  ;;  %v5215_v19 = vmul.f32 %v5206_v61, %v8072_v9 }
 0x525   : > { %v5216_v57 = vmul.f32 %v5206_v61, %v8067_v30  ;;  %v5217_v33 = vmul.f32 %v5206_v61, %v8084_v53  ;;  %v5218_v52 = vmul.f32 %v5206_v61, %v8081_v3  ;;  %v5219_v25 = vmul.f32 %v5206_v61, %v8096_v46 }
 0x526   : > { %v8526_v4 = vsub.s32 1, %v8524_v8  ;;  %v5220_v38 = vmul.f32 %v5206_v61, %v8091_v15  ;;  %v5221_v36 = vmul.f32 %v5206_v61, %v8108_v35  ;;  %v5222_v37 = vmul.f32 %v5206_v61, %v8105_v31 }
 0x527   : > { %v5223_v9 = vmul.f32 %v5206_v61, %v8120_v28  ;;  %v5224_v30 = vmul.f32 %v5206_v61, %v8115_v58  ;;  %v5225_v53 = vmul.f32 %v5206_v61, %v8132_v29  ;;  %v5226_v3 = vmul.f32 %v5206_v61, %v8129_v12 }
 0x528   : > { %v8228_v21 = vrot.slane %v5202_v2, %v8526_v4  ;;  %v5227_v60 = vmul.f32 %v5206_v61, %v8144_v16  ;;  %v5228_v15 = vmul.f32 %v5206_v61, %v8139_v0  ;;  %v5229_v35 = vmul.f32 %v5206_v61, %v8156_v51  ;;  %v5286_v2 = vld [vmem:[%s6187_s13 + $0x58] sm:$0xff] }
 0x529   : > { %v5230_v31 = vmul.f32 %v5206_v61, %v8153_v27  ;;  %v5231_v49 = vmul.f32 %v5206_v61, %v8168_v55  ;;  %v5232_v28 = vmul.f32 %v5206_v61, %v8163_v24  ;;  %v5233_v58 = vmul.f32 %v5206_v61, %v8180_v6  ;;  %v5290_v4 = vld [vmem:[%s6187_s13 + $0x78] sm:$0xff] }
 0x52a   : > { %v5273_v46 = vadd.f32 %v8228_v21, %v5237_v45  ;;  %v5234_v12 = vmul.f32 %v5206_v61, %v8177_v34  ;;  %v5235_v41 = vmul.f32 %v5206_v61, %v8192_v18  ;;  %v5236_v16 = vmul.f32 %v5206_v61, %v8187_v48  ;;  %v5281_v45 = vld [vmem:[%s6187_s13 + $0x30] sm:$0xff] }
 0x52b   : > { %v5238_v0 = vmul.f32 %v5206_v61, %v8201_v1  ;;  %v5243_v27 = vadd.f32 %v8228_v21, %v5207_v62  ;;  %v5244_v51 = vadd.f32 %v8228_v21, %v5208_v39  ;;  %v5245_v24 = vadd.f32 %v8228_v21, %v5209_v13  ;;  %v5284_v62 = vld [vmem:[%s6187_s13 + $0x48] sm:$0xff]  ;;  %v5283_v39 = vld [vmem:[%s6187_s13 + $0x40] sm:$0xff] }
 0x52c   : > { %v5337_v29 = vadd.f32 %v5305_v11, %v5273_v46  ;;  %v5246_v55 = vadd.f32 %v8228_v21, %v5210_v7  ;;  %v5247_v34 = vadd.f32 %v8228_v21, %v5211_v47  ;;  %v5248_v6 = vadd.f32 %v8228_v21, %v5212_v56 }
 0x52d   : > { %v5249_v48 = vadd.f32 %v8228_v21, %v5213_v54  ;;  %v5250_v18 = vadd.f32 %v8228_v21, %v5214_v44  ;;  %v5251_v1 = vadd.f32 %v8228_v21, %v5215_v19  ;;  %v5252_v22 = vadd.f32 %v8228_v21, %v5216_v57  ;;  %v5285_v54 = vld [vmem:[%s6187_s13 + $0x50] sm:$0xff]  ;;  %v5288_v44 = vld [vmem:[%s6187_s13 + $0x68] sm:$0xff] }
 0x52e   : > { %5369 = vst [vmem:[%s8255_s12 + $0xf0] sm:$0xff] %v5337_v29  ;;  %v5253_v40 = vadd.f32 %v8228_v21, %v5217_v33  ;;  %v5254_v42 = vadd.f32 %v8228_v21, %v5218_v52  ;;  %v5255_v43 = vadd.f32 %v8228_v21, %v5219_v25  ;;  %v5256_v10 = vadd.f32 %v8228_v21, %v5220_v38  ;;  %v5287_v25 = vld [vmem:[%s6187_s13 + $0x60] sm:$0xff]  ;;  %v5289_v38 = vld [vmem:[%s6187_s13 + $0x70] sm:$0xff] }
 0x52f   : > { %v5257_v23 = vadd.f32 %v8228_v21, %v5221_v36  ;;  %v5258_v8 = vadd.f32 %v8228_v21, %v5222_v37  ;;  %v8279_v50 = vadd.f32 %v8228_v21, %v5223_v9  ;;  %v8282_v61 = vadd.f32 %v8228_v21, %v5224_v30  ;;  %v5292_v30 = vld [vmem:[%s6187_s13 + $0x88] sm:$0xff] }
 0x530   : > { %v8285_v59 = vadd.f32 %v8228_v21, %v5225_v53  ;;  %v5262_v13 = vadd.f32 %v8228_v21, %v5226_v3  ;;  %v8292_v7 = vadd.f32 %v8228_v21, %v5227_v60  ;;  %v8295_v47 = vadd.f32 %v8228_v21, %v5228_v15  ;;  %v5291_v53 = vld [vmem:[%s6187_s13 + $0x80] sm:$0xff]  ;;  %v5294_v3 = vld [vmem:[%s6187_s13 + $0x98] sm:$0xff] }
 0x531   : > { %v8298_v56 = vadd.f32 %v8228_v21, %v5229_v35  ;;  %v8304_v19 = vadd.f32 %v8228_v21, %v5230_v31  ;;  %v8307_v57 = vadd.f32 %v8228_v21, %v5231_v49  ;;  %v8310_v33 = vadd.f32 %v8228_v21, %v5232_v28  ;;  %v5293_v31 = vld [vmem:[%s6187_s13 + $0x90] sm:$0xff]  ;;  %v5296_v49 = vld [vmem:[%s6187_s13 + $0xa8] sm:$0xff]  ;;  %v5295_v28 = vld [vmem:[%s6187_s13 + $0xa0] sm:$0xff] }
 0x532   : > { %v8313_v52 = vadd.f32 %v8228_v21, %v5233_v58  ;;  %v8319_v36 = vadd.f32 %v8228_v21, %v5234_v12  ;;  %v8322_v37 = vadd.f32 %v8228_v21, %v5235_v41  ;;  %v8325_v11 = vadd.f32 %v8228_v21, %v5236_v16  ;;  %v5298_v41 = vld [vmem:[%s6187_s13 + $0xb8] sm:$0xff]  ;;  %v5297_v16 = vld [vmem:[%s6187_s13 + $0xb0] sm:$0xff] }
 0x533   : > { %v8328_v9 = vadd.f32 %v8228_v21, %v5238_v0  ;;  %v5307_v46 = vadd.f32 %v5275_v63, %v5243_v27  ;;  %v5308_v60 = vadd.f32 %v5276_v14, %v5244_v51  ;;  %v5309_v15 = vadd.f32 %v5277_v26, %v5245_v24  ;;  %v5300_v0 = vld [vmem:[%s6187_s13 + $0xc8] sm:$0xff]  ;;  %v5303_v63 = vld [vmem:[%s6187_s13 + $0xe0] sm:$0xff] }
 0x534   : > { %v5310_v35 = vadd.f32 %v5278_v5, %v5246_v55  ;;  %v5311_v58 = vadd.f32 %v5279_v20, %v5247_v34  ;;  %v5312_v21 = vadd.f32 %v5280_v32, %v5248_v6  ;;  %v5313_v29 = vadd.f32 %v5281_v45, %v5249_v48  ;;  %v5299_v34 = vld [vmem:[%s6187_s13 + $0xc0] sm:$0xff]  ;;  %v5302_v6 = vld [vmem:[%s6187_s13 + $0xd8] sm:$0xff]  ;;  %v5301_v48 = vld [vmem:[%s6187_s13 + $0xd0] sm:$0xff] }
 0x535   : > { %v5314_v12 = vadd.f32 %v5282_v17, %v5250_v18  ;;  %v5315_v27 = vadd.f32 %v5283_v39, %v5251_v1  ;;  %v5316_v51 = vadd.f32 %v5284_v62, %v5252_v22  ;;  %v5317_v24 = vadd.f32 %v5285_v54, %v5253_v40  ;;  %5339 = vst [vmem:[%s8255_s12] sm:$0xff] %v5307_v46  ;;  %v5304_v14 = vld [vmem:[%s6187_s13 + $0xe8] sm:$0xff]  ;;  %v5306_v5 = vld [vmem:[%s6187_s13 + $0xf8] sm:$0xff] }
 0x536   : > { %v5318_v55 = vadd.f32 %v5286_v2, %v5254_v42  ;;  %5340 = vst [vmem:[%s8255_s12 + $0x8] sm:$0xff] %v5308_v60  ;;  %5341 = vst [vmem:[%s8255_s12 + $0x10] sm:$0xff] %v5309_v15  ;;  %v5319_v18 = vadd.f32 %v5287_v25, %v5255_v43  ;;  %v5320_v1 = vadd.f32 %v5288_v44, %v5256_v10 }
 0x537   : > { %5342 = vst [vmem:[%s8255_s12 + $0x18] sm:$0xff] %v5310_v35  ;;  %v5321_v22 = vadd.f32 %v5289_v38, %v5257_v23  ;;  %v5322_v40 = vadd.f32 %v5290_v4, %v5258_v8  ;;  %5343 = vst [vmem:[%s8255_s12 + $0x20] sm:$0xff] %v5311_v58  ;;  %v5323_v26 = vadd.f32 %v5291_v53, %v8279_v50 }
 0x538   : > { %5344 = vst [vmem:[%s8255_s12 + $0x28] sm:$0xff] %v5312_v21  ;;  %5345 = vst [vmem:[%s8255_s12 + $0x30] sm:$0xff] %v5313_v29  ;;  %v5324_v42 = vadd.f32 %v5292_v30, %v8282_v61  ;;  %v5325_v43 = vadd.f32 %v5293_v31, %v8285_v59  ;;  %v5326_v10 = vadd.f32 %v5294_v3, %v5262_v13 }
 0x539   : > { %5346 = vst [vmem:[%s8255_s12 + $0x38] sm:$0xff] %v5314_v12  ;;  %5347 = vst [vmem:[%s8255_s12 + $0x40] sm:$0xff] %v5315_v27  ;;  %v5327_v23 = vadd.f32 %v5295_v28, %v8292_v7  ;;  %v5328_v32 = vadd.f32 %v5296_v49, %v8295_v47  ;;  %v5329_v20 = vadd.f32 %v5297_v16, %v8298_v56 }
 0x53a   : > { %5348 = vst [vmem:[%s8255_s12 + $0x48] sm:$0xff] %v5316_v51  ;;  %5349 = vst [vmem:[%s8255_s12 + $0x50] sm:$0xff] %v5317_v24  ;;  %v5330_v17 = vadd.f32 %v5298_v41, %v8304_v19  ;;  %v5331_v8 = vadd.f32 %v5299_v34, %v8307_v57  ;;  %v5332_v50 = vadd.f32 %v5300_v0, %v8310_v33 }
 0x53b   : > { %5350 = vst [vmem:[%s8255_s12 + $0x58] sm:$0xff] %v5318_v55  ;;  %5351 = vst [vmem:[%s8255_s12 + $0x60] sm:$0xff] %v5319_v18  ;;  %v5333_v61 = vadd.f32 %v5301_v48, %v8313_v52  ;;  %v5334_v59 = vadd.f32 %v5302_v6, %v8319_v36  ;;  %v5335_v45 = vadd.f32 %v5303_v63, %v8322_v37 }
 0x53c   : > { %5352 = vst [vmem:[%s8255_s12 + $0x68] sm:$0xff] %v5320_v1  ;;  %5353 = vst [vmem:[%s8255_s12 + $0x70] sm:$0xff] %v5321_v22  ;;  %v5336_v62 = vadd.f32 %v5304_v14, %v8325_v11  ;;  %v5338_v39 = vadd.f32 %v5306_v5, %v8328_v9 }
 0x53d   : > { %5354 = vst [vmem:[%s8255_s12 + $0x78] sm:$0xff] %v5322_v40  ;;  %5355 = vst [vmem:[%s8255_s12 + $0x80] sm:$0xff] %v5323_v26 }
 0x53e   : > { %5356 = vst [vmem:[%s8255_s12 + $0x88] sm:$0xff] %v5324_v42  ;;  %5357 = vst [vmem:[%s8255_s12 + $0x90] sm:$0xff] %v5325_v43 }
 0x53f   : > { %5358 = vst [vmem:[%s8255_s12 + $0x98] sm:$0xff] %v5326_v10  ;;  %5359 = vst [vmem:[%s8255_s12 + $0xa0] sm:$0xff] %v5327_v23 }
 0x540   : > { %5360 = vst [vmem:[%s8255_s12 + $0xa8] sm:$0xff] %v5328_v32  ;;  %5361 = vst [vmem:[%s8255_s12 + $0xb0] sm:$0xff] %v5329_v20 }
 0x541   : > { %5362 = vst [vmem:[%s8255_s12 + $0xb8] sm:$0xff] %v5330_v17  ;;  %5363 = vst [vmem:[%s8255_s12 + $0xc0] sm:$0xff] %v5331_v8 }
 0x542   : > { %5364 = vst [vmem:[%s8255_s12 + $0xc8] sm:$0xff] %v5332_v50  ;;  %5365 = vst [vmem:[%s8255_s12 + $0xd0] sm:$0xff] %v5333_v61 }
 0x543   : > { %5366 = vst [vmem:[%s8255_s12 + $0xd8] sm:$0xff] %v5334_v59  ;;  %5367 = vst [vmem:[%s8255_s12 + $0xe0] sm:$0xff] %v5335_v45 }
 0x544   : > { %5368 = vst [vmem:[%s8255_s12 + $0xe8] sm:$0xff] %v5336_v62  ;;  %5370 = vst [vmem:[%s8255_s12 + $0xf8] sm:$0xff] %v5338_v39 }
 0x545   : > { %5949 = shalt.err (!%p5946_p3)
}
 0x546   : > { %s5950_s13 = scalar_lea.hbm %s8383_s11, 4096  ;;  %s5954_s9 = scalar_lea.hbm %s8449_s5, 8192 }
 0x547   : > { %p5951_p11 = scmp.ne.s32.totalorder %s8383_s11, %s5950_s13  ;;  %p5955_p4 = scmp.lt.s32.totalorder %s8383_s11, %s8449_s5 }
 0x548   : > { %p5956_p6 = scmp.lt.s32.totalorder %s5954_s9, %s5950_s13 }
 0x549   : > { %p5952_p9 = pnand %p5951_p11, %p8527_p2 }
 0x54a   : > { %p5957_p8 = por %p5956_p6, %p5955_p4 }
 0x54b   : > { %p5953_p1 = pneg %p5952_p9 }
 0x54d   : > { %p5958_p5 = pnand %p5957_p8, %p5953_p1 }
 0x54f   : > { %5961 = shalt.err (!%p5958_p5)
}
 0x550   : > { %s6013_s14 = smov 128   ;;  %s6014_s7 = smov 8  }
 0x551   : > { %5767 = dma.vmem_to_hbm [thread:$0]  (%p8527_p2), %s8387_s6, 4096, %s8383_s11, %s5372_s22, %s6013_s14, %s6013_s14, %s6014_s7  }
 0x552 PF: > { %s5400_s28 = sand.u32 1, %s5992_s18   ;;  %p8528_p7 = scmp.ne.s32.totalorder %s8476_s25, 0 }
 0x553   : > { %p8529_p12 = scmp.ge.s32.totalorder %s6004_s21, 2  ;;  %s5401_s17 = scalar_lea.sflag [#allocation6], %s5400_s28 }
 0x555   : > { %p5781_p13 = pnand %p8529_p12, %p8528_p7 }
 0x557   : > { %p5782_p0 = pneg %p5781_p13 }
 0x559   : > { %5987 = dma.done.wait (%p5782_p0), %s5401_s17, 4096  }
 0x55a   : > { %5989 = vsyncadd (%p5782_p0), %s5401_s17, 4294963200  ;;  %p19_p10 = scmp.ge.s32.totalorder %s6123_s15, 4   ;;  %s8530_s18 = smov %s5996_s19 }
 0x55b   : > { %s8531_s19 = smov %s6000_s20  ;;  %s8532_s20 = smov %s6139_s27 }
 0x55c   : > { %s8533_s21 = smov %s6123_s15  ;;  %21 = sbr.rel (!%p19_p10) target bundleno = 6 (0x6), region = 98 }
 0x561   :  { %5406 = vsyncpa [#allocation5], 1 }
 0x562   :  { %5408 = vsyncpa [#allocation5 + $0x1], 1 }
 0x563   :  { %5409 = vsyncpa [#allocation8], 1 }
 0x564   :  { %5410 = vsyncpa [#allocation6], 1 }
 0x565   :  { %5412 = vsyncpa [#allocation6 + $0x1], 1 }

</bundles_post_ra>
